<compile_context>
chip_gen: v7x
topology: tpu7x:2x2x1
jax: 0.10.0
libtpu: 0.0.40
codegen_flags: <defaults>
</compile_context>

<pallas_src>
import math
import functools

import jax
import jax.numpy as jnp
from jax.experimental import pallas as pl
from jax.experimental.pallas import tpu as pltpu


# ----------------------------------------------------------------------------
# In-kernel helpers (operate on VMEM-resident values)
# ----------------------------------------------------------------------------

def _mm(a, b):
    """MXU matmul: bf16 operands, f32 accumulation (astype is a no-op for the
    pre-cast bf16 weights)."""
    return jnp.dot(a.astype(jnp.bfloat16), b.astype(jnp.bfloat16),
                   preferred_element_type=jnp.float32)


def _mm_nt(a, b):
    """a @ b.T (contract the last dim of both operands), bf16 in / f32 out."""
    return jax.lax.dot_general(
        a.astype(jnp.bfloat16), b.astype(jnp.bfloat16),
        dimension_numbers=(((1,), (1,)), ((), ())),
        preferred_element_type=jnp.float32)


def _layernorm(x, g, b, eps):
    mu = jnp.mean(x, axis=-1, keepdims=True)
    var = jnp.mean(jnp.square(x - mu), axis=-1, keepdims=True)
    return (x - mu) * jax.lax.rsqrt(var + eps) * g + b


def _gelu_exact(x):
    # Matches torch.nn.GELU() default (erf form).  The tanh approximation would
    # route to the EUP on v6e/v7x but changes numerics, so we keep erf.
    return 0.5 * x * (1.0 + jax.lax.erf(x * (1.0 / math.sqrt(2.0))))


def _attention(q, k, v, wp, mask_ref, mask_batched, num_heads, bblk, t_q, t_kv,
               attw_ref):
    """Multi-head attention for `bblk` batch rows with the output projection
    folded into the head loop (no lane-dim concat of head slices).

    q: (bblk*t_q, P);  k, v: (bblk*t_kv, P);  wp: (P, C) bf16.
    attw_ref (optional): block (1, bblk, t_q, num_heads*t_kv); softmax weights
    are written as one lane-dense slab [head0 | head1 | ...].
    Returns the projected attention output (bblk*t_q, C) f32 (bias not added).
    """
    p = q.shape[-1]
    hd = p // num_heads
    scale = 1.0 / math.sqrt(hd)
    shared_masked = None if mask_batched else (mask_ref[0] > 0.5)
    rows = []
    for bi in range(bblk):                             # static unroll (tiny)
        qb = q[bi * t_q:(bi + 1) * t_q]
        kb = k[bi * t_kv:(bi + 1) * t_kv]
        vb = v[bi * t_kv:(bi + 1) * t_kv]
        masked = (mask_ref[bi] > 0.5) if mask_batched else shared_masked
        acc = None
        for h in range(num_heads):
            sl = slice(h * hd, (h + 1) * hd)
            att = _mm_nt(qb[:, sl], kb[:, sl]) * scale            # (t_q, t_kv)
            # Large finite negative instead of -inf: masked entries underflow
            # to exactly 0 after exp(); fully-masked rows stay NaN-free.
            att = jnp.where(masked, -1e30, att)
            amax = jnp.max(att, axis=-1, keepdims=True)
            e = jnp.exp(att - amax)
            w = e * pl.reciprocal(jnp.sum(e, axis=-1, keepdims=True),
                                  approx=True)
            if attw_ref is not None:
                attw_ref[0, bi, :, h * t_kv:(h + 1) * t_kv] = (
                    w.astype(attw_ref.dtype))
            yh = _mm(w, vb[:, sl])                                # (t_q, hd)
            contrib = _mm(yh, wp[sl, :])                          # (t_q, C)
            acc = contrib if acc is None else acc + contrib
        rows.append(acc)
    return rows[0] if bblk == 1 else jnp.concatenate(rows, axis=0)


# ----------------------------------------------------------------------------
# Fused decoder-stack kernel: grid = (batch_blocks, n_layers)
# ----------------------------------------------------------------------------

def _decoder_stack_kernel(*refs, num_heads, sm_batched, cm_batched, eps,
                          collect_attn):
    (x_ref, enc_ref, sm_ref, cm_ref,
     wqkv1_ref, bqkv1_ref, wp1_ref, bp1_ref,
     wq2_ref, bq2_ref, wkv2_ref, bkv2_ref, wp2_ref, bp2_ref,
     ln1g_ref, ln1b_ref, ln2g_ref, ln2b_ref, ln3g_ref, ln3b_ref,
     w1_ref, b1_ref, w2_ref, b2_ref, xo_ref) = refs[:25]
    dw_ref = refs[25] if collect_attn else None
    ew_ref = refs[26] if collect_attn else None

    bblk, t_dec, c = x_ref.shape
    s_enc = enc_ref.shape[1]
    p = wp1_ref.shape[1]

    # The x output block index is constant along the layer axis, so the block
    # stays resident in VMEM across all layers (carry).  Seed it at layer 0.
    @pl.when(pl.program_id(1) == 0)
    def _():
        xo_ref[...] = x_ref[...]

    x = xo_ref[...].astype(jnp.float32).reshape(bblk * t_dec, c)
    enc = enc_ref[...].astype(jnp.float32).reshape(bblk * s_enc, c)

    # ---- masked self-attention (fused QKV, out-proj folded into head loop) --
    qkv = _mm(x, wqkv1_ref[0]) + bqkv1_ref[0]                    # (R, 3P)
    a1 = _attention(qkv[:, :p], qkv[:, p:2 * p], qkv[:, 2 * p:], wp1_ref[0],
                    sm_ref, sm_batched, num_heads, bblk, t_dec, t_dec,
                    dw_ref) + bp1_ref[0]
    x1 = _layernorm(x + a1, ln1g_ref[0], ln1b_ref[0], eps)

    # ---- encoder-decoder attention (fused KV projection) ----
    q2 = _mm(x1, wq2_ref[0]) + bq2_ref[0]                        # (R, P)
    kv2 = _mm(enc, wkv2_ref[0]) + bkv2_ref[0]                    # (R_enc, 2P)
    a2 = _attention(q2, kv2[:, :p], kv2[:, p:], wp2_ref[0],
                    cm_ref, cm_batched, num_heads, bblk, t_dec, s_enc,
                    ew_ref) + bp2_ref[0]
    x2 = _layernorm(x1 + a2, ln2g_ref[0], ln2b_ref[0], eps)

    # ---- MLP, then x2 + ln3(x2 + mlp(x2))  (matches the reference exactly) --
    h = _gelu_exact(_mm(x2, w1_ref[0]) + b1_ref[0])              # (R, 4*d_model)
    m = _mm(h, w2_ref[0]) + b2_ref[0]                            # (R, C)
    x3 = x2 + _layernorm(x2 + m, ln3g_ref[0], ln3b_ref[0], eps)

    xo_ref[...] = x3.reshape(bblk, t_dec, c).astype(xo_ref.dtype)


# ----------------------------------------------------------------------------
# pallas_call wrapper
# ----------------------------------------------------------------------------

def _choose_batch_block(batch, t, row_target=256):
    """Largest divisor of `batch` whose rows-per-step (d*t) stays within a
    reasonable MXU tile, preferring >= 2 batch blocks so both v7x TensorCores
    (and the software pipeline) get work."""
    divisors = [d for d in range(1, batch + 1) if batch % d == 0]
    fitting = [d for d in divisors if d * t <= row_target] or [1]
    preferred = [d for d in fitting if batch // d >= 2]
    return max(preferred) if preferred else max(fitting)


def _normalize_mask(mask, s_kv, bblk):
    """Normalize a broadcastable attention mask (1 => masked) to (Bm, Tm, s_kv)
    with the head dim dropped, and build its BlockSpec for the
    (batch_block, layer) grid."""
    if mask is None:
        arr = jnp.zeros((1, 1, s_kv), jnp.float32)
    else:
        m = jnp.asarray(mask, jnp.float32)
        while m.ndim < 4:
            m = m[None]
        # TODO(synk): head-dependent masks are collapsed to head 0 (the
        # reference decoder only uses head-independent causal/padding masks).
        m = m[:, 0]                                    # (Bm, Tm, Sm)
        bm, tm, sm = m.shape
        if sm != s_kv:
            m = jnp.broadcast_to(m, (bm, tm, s_kv))
        arr = m
    bm, tm, _ = arr.shape
    batched = bm != 1
    if batched:
        spec = pl.BlockSpec((bblk, tm, s_kv), lambda bb, l: (bb, 0, 0))
    else:
        spec = pl.BlockSpec((1, tm, s_kv), lambda bb, l: (0, 0, 0))
    return arr, spec, batched


def _cost_estimate(B, T, S, C, P, D4, H, L):
    hd = P // H
    mm_flops = 2 * B * L * (T * C * 3 * P + T * P * C + T * C * P
                            + S * C * 2 * P + T * P * C
                            + T * C * D4 + T * D4 * C)
    attn_flops = 2 * B * L * H * hd * (2 * T * T + 2 * T * S)
    transcendentals = B * L * (H * (T * T + T * S) + T * D4)
    weight_bytes = 2 * L * (C * 3 * P + P * C + C * P + C * 2 * P + P * C
                            + C * D4 + D4 * C)                    # bf16 weights
    act_bytes = 4 * (2 * B * T * C + B * S * C + L * B * T * H * (T + S))
    return pl.CostEstimate(flops=int(mm_flops + attn_flops),
                           transcendentals=int(transcendentals),
                           bytes_accessed=int(weight_bytes + act_bytes))


def decoder_forward(params, idx, enc_out, look_ahead_mask=None,
                    dec_padding_mask=None, num_heads=4, batch_block=None,
                    collect_attn=True):
    B, T = idx.shape
    S = enc_out.shape[1]
    C = params["token_embds"].shape[1]
    L, _, P3 = params["Wqkv1"].shape
    P = P3 // 3
    D4 = params["W1"].shape[2]
    H = num_heads
    assert P % H == 0

    # Token-embedding gather + positional add kept as plain-JAX glue.
    x0 = (params["token_embds"][idx] + params["pos_emb"][:, :T, :]).astype(jnp.float32)
    enc = enc_out.astype(jnp.float32)

    bblk = _choose_batch_block(B, T) if batch_block is None else batch_block
    assert B % bblk == 0
    nbb = B // bblk

    sm, sm_spec, sm_batched = _normalize_mask(look_ahead_mask, T, bblk)
    cm, cm_spec, cm_batched = _normalize_mask(dec_padding_mask, S, bblk)

    # One-time bf16 cast of every matmul weight (halves weight DMA / VMEM and
    # removes repeated per-step f32->bf16 casts).  Biases / LN params stay f32.
    bf16 = lambda w: w.astype(jnp.bfloat16)

    def pls(*tail):   # per-layer-stacked operand: block (1, *tail), pick layer l
        return pl.BlockSpec((1,) + tail, lambda bb, l: (l,) + (0,) * len(tail))

    in_specs = [
        pl.BlockSpec((bblk, T, C), lambda bb, l: (bb, 0, 0)),   # x0
        pl.BlockSpec((bblk, S, C), lambda bb, l: (bb, 0, 0)),   # enc_out
        sm_spec, cm_spec,
        pls(C, 3 * P), pls(1, 3 * P),     # Wqkv1, bqkv1
        pls(P, C), pls(1, C),             # Wp1, bp1
        pls(C, P), pls(1, P),             # Wq2, bq2
        pls(C, 2 * P), pls(1, 2 * P),     # Wkv2, bkv2
        pls(P, C), pls(1, C),             # Wp2, bp2
        pls(1, C), pls(1, C),             # ln1 g/b
        pls(1, C), pls(1, C),             # ln2 g/b
        pls(1, C), pls(1, C),             # ln3 g/b
        pls(C, D4), pls(1, D4),           # W1, b1
        pls(D4, C), pls(1, C),            # W2, b2
    ]

    x_spec = pl.BlockSpec((bblk, T, C), lambda bb, l: (bb, 0, 0))
    if collect_attn:
        out_shape = (jax.ShapeDtypeStruct((B, T, C), jnp.float32),
                     jax.ShapeDtypeStruct((L, B, T, H * T), jnp.float32),
                     jax.ShapeDtypeStruct((L, B, T, H * S), jnp.float32))
        out_specs = (x_spec,
                     pl.BlockSpec((1, bblk, T, H * T), lambda bb, l: (l, bb, 0, 0)),
                     pl.BlockSpec((1, bblk, T, H * S), lambda bb, l: (l, bb, 0, 0)))
    else:
        out_shape = jax.ShapeDtypeStruct((B, T, C), jnp.float32)
        out_specs = x_spec

    kern = functools.partial(
        _decoder_stack_kernel, num_heads=H, sm_batched=sm_batched,
        cm_batched=cm_batched, eps=1e-5, collect_attn=collect_attn)

    outs = pl.pallas_call(
        kern,
        out_shape=out_shape,
        grid=(nbb, L),                     # layer axis innermost: x carried in VMEM
        in_specs=in_specs,
        out_specs=out_specs,
        compiler_params=pltpu.CompilerParams(
            # Batch blocks shard across TensorCores (megacore / v7x); the layer
            # axis is a sequential carry.  vmem_limit_bytes left at default for
            # this tiny model; raise it / tile the MLP over D4 when scaling up
            # (v7x has only 64 MiB VMEM).
            dimension_semantics=("parallel", "arbitrary")),
        cost_estimate=_cost_estimate(B, T, S, C, P, D4, H, L),
    )(
        x0, enc, sm, cm,
        bf16(params["Wqkv1"]), params["bqkv1"], bf16(params["Wp1"]), params["bp1"],
        bf16(params["Wq2"]), params["bq2"], bf16(params["Wkv2"]), params["bkv2"],
        bf16(params["Wp2"]), params["bp2"],
        params["ln1_g"], params["ln1_b"], params["ln2_g"], params["ln2_b"],
        params["ln3_g"], params["ln3_b"],
        bf16(params["W1"]), params["b1"], bf16(params["W2"]), params["b2"],
    )

    attn_weights = {}
    if collect_attn:
        x_out, dw_all, ew_all = outs
        for i in range(L):
            attn_weights[f"decoder_block_{i}"] = (
                dw_all[i].reshape(B, T, H, T).transpose(0, 2, 1, 3))
            attn_weights[f"encoder_decoder_block_{i}"] = (
                ew_all[i].reshape(B, T, H, S).transpose(0, 2, 1, 3))
    else:
        x_out = outs
    return x_out, attn_weights


# ----------------------------------------------------------------------------
# Deterministic parameter construction (PyTorch-default-style init),
# per-layer tensors stacked on a leading layer axis.
# ----------------------------------------------------------------------------

def _linear_init(key, fan_in, fan_out):
    kw, kb = jax.random.split(key)
    lim = 1.0 / math.sqrt(fan_in)
    w = jax.random.uniform(kw, (fan_in, fan_out), jnp.float32, -lim, lim)
    b = jax.random.uniform(kb, (1, fan_out), jnp.float32, -lim, lim)
    return w, b


def make_params(key, *, vocab_size, block_size, n_embd, proj_size, d_model,
                n_layers):
    keys = jax.random.split(key, 1 + n_layers)
    names = ["Wqkv1", "bqkv1", "Wp1", "bp1", "Wq2", "bq2", "Wkv2", "bkv2",
             "Wp2", "bp2", "W1", "b1", "W2", "b2",
             "ln1_g", "ln1_b", "ln2_g", "ln2_b", "ln3_g", "ln3_b"]
    per_layer = {n: [] for n in names}
    ones = jnp.ones((1, n_embd), jnp.float32)
    zeros = jnp.zeros((1, n_embd), jnp.float32)
    for li in range(n_layers):
        ks = jax.random.split(keys[1 + li], 10)
        wq1, bq1 = _linear_init(ks[0], n_embd, proj_size)
        wk1, bk1 = _linear_init(ks[1], n_embd, proj_size)
        wv1, bv1 = _linear_init(ks[2], n_embd, proj_size)
        wp1, bp1 = _linear_init(ks[3], proj_size, n_embd)
        wq2, bq2 = _linear_init(ks[4], n_embd, proj_size)
        wk2, bk2 = _linear_init(ks[5], n_embd, proj_size)
        wv2, bv2 = _linear_init(ks[6], n_embd, proj_size)
        wp2, bp2 = _linear_init(ks[7], proj_size, n_embd)
        w1, b1 = _linear_init(ks[8], n_embd, 4 * d_model)
        w2, b2 = _linear_init(ks[9], 4 * d_model, n_embd)
        vals = dict(
            Wqkv1=jnp.concatenate([wq1, wk1, wv1], axis=1),
            bqkv1=jnp.concatenate([bq1, bk1, bv1], axis=1),
            Wp1=wp1, bp1=bp1, Wq2=wq2, bq2=bq2,
            Wkv2=jnp.concatenate([wk2, wv2], axis=1),
            bkv2=jnp.concatenate([bk2, bv2], axis=1),
            Wp2=wp2, bp2=bp2, W1=w1, b1=b1, W2=w2, b2=b2,
            ln1_g=ones, ln1_b=zeros, ln2_g=ones, ln2_b=zeros,
            ln3_g=ones, ln3_b=zeros)
        for n in names:
            per_layer[n].append(vals[n])
    params = {
        "token_embds": jax.random.normal(keys[0], (vocab_size, n_embd), jnp.float32),
        "pos_emb": jnp.zeros((1, block_size, n_embd), jnp.float32),
    }
    params.update({n: jnp.stack(per_layer[n]) for n in names})
    return params


# ----------------------------------------------------------------------------
# Pure-JAX f32 reference (mirrors the PyTorch module, eval mode)
# ----------------------------------------------------------------------------

def _reference_forward(params, idx, enc_out, look_ahead_mask, dec_padding_mask,
                       num_heads):
    eps = 1e-5
    T = idx.shape[1]
    P = params["Wp1"].shape[1]
    L = params["Wqkv1"].shape[0]

    def ln(x, g, b):
        mu = jnp.mean(x, -1, keepdims=True)
        var = jnp.mean(jnp.square(x - mu), -1, keepdims=True)
        return (x - mu) * jax.lax.rsqrt(var + eps) * g + b

    def mha(xq, xkv, wq, bq, wk, bk, wv, bv, wp, bp, mask):
        q = xq @ wq + bq
        k = xkv @ wk + bk
        v = xkv @ wv + bv
        Bq, Tq, _ = q.shape
        H = num_heads
        hd = P // H
        q = q.reshape(Bq, Tq, H, hd).transpose(0, 2, 1, 3)
        k = k.reshape(Bq, -1, H, hd).transpose(0, 2, 1, 3)
        v = v.reshape(Bq, -1, H, hd).transpose(0, 2, 1, 3)
        att = jnp.einsum("bhqd,bhkd->bhqk", q, k) / math.sqrt(hd)
        if mask is not None:
            att = jnp.where(mask == 1, -1e30, att)
        w = jax.nn.softmax(att, axis=-1)
        y = jnp.einsum("bhqk,bhkd->bhqd", w, v)
        y = y.transpose(0, 2, 1, 3).reshape(Bq, Tq, P)
        return y @ wp + bp, w

    x = params["token_embds"][idx] + params["pos_emb"][:, :T, :]
    attn = {}
    for l in range(L):
        Wqkv, bqkv = params["Wqkv1"][l], params["bqkv1"][l]
        a1, dw = mha(x, x,
                     Wqkv[:, :P], bqkv[:, :P], Wqkv[:, P:2 * P], bqkv[:, P:2 * P],
                     Wqkv[:, 2 * P:], bqkv[:, 2 * P:],
                     params["Wp1"][l], params["bp1"][l], look_ahead_mask)
        x = ln(x + a1, params["ln1_g"][l], params["ln1_b"][l])
        Wkv, bkv = params["Wkv2"][l], params["bkv2"][l]
        a2, ew = mha(x, enc_out,
                     params["Wq2"][l], params["bq2"][l],
                     Wkv[:, :P], bkv[:, :P], Wkv[:, P:], bkv[:, P:],
                     params["Wp2"][l], params["bp2"][l], dec_padding_mask)
        x = ln(x + a2, params["ln2_g"][l], params["ln2_b"][l])
        h_pre = x @ params["W1"][l] + params["b1"][l]
        h = 0.5 * h_pre * (1.0 + jax.lax.erf(h_pre / math.sqrt(2.0)))
        m = h @ params["W2"][l] + params["b2"][l]
        x = x + ln(x + m, params["ln3_g"][l], params["ln3_b"][l])
        attn[f"decoder_block_{l}"] = dw
        attn[f"encoder_decoder_block_{l}"] = ew
    return x, attn


# ----------------------------------------------------------------------------
# Demo
# ----------------------------------------------------------------------------

if __name__ == "__main__":
    # config
    vocab_size, block_size = 50, 16
    n_embd, proj_size, d_model = 32, 32, 32
    num_heads, n_layers = 4, 2
    B, T, S = 4, 8, 8

    key = jax.random.PRNGKey(0)
    k_par, k_idx, k_enc = jax.random.split(key, 3)

    params = make_params(k_par, vocab_size=vocab_size, block_size=block_size,
                         n_embd=n_embd, proj_size=proj_size, d_model=d_model,
                         n_layers=n_layers)

    idx = jax.random.randint(k_idx, (B, T), 0, vocab_size)
    enc_out = jax.random.normal(k_enc, (B, S, n_embd), jnp.float32)

    # look-ahead (causal) mask: 1 == masked, broadcastable to (B,H,T,T)
    look_ahead_mask = jnp.triu(jnp.ones((T, T), jnp.float32), k=1).reshape(1, 1, T, T)
    # decoder padding mask over encoder positions: mask last enc token of batch 1
    dec_padding_mask = jnp.zeros((B, 1, 1, S), jnp.float32).at[1, 0, 0, S - 1].set(1.0)

    fwd = jax.jit(decoder_forward,
                  static_argnames=("num_heads", "batch_block", "collect_attn"))
    x_out, attn_w = fwd(params, idx, enc_out,
                        look_ahead_mask=look_ahead_mask,
                        dec_padding_mask=dec_padding_mask,
                        num_heads=num_heads)
    jax.block_until_ready((x_out, attn_w))

    # shape / sanity checks
    assert x_out.shape == (B, T, n_embd)
    assert attn_w["decoder_block_0"].shape == (B, num_heads, T, T)
    assert attn_w["encoder_decoder_block_0"].shape == (B, num_heads, T, S)
    assert bool(jnp.all(jnp.isfinite(x_out)))
    # causal: first query position can only attend to position 0
    assert bool(attn_w["decoder_block_0"][0, 0, 0, 0] > 0.99)
    # padding: the masked encoder position gets ~0 weight for batch 1
    assert bool(jnp.max(attn_w["encoder_decoder_block_1"][1, :, :, S - 1]) < 1e-6)

    # pure-JAX f32 reference check (kernel uses bf16 MXU operands + approx
    # reciprocal, so tolerances are loose but catch any structural error)
    x_ref, attn_ref = _reference_forward(params, idx, enc_out, look_ahead_mask,
                                         dec_padding_mask, num_heads)
    assert float(jnp.max(jnp.abs(x_out - x_ref))) < 0.2
    assert float(jnp.max(jnp.abs(attn_w["decoder_block_1"]
                                 - attn_ref["decoder_block_1"]))) < 0.1
    assert float(jnp.max(jnp.abs(attn_w["encoder_decoder_block_1"]
                                 - attn_ref["encoder_decoder_block_1"]))) < 0.1

    print("KERNEL_OK")
</pallas_src>

<mosaic_0001>
module attributes {stable_mosaic.version = 11 : i64} {
  func.func @_decoder_stack_kernel(%arg0: i32, %arg1: i32, %arg2: memref<2x8x32xf32, #tpu.memory_space<vmem>>, %arg3: memref<2x8x32xf32, #tpu.memory_space<vmem>>, %arg4: memref<1x8x8xf32, #tpu.memory_space<vmem>>, %arg5: memref<2x1x8xf32, #tpu.memory_space<vmem>>, %arg6: memref<1x32x96xbf16, #tpu.memory_space<vmem>>, %arg7: memref<1x1x96xf32, #tpu.memory_space<vmem>>, %arg8: memref<1x32x32xbf16, #tpu.memory_space<vmem>>, %arg9: memref<1x1x32xf32, #tpu.memory_space<vmem>>, %arg10: memref<1x32x32xbf16, #tpu.memory_space<vmem>>, %arg11: memref<1x1x32xf32, #tpu.memory_space<vmem>>, %arg12: memref<1x32x64xbf16, #tpu.memory_space<vmem>>, %arg13: memref<1x1x64xf32, #tpu.memory_space<vmem>>, %arg14: memref<1x32x32xbf16, #tpu.memory_space<vmem>>, %arg15: memref<1x1x32xf32, #tpu.memory_space<vmem>>, %arg16: memref<1x1x32xf32, #tpu.memory_space<vmem>>, %arg17: memref<1x1x32xf32, #tpu.memory_space<vmem>>, %arg18: memref<1x1x32xf32, #tpu.memory_space<vmem>>, %arg19: memref<1x1x32xf32, #tpu.memory_space<vmem>>, %arg20: memref<1x1x32xf32, #tpu.memory_space<vmem>>, %arg21: memref<1x1x32xf32, #tpu.memory_space<vmem>>, %arg22: memref<1x32x128xbf16, #tpu.memory_space<vmem>>, %arg23: memref<1x1x128xf32, #tpu.memory_space<vmem>>, %arg24: memref<1x128x32xbf16, #tpu.memory_space<vmem>>, %arg25: memref<1x1x32xf32, #tpu.memory_space<vmem>>, %arg26: memref<2x8x32xf32, #tpu.memory_space<vmem>>, %arg27: memref<1x2x8x32xf32, #tpu.memory_space<vmem>>, %arg28: memref<1x2x8x32xf32, #tpu.memory_space<vmem>>) attributes {dimension_semantics = [#tpu.dimension_semantics<parallel>, #tpu.dimension_semantics<arbitrary>], iteration_bounds = array<i64: 2, 2>, scalar_prefetch = 0 : i64, scratch_operands = 0 : i64, tpu.core_type = #tpu.core_type<tc>, window_params = [{transform_indices = @transform_0, window_bounds = array<i64: 2, 8, 32>}, {transform_indices = @transform_1, window_bounds = array<i64: 2, 8, 32>}, {pipeline_mode = #tpu.pipeline_mode<synchronous>, transform_indices = @transform_2, window_bounds = array<i64: 1, 8, 8>}, {transform_indices = @transform_3, window_bounds = array<i64: 2, 1, 8>}, {transform_indices = @transform_4, window_bounds = array<i64: 1, 32, 96>}, {transform_indices = @transform_5, window_bounds = array<i64: 1, 1, 96>}, {transform_indices = @transform_6, window_bounds = array<i64: 1, 32, 32>}, {transform_indices = @transform_7, window_bounds = array<i64: 1, 1, 32>}, {transform_indices = @transform_8, window_bounds = array<i64: 1, 32, 32>}, {transform_indices = @transform_9, window_bounds = array<i64: 1, 1, 32>}, {transform_indices = @transform_10, window_bounds = array<i64: 1, 32, 64>}, {transform_indices = @transform_11, window_bounds = array<i64: 1, 1, 64>}, {transform_indices = @transform_12, window_bounds = array<i64: 1, 32, 32>}, {transform_indices = @transform_13, window_bounds = array<i64: 1, 1, 32>}, {transform_indices = @transform_14, window_bounds = array<i64: 1, 1, 32>}, {transform_indices = @transform_15, window_bounds = array<i64: 1, 1, 32>}, {transform_indices = @transform_16, window_bounds = array<i64: 1, 1, 32>}, {transform_indices = @transform_17, window_bounds = array<i64: 1, 1, 32>}, {transform_indices = @transform_18, window_bounds = array<i64: 1, 1, 32>}, {transform_indices = @transform_19, window_bounds = array<i64: 1, 1, 32>}, {transform_indices = @transform_20, window_bounds = array<i64: 1, 32, 128>}, {transform_indices = @transform_21, window_bounds = array<i64: 1, 1, 128>}, {transform_indices = @transform_22, window_bounds = array<i64: 1, 128, 32>}, {transform_indices = @transform_23, window_bounds = array<i64: 1, 1, 32>}, {transform_indices = @transform_24, window_bounds = array<i64: 2, 8, 32>}, {transform_indices = @transform_25, window_bounds = array<i64: 1, 2, 8, 32>}, {transform_indices = @transform_26, window_bounds = array<i64: 1, 2, 8, 32>}]} {
    %c0_i32 = arith.constant 0 : i32
    %0 = arith.cmpi eq, %arg1, %c0_i32 : i32
    %1 = arith.extui %0 : i1 to i32
    %c0_i32_0 = arith.constant 0 : i32
    %2 = arith.cmpi ne, %1, %c0_i32_0 : i32
    scf.if %2 {
      %c0_275 = arith.constant 0 : index
      %c0_276 = arith.constant 0 : index
      %c0_277 = arith.constant 0 : index
      %674 = vector.load %arg2[%c0_275, %c0_276, %c0_277] : memref<2x8x32xf32, #tpu.memory_space<vmem>>, vector<2x8x32xf32>
      %c0_278 = arith.constant 0 : index
      %c0_279 = arith.constant 0 : index
      %c0_280 = arith.constant 0 : index
      %675 = vector.load %arg26[%c0_278, %c0_279, %c0_280] : memref<2x8x32xf32, #tpu.memory_space<vmem>>, vector<2x8x32xf32>
      tpu.vector_store %arg26[%c0_278, %c0_279, %c0_280], %674 {strides = array<i32>} : memref<2x8x32xf32, #tpu.memory_space<vmem>>, vector<2x8x32xf32>,
    } else {
    }
    %c0 = arith.constant 0 : index
    %c0_1 = arith.constant 0 : index
    %c0_2 = arith.constant 0 : index
    %3 = vector.load %arg26[%c0, %c0_1, %c0_2] : memref<2x8x32xf32, #tpu.memory_space<vmem>>, vector<2x8x32xf32>
    %4 = vector.shape_cast %3 : vector<2x8x32xf32> to vector<16x32xf32>
    %c0_3 = arith.constant 0 : index
    %c0_4 = arith.constant 0 : index
    %c0_5 = arith.constant 0 : index
    %5 = vector.load %arg3[%c0_3, %c0_4, %c0_5] : memref<2x8x32xf32, #tpu.memory_space<vmem>>, vector<2x8x32xf32>
    %6 = vector.shape_cast %5 : vector<2x8x32xf32> to vector<16x32xf32>
    %c0_6 = arith.constant 0 : index
    %c0_7 = arith.constant 0 : index
    %c0_8 = arith.constant 0 : index
    %7 = vector.load %arg6[%c0_6, %c0_7, %c0_8] : memref<1x32x96xbf16, #tpu.memory_space<vmem>>, vector<1x32x96xbf16>
    %8 = vector.shape_cast %7 : vector<1x32x96xbf16> to vector<32x96xbf16>
    %9 = arith.truncf %4 : vector<16x32xf32> to vector<16x32xbf16>
    %cst = arith.constant dense<0.000000e+00> : vector<16x96xf32>
    %10 = tpu.matmul %9, %8, %cst {dimension_numbers = #tpu.dot_dimension_numbers<[1], [0], [0], [1], [0, 0, 1, 1], [], []>} : vector<16x32xbf16>, vector<32x96xbf16>, vector<16x96xf32> -> vector<16x96xf32>
    %c0_9 = arith.constant 0 : index
    %c0_10 = arith.constant 0 : index
    %c0_11 = arith.constant 0 : index
    %11 = vector.load %arg7[%c0_9, %c0_10, %c0_11] : memref<1x1x96xf32, #tpu.memory_space<vmem>>, vector<1x1x96xf32>
    %12 = vector.shape_cast %11 : vector<1x1x96xf32> to vector<1x96xf32>
    %13 = vector.broadcast %12 : vector<1x96xf32> to vector<16x96xf32>
    %14 = arith.addf %10, %13 : vector<16x96xf32>
    %15 = vector.extract_strided_slice %14 {offsets = [0, 0], sizes = [16, 32], strides = [1, 1]} : vector<16x96xf32> to vector<16x32xf32>
    %16 = vector.extract_strided_slice %14 {offsets = [0, 32], sizes = [16, 32], strides = [1, 1]} : vector<16x96xf32> to vector<16x32xf32>
    %17 = vector.extract_strided_slice %14 {offsets = [0, 64], sizes = [16, 32], strides = [1, 1]} : vector<16x96xf32> to vector<16x32xf32>
    %c0_12 = arith.constant 0 : index
    %c0_13 = arith.constant 0 : index
    %c0_14 = arith.constant 0 : index
    %18 = vector.load %arg8[%c0_12, %c0_13, %c0_14] : memref<1x32x32xbf16, #tpu.memory_space<vmem>>, vector<1x32x32xbf16>
    %19 = vector.shape_cast %18 : vector<1x32x32xbf16> to vector<32x32xbf16>
    %c0_15 = arith.constant 0 : index
    %c0_16 = arith.constant 0 : index
    %c0_17 = arith.constant 0 : index
    %20 = vector.load %arg4[%c0_15, %c0_16, %c0_17] : memref<1x8x8xf32, #tpu.memory_space<vmem>>, vector<1x8x8xf32>
    %21 = vector.shape_cast %20 : vector<1x8x8xf32> to vector<8x8xf32>
    %cst_18 = arith.constant 5.000000e-01 : f32
    %22 = vector.broadcast %cst_18 : f32 to vector<8x8xf32>
    %23 = arith.cmpf ogt, %21, %22 : vector<8x8xf32>
    %24 = vector.extract_strided_slice %15 {offsets = [0, 0], sizes = [8, 32], strides = [1, 1]} : vector<16x32xf32> to vector<8x32xf32>
    %25 = vector.extract_strided_slice %16 {offsets = [0, 0], sizes = [8, 32], strides = [1, 1]} : vector<16x32xf32> to vector<8x32xf32>
    %26 = vector.extract_strided_slice %17 {offsets = [0, 0], sizes = [8, 32], strides = [1, 1]} : vector<16x32xf32> to vector<8x32xf32>
    %27 = vector.extract_strided_slice %24 {offsets = [0, 0], sizes = [8, 8], strides = [1, 1]} : vector<8x32xf32> to vector<8x8xf32>
    %28 = vector.extract_strided_slice %25 {offsets = [0, 0], sizes = [8, 8], strides = [1, 1]} : vector<8x32xf32> to vector<8x8xf32>
    %29 = arith.truncf %27 : vector<8x8xf32> to vector<8x8xbf16>
    %30 = arith.truncf %28 : vector<8x8xf32> to vector<8x8xbf16>
    %cst_19 = arith.constant dense<0.000000e+00> : vector<8x8xf32>
    %31 = tpu.matmul %29, %30, %cst_19 {dimension_numbers = #tpu.dot_dimension_numbers<[1], [1], [0], [0], [0, 0, 1, 0], [], []>} : vector<8x8xbf16>, vector<8x8xbf16>, vector<8x8xf32> -> vector<8x8xf32>
    %cst_20 = arith.constant 0.353553385 : f32
    %32 = vector.broadcast %cst_20 : f32 to vector<8x8xf32>
    %33 = arith.mulf %31, %32 : vector<8x8xf32>
    %cst_21 = arith.constant -1.000000e+30 : f32
    %34 = vector.broadcast %cst_21 : f32 to vector<8x8xf32>
    %35 = arith.select %23, %34, %33 : vector<8x8xi1>, vector<8x8xf32>
    %cst_22 = arith.constant dense<0xFF800000> : vector<8xf32>
    %36 = vector.multi_reduction <maximumf>, %35, %cst_22 [1] : vector<8x8xf32> to vector<8xf32>
    %37 = vector.shape_cast %36 : vector<8xf32> to vector<8x1xf32>
    %38 = vector.broadcast %37 : vector<8x1xf32> to vector<8x8xf32>
    %39 = arith.subf %35, %38 : vector<8x8xf32>
    %40 = math.exp %39 : vector<8x8xf32>
    %cst_23 = arith.constant dense<0.000000e+00> : vector<8xf32>
    %41 = vector.multi_reduction <add>, %40, %cst_23 [1] : vector<8x8xf32> to vector<8xf32>
    %42 = vector.shape_cast %41 : vector<8xf32> to vector<8x1xf32>
    %43 = tpu.reciprocal %42 {approx = true} : vector<8x1xf32> -> vector<8x1xf32>
    %44 = vector.broadcast %43 : vector<8x1xf32> to vector<8x8xf32>
    %45 = arith.mulf %40, %44 : vector<8x8xf32>
    %c0_24 = arith.constant 0 : index
    %c0_25 = arith.constant 0 : index
    %c0_26 = arith.constant 0 : index
    %c0_27 = arith.constant 0 : index
    %46 = vector.load %arg27[%c0_24, %c0_25, %c0_26, %c0_27] : memref<1x2x8x32xf32, #tpu.memory_space<vmem>>, vector<1x1x8x8xf32>
    %47 = vector.shape_cast %46 : vector<1x1x8x8xf32> to vector<8x8xf32>
    %48 = vector.shape_cast %45 : vector<8x8xf32> to vector<1x1x8x8xf32>
    tpu.vector_store %arg27[%c0_24, %c0_25, %c0_26, %c0_27], %48 {strides = array<i32>} : memref<1x2x8x32xf32, #tpu.memory_space<vmem>>, vector<1x1x8x8xf32>,
    %49 = vector.extract_strided_slice %26 {offsets = [0, 0], sizes = [8, 8], strides = [1, 1]} : vector<8x32xf32> to vector<8x8xf32>
    %50 = arith.truncf %45 : vector<8x8xf32> to vector<8x8xbf16>
    %51 = arith.truncf %49 : vector<8x8xf32> to vector<8x8xbf16>
    %cst_28 = arith.constant dense<0.000000e+00> : vector<8x8xf32>
    %52 = tpu.matmul %50, %51, %cst_28 {dimension_numbers = #tpu.dot_dimension_numbers<[1], [0], [0], [1], [0, 0, 1, 1], [], []>} : vector<8x8xbf16>, vector<8x8xbf16>, vector<8x8xf32> -> vector<8x8xf32>
    %53 = vector.extract_strided_slice %19 {offsets = [0, 0], sizes = [8, 32], strides = [1, 1]} : vector<32x32xbf16> to vector<8x32xbf16>
    %54 = arith.truncf %52 : vector<8x8xf32> to vector<8x8xbf16>
    %cst_29 = arith.constant dense<0.000000e+00> : vector<8x32xf32>
    %55 = tpu.matmul %54, %53, %cst_29 {dimension_numbers = #tpu.dot_dimension_numbers<[1], [0], [0], [1], [0, 0, 1, 1], [], []>} : vector<8x8xbf16>, vector<8x32xbf16>, vector<8x32xf32> -> vector<8x32xf32>
    %56 = vector.extract_strided_slice %24 {offsets = [0, 8], sizes = [8, 8], strides = [1, 1]} : vector<8x32xf32> to vector<8x8xf32>
    %57 = vector.extract_strided_slice %25 {offsets = [0, 8], sizes = [8, 8], strides = [1, 1]} : vector<8x32xf32> to vector<8x8xf32>
    %58 = arith.truncf %56 : vector<8x8xf32> to vector<8x8xbf16>
    %59 = arith.truncf %57 : vector<8x8xf32> to vector<8x8xbf16>
    %cst_30 = arith.constant dense<0.000000e+00> : vector<8x8xf32>
    %60 = tpu.matmul %58, %59, %cst_30 {dimension_numbers = #tpu.dot_dimension_numbers<[1], [1], [0], [0], [0, 0, 1, 0], [], []>} : vector<8x8xbf16>, vector<8x8xbf16>, vector<8x8xf32> -> vector<8x8xf32>
    %cst_31 = arith.constant 0.353553385 : f32
    %61 = vector.broadcast %cst_31 : f32 to vector<8x8xf32>
    %62 = arith.mulf %60, %61 : vector<8x8xf32>
    %cst_32 = arith.constant -1.000000e+30 : f32
    %63 = vector.broadcast %cst_32 : f32 to vector<8x8xf32>
    %64 = arith.select %23, %63, %62 : vector<8x8xi1>, vector<8x8xf32>
    %cst_33 = arith.constant dense<0xFF800000> : vector<8xf32>
    %65 = vector.multi_reduction <maximumf>, %64, %cst_33 [1] : vector<8x8xf32> to vector<8xf32>
    %66 = vector.shape_cast %65 : vector<8xf32> to vector<8x1xf32>
    %67 = vector.broadcast %66 : vector<8x1xf32> to vector<8x8xf32>
    %68 = arith.subf %64, %67 : vector<8x8xf32>
    %69 = math.exp %68 : vector<8x8xf32>
    %cst_34 = arith.constant dense<0.000000e+00> : vector<8xf32>
    %70 = vector.multi_reduction <add>, %69, %cst_34 [1] : vector<8x8xf32> to vector<8xf32>
    %71 = vector.shape_cast %70 : vector<8xf32> to vector<8x1xf32>
    %72 = tpu.reciprocal %71 {approx = true} : vector<8x1xf32> -> vector<8x1xf32>
    %73 = vector.broadcast %72 : vector<8x1xf32> to vector<8x8xf32>
    %74 = arith.mulf %69, %73 : vector<8x8xf32>
    %c0_35 = arith.constant 0 : index
    %c0_36 = arith.constant 0 : index
    %c0_37 = arith.constant 0 : index
    %c8 = arith.constant 8 : index
    %75 = vector.load %arg27[%c0_35, %c0_36, %c0_37, %c8] : memref<1x2x8x32xf32, #tpu.memory_space<vmem>>, vector<1x1x8x8xf32>
    %76 = vector.shape_cast %75 : vector<1x1x8x8xf32> to vector<8x8xf32>
    %77 = vector.shape_cast %74 : vector<8x8xf32> to vector<1x1x8x8xf32>
    tpu.vector_store %arg27[%c0_35, %c0_36, %c0_37, %c8], %77 {strides = array<i32>} : memref<1x2x8x32xf32, #tpu.memory_space<vmem>>, vector<1x1x8x8xf32>,
    %78 = vector.extract_strided_slice %26 {offsets = [0, 8], sizes = [8, 8], strides = [1, 1]} : vector<8x32xf32> to vector<8x8xf32>
    %79 = arith.truncf %74 : vector<8x8xf32> to vector<8x8xbf16>
    %80 = arith.truncf %78 : vector<8x8xf32> to vector<8x8xbf16>
    %cst_38 = arith.constant dense<0.000000e+00> : vector<8x8xf32>
    %81 = tpu.matmul %79, %80, %cst_38 {dimension_numbers = #tpu.dot_dimension_numbers<[1], [0], [0], [1], [0, 0, 1, 1], [], []>} : vector<8x8xbf16>, vector<8x8xbf16>, vector<8x8xf32> -> vector<8x8xf32>
    %82 = vector.extract_strided_slice %19 {offsets = [8, 0], sizes = [8, 32], strides = [1, 1]} : vector<32x32xbf16> to vector<8x32xbf16>
    %83 = arith.truncf %81 : vector<8x8xf32> to vector<8x8xbf16>
    %cst_39 = arith.constant dense<0.000000e+00> : vector<8x32xf32>
    %84 = tpu.matmul %83, %82, %cst_39 {dimension_numbers = #tpu.dot_dimension_numbers<[1], [0], [0], [1], [0, 0, 1, 1], [], []>} : vector<8x8xbf16>, vector<8x32xbf16>, vector<8x32xf32> -> vector<8x32xf32>
    %85 = arith.addf %55, %84 : vector<8x32xf32>
    %86 = vector.extract_strided_slice %24 {offsets = [0, 16], sizes = [8, 8], strides = [1, 1]} : vector<8x32xf32> to vector<8x8xf32>
    %87 = vector.extract_strided_slice %25 {offsets = [0, 16], sizes = [8, 8], strides = [1, 1]} : vector<8x32xf32> to vector<8x8xf32>
    %88 = arith.truncf %86 : vector<8x8xf32> to vector<8x8xbf16>
    %89 = arith.truncf %87 : vector<8x8xf32> to vector<8x8xbf16>
    %cst_40 = arith.constant dense<0.000000e+00> : vector<8x8xf32>
    %90 = tpu.matmul %88, %89, %cst_40 {dimension_numbers = #tpu.dot_dimension_numbers<[1], [1], [0], [0], [0, 0, 1, 0], [], []>} : vector<8x8xbf16>, vector<8x8xbf16>, vector<8x8xf32> -> vector<8x8xf32>
    %cst_41 = arith.constant 0.353553385 : f32
    %91 = vector.broadcast %cst_41 : f32 to vector<8x8xf32>
    %92 = arith.mulf %90, %91 : vector<8x8xf32>
    %cst_42 = arith.constant -1.000000e+30 : f32
    %93 = vector.broadcast %cst_42 : f32 to vector<8x8xf32>
    %94 = arith.select %23, %93, %92 : vector<8x8xi1>, vector<8x8xf32>
    %cst_43 = arith.constant dense<0xFF800000> : vector<8xf32>
    %95 = vector.multi_reduction <maximumf>, %94, %cst_43 [1] : vector<8x8xf32> to vector<8xf32>
    %96 = vector.shape_cast %95 : vector<8xf32> to vector<8x1xf32>
    %97 = vector.broadcast %96 : vector<8x1xf32> to vector<8x8xf32>
    %98 = arith.subf %94, %97 : vector<8x8xf32>
    %99 = math.exp %98 : vector<8x8xf32>
    %cst_44 = arith.constant dense<0.000000e+00> : vector<8xf32>
    %100 = vector.multi_reduction <add>, %99, %cst_44 [1] : vector<8x8xf32> to vector<8xf32>
    %101 = vector.shape_cast %100 : vector<8xf32> to vector<8x1xf32>
    %102 = tpu.reciprocal %101 {approx = true} : vector<8x1xf32> -> vector<8x1xf32>
    %103 = vector.broadcast %102 : vector<8x1xf32> to vector<8x8xf32>
    %104 = arith.mulf %99, %103 : vector<8x8xf32>
    %c0_45 = arith.constant 0 : index
    %c0_46 = arith.constant 0 : index
    %c0_47 = arith.constant 0 : index
    %c16 = arith.constant 16 : index
    %105 = vector.load %arg27[%c0_45, %c0_46, %c0_47, %c16] : memref<1x2x8x32xf32, #tpu.memory_space<vmem>>, vector<1x1x8x8xf32>
    %106 = vector.shape_cast %105 : vector<1x1x8x8xf32> to vector<8x8xf32>
    %107 = vector.shape_cast %104 : vector<8x8xf32> to vector<1x1x8x8xf32>
    tpu.vector_store %arg27[%c0_45, %c0_46, %c0_47, %c16], %107 {strides = array<i32>} : memref<1x2x8x32xf32, #tpu.memory_space<vmem>>, vector<1x1x8x8xf32>,
    %108 = vector.extract_strided_slice %26 {offsets = [0, 16], sizes = [8, 8], strides = [1, 1]} : vector<8x32xf32> to vector<8x8xf32>
    %109 = arith.truncf %104 : vector<8x8xf32> to vector<8x8xbf16>
    %110 = arith.truncf %108 : vector<8x8xf32> to vector<8x8xbf16>
    %cst_48 = arith.constant dense<0.000000e+00> : vector<8x8xf32>
    %111 = tpu.matmul %109, %110, %cst_48 {dimension_numbers = #tpu.dot_dimension_numbers<[1], [0], [0], [1], [0, 0, 1, 1], [], []>} : vector<8x8xbf16>, vector<8x8xbf16>, vector<8x8xf32> -> vector<8x8xf32>
    %112 = vector.extract_strided_slice %19 {offsets = [16, 0], sizes = [8, 32], strides = [1, 1]} : vector<32x32xbf16> to vector<8x32xbf16>
    %113 = arith.truncf %111 : vector<8x8xf32> to vector<8x8xbf16>
    %cst_49 = arith.constant dense<0.000000e+00> : vector<8x32xf32>
    %114 = tpu.matmul %113, %112, %cst_49 {dimension_numbers = #tpu.dot_dimension_numbers<[1], [0], [0], [1], [0, 0, 1, 1], [], []>} : vector<8x8xbf16>, vector<8x32xbf16>, vector<8x32xf32> -> vector<8x32xf32>
    %115 = arith.addf %85, %114 : vector<8x32xf32>
    %116 = vector.extract_strided_slice %24 {offsets = [0, 24], sizes = [8, 8], strides = [1, 1]} : vector<8x32xf32> to vector<8x8xf32>
    %117 = vector.extract_strided_slice %25 {offsets = [0, 24], sizes = [8, 8], strides = [1, 1]} : vector<8x32xf32> to vector<8x8xf32>
    %118 = arith.truncf %116 : vector<8x8xf32> to vector<8x8xbf16>
    %119 = arith.truncf %117 : vector<8x8xf32> to vector<8x8xbf16>
    %cst_50 = arith.constant dense<0.000000e+00> : vector<8x8xf32>
    %120 = tpu.matmul %118, %119, %cst_50 {dimension_numbers = #tpu.dot_dimension_numbers<[1], [1], [0], [0], [0, 0, 1, 0], [], []>} : vector<8x8xbf16>, vector<8x8xbf16>, vector<8x8xf32> -> vector<8x8xf32>
    %cst_51 = arith.constant 0.353553385 : f32
    %121 = vector.broadcast %cst_51 : f32 to vector<8x8xf32>
    %122 = arith.mulf %120, %121 : vector<8x8xf32>
    %cst_52 = arith.constant -1.000000e+30 : f32
    %123 = vector.broadcast %cst_52 : f32 to vector<8x8xf32>
    %124 = arith.select %23, %123, %122 : vector<8x8xi1>, vector<8x8xf32>
    %cst_53 = arith.constant dense<0xFF800000> : vector<8xf32>
    %125 = vector.multi_reduction <maximumf>, %124, %cst_53 [1] : vector<8x8xf32> to vector<8xf32>
    %126 = vector.shape_cast %125 : vector<8xf32> to vector<8x1xf32>
    %127 = vector.broadcast %126 : vector<8x1xf32> to vector<8x8xf32>
    %128 = arith.subf %124, %127 : vector<8x8xf32>
    %129 = math.exp %128 : vector<8x8xf32>
    %cst_54 = arith.constant dense<0.000000e+00> : vector<8xf32>
    %130 = vector.multi_reduction <add>, %129, %cst_54 [1] : vector<8x8xf32> to vector<8xf32>
    %131 = vector.shape_cast %130 : vector<8xf32> to vector<8x1xf32>
    %132 = tpu.reciprocal %131 {approx = true} : vector<8x1xf32> -> vector<8x1xf32>
    %133 = vector.broadcast %132 : vector<8x1xf32> to vector<8x8xf32>
    %134 = arith.mulf %129, %133 : vector<8x8xf32>
    %c0_55 = arith.constant 0 : index
    %c0_56 = arith.constant 0 : index
    %c0_57 = arith.constant 0 : index
    %c24 = arith.constant 24 : index
    %135 = vector.load %arg27[%c0_55, %c0_56, %c0_57, %c24] : memref<1x2x8x32xf32, #tpu.memory_space<vmem>>, vector<1x1x8x8xf32>
    %136 = vector.shape_cast %135 : vector<1x1x8x8xf32> to vector<8x8xf32>
    %137 = vector.shape_cast %134 : vector<8x8xf32> to vector<1x1x8x8xf32>
    tpu.vector_store %arg27[%c0_55, %c0_56, %c0_57, %c24], %137 {strides = array<i32>} : memref<1x2x8x32xf32, #tpu.memory_space<vmem>>, vector<1x1x8x8xf32>,
    %138 = vector.extract_strided_slice %26 {offsets = [0, 24], sizes = [8, 8], strides = [1, 1]} : vector<8x32xf32> to vector<8x8xf32>
    %139 = arith.truncf %134 : vector<8x8xf32> to vector<8x8xbf16>
    %140 = arith.truncf %138 : vector<8x8xf32> to vector<8x8xbf16>
    %cst_58 = arith.constant dense<0.000000e+00> : vector<8x8xf32>
    %141 = tpu.matmul %139, %140, %cst_58 {dimension_numbers = #tpu.dot_dimension_numbers<[1], [0], [0], [1], [0, 0, 1, 1], [], []>} : vector<8x8xbf16>, vector<8x8xbf16>, vector<8x8xf32> -> vector<8x8xf32>
    %142 = vector.extract_strided_slice %19 {offsets = [24, 0], sizes = [8, 32], strides = [1, 1]} : vector<32x32xbf16> to vector<8x32xbf16>
    %143 = arith.truncf %141 : vector<8x8xf32> to vector<8x8xbf16>
    %cst_59 = arith.constant dense<0.000000e+00> : vector<8x32xf32>
    %144 = tpu.matmul %143, %142, %cst_59 {dimension_numbers = #tpu.dot_dimension_numbers<[1], [0], [0], [1], [0, 0, 1, 1], [], []>} : vector<8x8xbf16>, vector<8x32xbf16>, vector<8x32xf32> -> vector<8x32xf32>
    %145 = arith.addf %115, %144 : vector<8x32xf32>
    %146 = vector.extract_strided_slice %15 {offsets = [8, 0], sizes = [8, 32], strides = [1, 1]} : vector<16x32xf32> to vector<8x32xf32>
    %147 = vector.extract_strided_slice %16 {offsets = [8, 0], sizes = [8, 32], strides = [1, 1]} : vector<16x32xf32> to vector<8x32xf32>
    %148 = vector.extract_strided_slice %17 {offsets = [8, 0], sizes = [8, 32], strides = [1, 1]} : vector<16x32xf32> to vector<8x32xf32>
    %149 = vector.extract_strided_slice %146 {offsets = [0, 0], sizes = [8, 8], strides = [1, 1]} : vector<8x32xf32> to vector<8x8xf32>
    %150 = vector.extract_strided_slice %147 {offsets = [0, 0], sizes = [8, 8], strides = [1, 1]} : vector<8x32xf32> to vector<8x8xf32>
    %151 = arith.truncf %149 : vector<8x8xf32> to vector<8x8xbf16>
    %152 = arith.truncf %150 : vector<8x8xf32> to vector<8x8xbf16>
    %cst_60 = arith.constant dense<0.000000e+00> : vector<8x8xf32>
    %153 = tpu.matmul %151, %152, %cst_60 {dimension_numbers = #tpu.dot_dimension_numbers<[1], [1], [0], [0], [0, 0, 1, 0], [], []>} : vector<8x8xbf16>, vector<8x8xbf16>, vector<8x8xf32> -> vector<8x8xf32>
    %cst_61 = arith.constant 0.353553385 : f32
    %154 = vector.broadcast %cst_61 : f32 to vector<8x8xf32>
    %155 = arith.mulf %153, %154 : vector<8x8xf32>
    %cst_62 = arith.constant -1.000000e+30 : f32
    %156 = vector.broadcast %cst_62 : f32 to vector<8x8xf32>
    %157 = arith.select %23, %156, %155 : vector<8x8xi1>, vector<8x8xf32>
    %cst_63 = arith.constant dense<0xFF800000> : vector<8xf32>
    %158 = vector.multi_reduction <maximumf>, %157, %cst_63 [1] : vector<8x8xf32> to vector<8xf32>
    %159 = vector.shape_cast %158 : vector<8xf32> to vector<8x1xf32>
    %160 = vector.broadcast %159 : vector<8x1xf32> to vector<8x8xf32>
    %161 = arith.subf %157, %160 : vector<8x8xf32>
    %162 = math.exp %161 : vector<8x8xf32>
    %cst_64 = arith.constant dense<0.000000e+00> : vector<8xf32>
    %163 = vector.multi_reduction <add>, %162, %cst_64 [1] : vector<8x8xf32> to vector<8xf32>
    %164 = vector.shape_cast %163 : vector<8xf32> to vector<8x1xf32>
    %165 = tpu.reciprocal %164 {approx = true} : vector<8x1xf32> -> vector<8x1xf32>
    %166 = vector.broadcast %165 : vector<8x1xf32> to vector<8x8xf32>
    %167 = arith.mulf %162, %166 : vector<8x8xf32>
    %c0_65 = arith.constant 0 : index
    %c1 = arith.constant 1 : index
    %c0_66 = arith.constant 0 : index
    %c0_67 = arith.constant 0 : index
    %168 = vector.load %arg27[%c0_65, %c1, %c0_66, %c0_67] : memref<1x2x8x32xf32, #tpu.memory_space<vmem>>, vector<1x1x8x8xf32>
    %169 = vector.shape_cast %168 : vector<1x1x8x8xf32> to vector<8x8xf32>
    %170 = vector.shape_cast %167 : vector<8x8xf32> to vector<1x1x8x8xf32>
    tpu.vector_store %arg27[%c0_65, %c1, %c0_66, %c0_67], %170 {strides = array<i32>} : memref<1x2x8x32xf32, #tpu.memory_space<vmem>>, vector<1x1x8x8xf32>,
    %171 = vector.extract_strided_slice %148 {offsets = [0, 0], sizes = [8, 8], strides = [1, 1]} : vector<8x32xf32> to vector<8x8xf32>
    %172 = arith.truncf %167 : vector<8x8xf32> to vector<8x8xbf16>
    %173 = arith.truncf %171 : vector<8x8xf32> to vector<8x8xbf16>
    %cst_68 = arith.constant dense<0.000000e+00> : vector<8x8xf32>
    %174 = tpu.matmul %172, %173, %cst_68 {dimension_numbers = #tpu.dot_dimension_numbers<[1], [0], [0], [1], [0, 0, 1, 1], [], []>} : vector<8x8xbf16>, vector<8x8xbf16>, vector<8x8xf32> -> vector<8x8xf32>
    %175 = vector.extract_strided_slice %19 {offsets = [0, 0], sizes = [8, 32], strides = [1, 1]} : vector<32x32xbf16> to vector<8x32xbf16>
    %176 = arith.truncf %174 : vector<8x8xf32> to vector<8x8xbf16>
    %cst_69 = arith.constant dense<0.000000e+00> : vector<8x32xf32>
    %177 = tpu.matmul %176, %175, %cst_69 {dimension_numbers = #tpu.dot_dimension_numbers<[1], [0], [0], [1], [0, 0, 1, 1], [], []>} : vector<8x8xbf16>, vector<8x32xbf16>, vector<8x32xf32> -> vector<8x32xf32>
    %178 = vector.extract_strided_slice %146 {offsets = [0, 8], sizes = [8, 8], strides = [1, 1]} : vector<8x32xf32> to vector<8x8xf32>
    %179 = vector.extract_strided_slice %147 {offsets = [0, 8], sizes = [8, 8], strides = [1, 1]} : vector<8x32xf32> to vector<8x8xf32>
    %180 = arith.truncf %178 : vector<8x8xf32> to vector<8x8xbf16>
    %181 = arith.truncf %179 : vector<8x8xf32> to vector<8x8xbf16>
    %cst_70 = arith.constant dense<0.000000e+00> : vector<8x8xf32>
    %182 = tpu.matmul %180, %181, %cst_70 {dimension_numbers = #tpu.dot_dimension_numbers<[1], [1], [0], [0], [0, 0, 1, 0], [], []>} : vector<8x8xbf16>, vector<8x8xbf16>, vector<8x8xf32> -> vector<8x8xf32>
    %cst_71 = arith.constant 0.353553385 : f32
    %183 = vector.broadcast %cst_71 : f32 to vector<8x8xf32>
    %184 = arith.mulf %182, %183 : vector<8x8xf32>
    %cst_72 = arith.constant -1.000000e+30 : f32
    %185 = vector.broadcast %cst_72 : f32 to vector<8x8xf32>
    %186 = arith.select %23, %185, %184 : vector<8x8xi1>, vector<8x8xf32>
    %cst_73 = arith.constant dense<0xFF800000> : vector<8xf32>
    %187 = vector.multi_reduction <maximumf>, %186, %cst_73 [1] : vector<8x8xf32> to vector<8xf32>
    %188 = vector.shape_cast %187 : vector<8xf32> to vector<8x1xf32>
    %189 = vector.broadcast %188 : vector<8x1xf32> to vector<8x8xf32>
    %190 = arith.subf %186, %189 : vector<8x8xf32>
    %191 = math.exp %190 : vector<8x8xf32>
    %cst_74 = arith.constant dense<0.000000e+00> : vector<8xf32>
    %192 = vector.multi_reduction <add>, %191, %cst_74 [1] : vector<8x8xf32> to vector<8xf32>
    %193 = vector.shape_cast %192 : vector<8xf32> to vector<8x1xf32>
    %194 = tpu.reciprocal %193 {approx = true} : vector<8x1xf32> -> vector<8x1xf32>
    %195 = vector.broadcast %194 : vector<8x1xf32> to vector<8x8xf32>
    %196 = arith.mulf %191, %195 : vector<8x8xf32>
    %c0_75 = arith.constant 0 : index
    %c1_76 = arith.constant 1 : index
    %c0_77 = arith.constant 0 : index
    %c8_78 = arith.constant 8 : index
    %197 = vector.load %arg27[%c0_75, %c1_76, %c0_77, %c8_78] : memref<1x2x8x32xf32, #tpu.memory_space<vmem>>, vector<1x1x8x8xf32>
    %198 = vector.shape_cast %197 : vector<1x1x8x8xf32> to vector<8x8xf32>
    %199 = vector.shape_cast %196 : vector<8x8xf32> to vector<1x1x8x8xf32>
    tpu.vector_store %arg27[%c0_75, %c1_76, %c0_77, %c8_78], %199 {strides = array<i32>} : memref<1x2x8x32xf32, #tpu.memory_space<vmem>>, vector<1x1x8x8xf32>,
    %200 = vector.extract_strided_slice %148 {offsets = [0, 8], sizes = [8, 8], strides = [1, 1]} : vector<8x32xf32> to vector<8x8xf32>
    %201 = arith.truncf %196 : vector<8x8xf32> to vector<8x8xbf16>
    %202 = arith.truncf %200 : vector<8x8xf32> to vector<8x8xbf16>
    %cst_79 = arith.constant dense<0.000000e+00> : vector<8x8xf32>
    %203 = tpu.matmul %201, %202, %cst_79 {dimension_numbers = #tpu.dot_dimension_numbers<[1], [0], [0], [1], [0, 0, 1, 1], [], []>} : vector<8x8xbf16>, vector<8x8xbf16>, vector<8x8xf32> -> vector<8x8xf32>
    %204 = vector.extract_strided_slice %19 {offsets = [8, 0], sizes = [8, 32], strides = [1, 1]} : vector<32x32xbf16> to vector<8x32xbf16>
    %205 = arith.truncf %203 : vector<8x8xf32> to vector<8x8xbf16>
    %cst_80 = arith.constant dense<0.000000e+00> : vector<8x32xf32>
    %206 = tpu.matmul %205, %204, %cst_80 {dimension_numbers = #tpu.dot_dimension_numbers<[1], [0], [0], [1], [0, 0, 1, 1], [], []>} : vector<8x8xbf16>, vector<8x32xbf16>, vector<8x32xf32> -> vector<8x32xf32>
    %207 = arith.addf %177, %206 : vector<8x32xf32>
    %208 = vector.extract_strided_slice %146 {offsets = [0, 16], sizes = [8, 8], strides = [1, 1]} : vector<8x32xf32> to vector<8x8xf32>
    %209 = vector.extract_strided_slice %147 {offsets = [0, 16], sizes = [8, 8], strides = [1, 1]} : vector<8x32xf32> to vector<8x8xf32>
    %210 = arith.truncf %208 : vector<8x8xf32> to vector<8x8xbf16>
    %211 = arith.truncf %209 : vector<8x8xf32> to vector<8x8xbf16>
    %cst_81 = arith.constant dense<0.000000e+00> : vector<8x8xf32>
    %212 = tpu.matmul %210, %211, %cst_81 {dimension_numbers = #tpu.dot_dimension_numbers<[1], [1], [0], [0], [0, 0, 1, 0], [], []>} : vector<8x8xbf16>, vector<8x8xbf16>, vector<8x8xf32> -> vector<8x8xf32>
    %cst_82 = arith.constant 0.353553385 : f32
    %213 = vector.broadcast %cst_82 : f32 to vector<8x8xf32>
    %214 = arith.mulf %212, %213 : vector<8x8xf32>
    %cst_83 = arith.constant -1.000000e+30 : f32
    %215 = vector.broadcast %cst_83 : f32 to vector<8x8xf32>
    %216 = arith.select %23, %215, %214 : vector<8x8xi1>, vector<8x8xf32>
    %cst_84 = arith.constant dense<0xFF800000> : vector<8xf32>
    %217 = vector.multi_reduction <maximumf>, %216, %cst_84 [1] : vector<8x8xf32> to vector<8xf32>
    %218 = vector.shape_cast %217 : vector<8xf32> to vector<8x1xf32>
    %219 = vector.broadcast %218 : vector<8x1xf32> to vector<8x8xf32>
    %220 = arith.subf %216, %219 : vector<8x8xf32>
    %221 = math.exp %220 : vector<8x8xf32>
    %cst_85 = arith.constant dense<0.000000e+00> : vector<8xf32>
    %222 = vector.multi_reduction <add>, %221, %cst_85 [1] : vector<8x8xf32> to vector<8xf32>
    %223 = vector.shape_cast %222 : vector<8xf32> to vector<8x1xf32>
    %224 = tpu.reciprocal %223 {approx = true} : vector<8x1xf32> -> vector<8x1xf32>
    %225 = vector.broadcast %224 : vector<8x1xf32> to vector<8x8xf32>
    %226 = arith.mulf %221, %225 : vector<8x8xf32>
    %c0_86 = arith.constant 0 : index
    %c1_87 = arith.constant 1 : index
    %c0_88 = arith.constant 0 : index
    %c16_89 = arith.constant 16 : index
    %227 = vector.load %arg27[%c0_86, %c1_87, %c0_88, %c16_89] : memref<1x2x8x32xf32, #tpu.memory_space<vmem>>, vector<1x1x8x8xf32>
    %228 = vector.shape_cast %227 : vector<1x1x8x8xf32> to vector<8x8xf32>
    %229 = vector.shape_cast %226 : vector<8x8xf32> to vector<1x1x8x8xf32>
    tpu.vector_store %arg27[%c0_86, %c1_87, %c0_88, %c16_89], %229 {strides = array<i32>} : memref<1x2x8x32xf32, #tpu.memory_space<vmem>>, vector<1x1x8x8xf32>,
    %230 = vector.extract_strided_slice %148 {offsets = [0, 16], sizes = [8, 8], strides = [1, 1]} : vector<8x32xf32> to vector<8x8xf32>
    %231 = arith.truncf %226 : vector<8x8xf32> to vector<8x8xbf16>
    %232 = arith.truncf %230 : vector<8x8xf32> to vector<8x8xbf16>
    %cst_90 = arith.constant dense<0.000000e+00> : vector<8x8xf32>
    %233 = tpu.matmul %231, %232, %cst_90 {dimension_numbers = #tpu.dot_dimension_numbers<[1], [0], [0], [1], [0, 0, 1, 1], [], []>} : vector<8x8xbf16>, vector<8x8xbf16>, vector<8x8xf32> -> vector<8x8xf32>
    %234 = vector.extract_strided_slice %19 {offsets = [16, 0], sizes = [8, 32], strides = [1, 1]} : vector<32x32xbf16> to vector<8x32xbf16>
    %235 = arith.truncf %233 : vector<8x8xf32> to vector<8x8xbf16>
    %cst_91 = arith.constant dense<0.000000e+00> : vector<8x32xf32>
    %236 = tpu.matmul %235, %234, %cst_91 {dimension_numbers = #tpu.dot_dimension_numbers<[1], [0], [0], [1], [0, 0, 1, 1], [], []>} : vector<8x8xbf16>, vector<8x32xbf16>, vector<8x32xf32> -> vector<8x32xf32>
    %237 = arith.addf %207, %236 : vector<8x32xf32>
    %238 = vector.extract_strided_slice %146 {offsets = [0, 24], sizes = [8, 8], strides = [1, 1]} : vector<8x32xf32> to vector<8x8xf32>
    %239 = vector.extract_strided_slice %147 {offsets = [0, 24], sizes = [8, 8], strides = [1, 1]} : vector<8x32xf32> to vector<8x8xf32>
    %240 = arith.truncf %238 : vector<8x8xf32> to vector<8x8xbf16>
    %241 = arith.truncf %239 : vector<8x8xf32> to vector<8x8xbf16>
    %cst_92 = arith.constant dense<0.000000e+00> : vector<8x8xf32>
    %242 = tpu.matmul %240, %241, %cst_92 {dimension_numbers = #tpu.dot_dimension_numbers<[1], [1], [0], [0], [0, 0, 1, 0], [], []>} : vector<8x8xbf16>, vector<8x8xbf16>, vector<8x8xf32> -> vector<8x8xf32>
    %cst_93 = arith.constant 0.353553385 : f32
    %243 = vector.broadcast %cst_93 : f32 to vector<8x8xf32>
    %244 = arith.mulf %242, %243 : vector<8x8xf32>
    %cst_94 = arith.constant -1.000000e+30 : f32
    %245 = vector.broadcast %cst_94 : f32 to vector<8x8xf32>
    %246 = arith.select %23, %245, %244 : vector<8x8xi1>, vector<8x8xf32>
    %cst_95 = arith.constant dense<0xFF800000> : vector<8xf32>
    %247 = vector.multi_reduction <maximumf>, %246, %cst_95 [1] : vector<8x8xf32> to vector<8xf32>
    %248 = vector.shape_cast %247 : vector<8xf32> to vector<8x1xf32>
    %249 = vector.broadcast %248 : vector<8x1xf32> to vector<8x8xf32>
    %250 = arith.subf %246, %249 : vector<8x8xf32>
    %251 = math.exp %250 : vector<8x8xf32>
    %cst_96 = arith.constant dense<0.000000e+00> : vector<8xf32>
    %252 = vector.multi_reduction <add>, %251, %cst_96 [1] : vector<8x8xf32> to vector<8xf32>
    %253 = vector.shape_cast %252 : vector<8xf32> to vector<8x1xf32>
    %254 = tpu.reciprocal %253 {approx = true} : vector<8x1xf32> -> vector<8x1xf32>
    %255 = vector.broadcast %254 : vector<8x1xf32> to vector<8x8xf32>
    %256 = arith.mulf %251, %255 : vector<8x8xf32>
    %c0_97 = arith.constant 0 : index
    %c1_98 = arith.constant 1 : index
    %c0_99 = arith.constant 0 : index
    %c24_100 = arith.constant 24 : index
    %257 = vector.load %arg27[%c0_97, %c1_98, %c0_99, %c24_100] : memref<1x2x8x32xf32, #tpu.memory_space<vmem>>, vector<1x1x8x8xf32>
    %258 = vector.shape_cast %257 : vector<1x1x8x8xf32> to vector<8x8xf32>
    %259 = vector.shape_cast %256 : vector<8x8xf32> to vector<1x1x8x8xf32>
    tpu.vector_store %arg27[%c0_97, %c1_98, %c0_99, %c24_100], %259 {strides = array<i32>} : memref<1x2x8x32xf32, #tpu.memory_space<vmem>>, vector<1x1x8x8xf32>,
    %260 = vector.extract_strided_slice %148 {offsets = [0, 24], sizes = [8, 8], strides = [1, 1]} : vector<8x32xf32> to vector<8x8xf32>
    %261 = arith.truncf %256 : vector<8x8xf32> to vector<8x8xbf16>
    %262 = arith.truncf %260 : vector<8x8xf32> to vector<8x8xbf16>
    %cst_101 = arith.constant dense<0.000000e+00> : vector<8x8xf32>
    %263 = tpu.matmul %261, %262, %cst_101 {dimension_numbers = #tpu.dot_dimension_numbers<[1], [0], [0], [1], [0, 0, 1, 1], [], []>} : vector<8x8xbf16>, vector<8x8xbf16>, vector<8x8xf32> -> vector<8x8xf32>
    %264 = vector.extract_strided_slice %19 {offsets = [24, 0], sizes = [8, 32], strides = [1, 1]} : vector<32x32xbf16> to vector<8x32xbf16>
    %265 = arith.truncf %263 : vector<8x8xf32> to vector<8x8xbf16>
    %cst_102 = arith.constant dense<0.000000e+00> : vector<8x32xf32>
    %266 = tpu.matmul %265, %264, %cst_102 {dimension_numbers = #tpu.dot_dimension_numbers<[1], [0], [0], [1], [0, 0, 1, 1], [], []>} : vector<8x8xbf16>, vector<8x32xbf16>, vector<8x32xf32> -> vector<8x32xf32>
    %267 = arith.addf %237, %266 : vector<8x32xf32>
    %268 = tpu.concatenate %145, %267 in 0 : vector<8x32xf32>, vector<8x32xf32> -> vector<16x32xf32>
    %c0_103 = arith.constant 0 : index
    %c0_104 = arith.constant 0 : index
    %c0_105 = arith.constant 0 : index
    %269 = vector.load %arg9[%c0_103, %c0_104, %c0_105] : memref<1x1x32xf32, #tpu.memory_space<vmem>>, vector<1x1x32xf32>
    %270 = vector.shape_cast %269 : vector<1x1x32xf32> to vector<1x32xf32>
    %271 = vector.broadcast %270 : vector<1x32xf32> to vector<16x32xf32>
    %272 = arith.addf %268, %271 : vector<16x32xf32>
    %273 = arith.addf %4, %272 : vector<16x32xf32>
    %c0_106 = arith.constant 0 : index
    %c0_107 = arith.constant 0 : index
    %c0_108 = arith.constant 0 : index
    %274 = vector.load %arg16[%c0_106, %c0_107, %c0_108] : memref<1x1x32xf32, #tpu.memory_space<vmem>>, vector<1x1x32xf32>
    %275 = vector.shape_cast %274 : vector<1x1x32xf32> to vector<1x32xf32>
    %c0_109 = arith.constant 0 : index
    %c0_110 = arith.constant 0 : index
    %c0_111 = arith.constant 0 : index
    %276 = vector.load %arg17[%c0_109, %c0_110, %c0_111] : memref<1x1x32xf32, #tpu.memory_space<vmem>>, vector<1x1x32xf32>
    %277 = vector.shape_cast %276 : vector<1x1x32xf32> to vector<1x32xf32>
    %cst_112 = arith.constant dense<0.000000e+00> : vector<16xf32>
    %278 = vector.multi_reduction <add>, %273, %cst_112 [1] : vector<16x32xf32> to vector<16xf32>
    %279 = vector.shape_cast %278 : vector<16xf32> to vector<16x1xf32>
    %cst_113 = arith.constant 3.200000e+01 : f32
    %280 = vector.broadcast %cst_113 : f32 to vector<16x1xf32>
    %281 = arith.divf %279, %280 : vector<16x1xf32>
    %282 = vector.broadcast %281 : vector<16x1xf32> to vector<16x32xf32>
    %283 = arith.subf %273, %282 : vector<16x32xf32>
    %284 = arith.mulf %283, %283 : vector<16x32xf32>
    %cst_114 = arith.constant dense<0.000000e+00> : vector<16xf32>
    %285 = vector.multi_reduction <add>, %284, %cst_114 [1] : vector<16x32xf32> to vector<16xf32>
    %286 = vector.shape_cast %285 : vector<16xf32> to vector<16x1xf32>
    %cst_115 = arith.constant 3.200000e+01 : f32
    %287 = vector.broadcast %cst_115 : f32 to vector<16x1xf32>
    %288 = arith.divf %286, %287 : vector<16x1xf32>
    %289 = vector.broadcast %281 : vector<16x1xf32> to vector<16x32xf32>
    %290 = arith.subf %273, %289 : vector<16x32xf32>
    %cst_116 = arith.constant 9.99999974E-6 : f32
    %291 = vector.broadcast %cst_116 : f32 to vector<16x1xf32>
    %292 = arith.addf %288, %291 : vector<16x1xf32>
    %293 = math.rsqrt %292 : vector<16x1xf32>
    %294 = vector.broadcast %293 : vector<16x1xf32> to vector<16x32xf32>
    %295 = arith.mulf %290, %294 : vector<16x32xf32>
    %296 = vector.broadcast %275 : vector<1x32xf32> to vector<16x32xf32>
    %297 = arith.mulf %295, %296 : vector<16x32xf32>
    %298 = vector.broadcast %277 : vector<1x32xf32> to vector<16x32xf32>
    %299 = arith.addf %297, %298 : vector<16x32xf32>
    %c0_117 = arith.constant 0 : index
    %c0_118 = arith.constant 0 : index
    %c0_119 = arith.constant 0 : index
    %300 = vector.load %arg10[%c0_117, %c0_118, %c0_119] : memref<1x32x32xbf16, #tpu.memory_space<vmem>>, vector<1x32x32xbf16>
    %301 = vector.shape_cast %300 : vector<1x32x32xbf16> to vector<32x32xbf16>
    %302 = arith.truncf %299 : vector<16x32xf32> to vector<16x32xbf16>
    %cst_120 = arith.constant dense<0.000000e+00> : vector<16x32xf32>
    %303 = tpu.matmul %302, %301, %cst_120 {dimension_numbers = #tpu.dot_dimension_numbers<[1], [0], [0], [1], [0, 0, 1, 1], [], []>} : vector<16x32xbf16>, vector<32x32xbf16>, vector<16x32xf32> -> vector<16x32xf32>
    %c0_121 = arith.constant 0 : index
    %c0_122 = arith.constant 0 : index
    %c0_123 = arith.constant 0 : index
    %304 = vector.load %arg11[%c0_121, %c0_122, %c0_123] : memref<1x1x32xf32, #tpu.memory_space<vmem>>, vector<1x1x32xf32>
    %305 = vector.shape_cast %304 : vector<1x1x32xf32> to vector<1x32xf32>
    %306 = vector.broadcast %305 : vector<1x32xf32> to vector<16x32xf32>
    %307 = arith.addf %303, %306 : vector<16x32xf32>
    %c0_124 = arith.constant 0 : index
    %c0_125 = arith.constant 0 : index
    %c0_126 = arith.constant 0 : index
    %308 = vector.load %arg12[%c0_124, %c0_125, %c0_126] : memref<1x32x64xbf16, #tpu.memory_space<vmem>>, vector<1x32x64xbf16>
    %309 = vector.shape_cast %308 : vector<1x32x64xbf16> to vector<32x64xbf16>
    %310 = arith.truncf %6 : vector<16x32xf32> to vector<16x32xbf16>
    %cst_127 = arith.constant dense<0.000000e+00> : vector<16x64xf32>
    %311 = tpu.matmul %310, %309, %cst_127 {dimension_numbers = #tpu.dot_dimension_numbers<[1], [0], [0], [1], [0, 0, 1, 1], [], []>} : vector<16x32xbf16>, vector<32x64xbf16>, vector<16x64xf32> -> vector<16x64xf32>
    %c0_128 = arith.constant 0 : index
    %c0_129 = arith.constant 0 : index
    %c0_130 = arith.constant 0 : index
    %312 = vector.load %arg13[%c0_128, %c0_129, %c0_130] : memref<1x1x64xf32, #tpu.memory_space<vmem>>, vector<1x1x64xf32>
    %313 = vector.shape_cast %312 : vector<1x1x64xf32> to vector<1x64xf32>
    %314 = vector.broadcast %313 : vector<1x64xf32> to vector<16x64xf32>
    %315 = arith.addf %311, %314 : vector<16x64xf32>
    %316 = vector.extract_strided_slice %315 {offsets = [0, 0], sizes = [16, 32], strides = [1, 1]} : vector<16x64xf32> to vector<16x32xf32>
    %317 = vector.extract_strided_slice %315 {offsets = [0, 32], sizes = [16, 32], strides = [1, 1]} : vector<16x64xf32> to vector<16x32xf32>
    %c0_131 = arith.constant 0 : index
    %c0_132 = arith.constant 0 : index
    %c0_133 = arith.constant 0 : index
    %318 = vector.load %arg14[%c0_131, %c0_132, %c0_133] : memref<1x32x32xbf16, #tpu.memory_space<vmem>>, vector<1x32x32xbf16>
    %319 = vector.shape_cast %318 : vector<1x32x32xbf16> to vector<32x32xbf16>
    %320 = vector.extract_strided_slice %307 {offsets = [0, 0], sizes = [8, 32], strides = [1, 1]} : vector<16x32xf32> to vector<8x32xf32>
    %321 = vector.extract_strided_slice %316 {offsets = [0, 0], sizes = [8, 32], strides = [1, 1]} : vector<16x32xf32> to vector<8x32xf32>
    %322 = vector.extract_strided_slice %317 {offsets = [0, 0], sizes = [8, 32], strides = [1, 1]} : vector<16x32xf32> to vector<8x32xf32>
    %c0_134 = arith.constant 0 : index
    %c0_135 = arith.constant 0 : index
    %c0_136 = arith.constant 0 : index
    %323 = vector.load %arg5[%c0_134, %c0_135, %c0_136] : memref<2x1x8xf32, #tpu.memory_space<vmem>>, vector<1x1x8xf32>
    %324 = vector.shape_cast %323 : vector<1x1x8xf32> to vector<1x8xf32>
    %cst_137 = arith.constant 5.000000e-01 : f32
    %325 = vector.broadcast %cst_137 : f32 to vector<1x8xf32>
    %326 = arith.cmpf ogt, %324, %325 : vector<1x8xf32>
    %327 = vector.extract_strided_slice %320 {offsets = [0, 0], sizes = [8, 8], strides = [1, 1]} : vector<8x32xf32> to vector<8x8xf32>
    %328 = vector.extract_strided_slice %321 {offsets = [0, 0], sizes = [8, 8], strides = [1, 1]} : vector<8x32xf32> to vector<8x8xf32>
    %329 = arith.truncf %327 : vector<8x8xf32> to vector<8x8xbf16>
    %330 = arith.truncf %328 : vector<8x8xf32> to vector<8x8xbf16>
    %cst_138 = arith.constant dense<0.000000e+00> : vector<8x8xf32>
    %331 = tpu.matmul %329, %330, %cst_138 {dimension_numbers = #tpu.dot_dimension_numbers<[1], [1], [0], [0], [0, 0, 1, 0], [], []>} : vector<8x8xbf16>, vector<8x8xbf16>, vector<8x8xf32> -> vector<8x8xf32>
    %cst_139 = arith.constant 0.353553385 : f32
    %332 = vector.broadcast %cst_139 : f32 to vector<8x8xf32>
    %333 = arith.mulf %331, %332 : vector<8x8xf32>
    %cst_140 = arith.constant -1.000000e+30 : f32
    %334 = vector.shape_cast %326 : vector<1x8xi1> to vector<1x8xi1>
    %335 = vector.broadcast %334 : vector<1x8xi1> to vector<8x8xi1>
    %336 = vector.broadcast %cst_140 : f32 to vector<8x8xf32>
    %337 = arith.select %335, %336, %333 : vector<8x8xi1>, vector<8x8xf32>
    %cst_141 = arith.constant dense<0xFF800000> : vector<8xf32>
    %338 = vector.multi_reduction <maximumf>, %337, %cst_141 [1] : vector<8x8xf32> to vector<8xf32>
    %339 = vector.shape_cast %338 : vector<8xf32> to vector<8x1xf32>
    %340 = vector.broadcast %339 : vector<8x1xf32> to vector<8x8xf32>
    %341 = arith.subf %337, %340 : vector<8x8xf32>
    %342 = math.exp %341 : vector<8x8xf32>
    %cst_142 = arith.constant dense<0.000000e+00> : vector<8xf32>
    %343 = vector.multi_reduction <add>, %342, %cst_142 [1] : vector<8x8xf32> to vector<8xf32>
    %344 = vector.shape_cast %343 : vector<8xf32> to vector<8x1xf32>
    %345 = tpu.reciprocal %344 {approx = true} : vector<8x1xf32> -> vector<8x1xf32>
    %346 = vector.broadcast %345 : vector<8x1xf32> to vector<8x8xf32>
    %347 = arith.mulf %342, %346 : vector<8x8xf32>
    %c0_143 = arith.constant 0 : index
    %c0_144 = arith.constant 0 : index
    %c0_145 = arith.constant 0 : index
    %c0_146 = arith.constant 0 : index
    %348 = vector.load %arg28[%c0_143, %c0_144, %c0_145, %c0_146] : memref<1x2x8x32xf32, #tpu.memory_space<vmem>>, vector<1x1x8x8xf32>
    %349 = vector.shape_cast %348 : vector<1x1x8x8xf32> to vector<8x8xf32>
    %350 = vector.shape_cast %347 : vector<8x8xf32> to vector<1x1x8x8xf32>
    tpu.vector_store %arg28[%c0_143, %c0_144, %c0_145, %c0_146], %350 {strides = array<i32>} : memref<1x2x8x32xf32, #tpu.memory_space<vmem>>, vector<1x1x8x8xf32>,
    %351 = vector.extract_strided_slice %322 {offsets = [0, 0], sizes = [8, 8], strides = [1, 1]} : vector<8x32xf32> to vector<8x8xf32>
    %352 = arith.truncf %347 : vector<8x8xf32> to vector<8x8xbf16>
    %353 = arith.truncf %351 : vector<8x8xf32> to vector<8x8xbf16>
    %cst_147 = arith.constant dense<0.000000e+00> : vector<8x8xf32>
    %354 = tpu.matmul %352, %353, %cst_147 {dimension_numbers = #tpu.dot_dimension_numbers<[1], [0], [0], [1], [0, 0, 1, 1], [], []>} : vector<8x8xbf16>, vector<8x8xbf16>, vector<8x8xf32> -> vector<8x8xf32>
    %355 = vector.extract_strided_slice %319 {offsets = [0, 0], sizes = [8, 32], strides = [1, 1]} : vector<32x32xbf16> to vector<8x32xbf16>
    %356 = arith.truncf %354 : vector<8x8xf32> to vector<8x8xbf16>
    %cst_148 = arith.constant dense<0.000000e+00> : vector<8x32xf32>
    %357 = tpu.matmul %356, %355, %cst_148 {dimension_numbers = #tpu.dot_dimension_numbers<[1], [0], [0], [1], [0, 0, 1, 1], [], []>} : vector<8x8xbf16>, vector<8x32xbf16>, vector<8x32xf32> -> vector<8x32xf32>
    %358 = vector.extract_strided_slice %320 {offsets = [0, 8], sizes = [8, 8], strides = [1, 1]} : vector<8x32xf32> to vector<8x8xf32>
    %359 = vector.extract_strided_slice %321 {offsets = [0, 8], sizes = [8, 8], strides = [1, 1]} : vector<8x32xf32> to vector<8x8xf32>
    %360 = arith.truncf %358 : vector<8x8xf32> to vector<8x8xbf16>
    %361 = arith.truncf %359 : vector<8x8xf32> to vector<8x8xbf16>
    %cst_149 = arith.constant dense<0.000000e+00> : vector<8x8xf32>
    %362 = tpu.matmul %360, %361, %cst_149 {dimension_numbers = #tpu.dot_dimension_numbers<[1], [1], [0], [0], [0, 0, 1, 0], [], []>} : vector<8x8xbf16>, vector<8x8xbf16>, vector<8x8xf32> -> vector<8x8xf32>
    %cst_150 = arith.constant 0.353553385 : f32
    %363 = vector.broadcast %cst_150 : f32 to vector<8x8xf32>
    %364 = arith.mulf %362, %363 : vector<8x8xf32>
    %cst_151 = arith.constant -1.000000e+30 : f32
    %365 = vector.shape_cast %326 : vector<1x8xi1> to vector<1x8xi1>
    %366 = vector.broadcast %365 : vector<1x8xi1> to vector<8x8xi1>
    %367 = vector.broadcast %cst_151 : f32 to vector<8x8xf32>
    %368 = arith.select %366, %367, %364 : vector<8x8xi1>, vector<8x8xf32>
    %cst_152 = arith.constant dense<0xFF800000> : vector<8xf32>
    %369 = vector.multi_reduction <maximumf>, %368, %cst_152 [1] : vector<8x8xf32> to vector<8xf32>
    %370 = vector.shape_cast %369 : vector<8xf32> to vector<8x1xf32>
    %371 = vector.broadcast %370 : vector<8x1xf32> to vector<8x8xf32>
    %372 = arith.subf %368, %371 : vector<8x8xf32>
    %373 = math.exp %372 : vector<8x8xf32>
    %cst_153 = arith.constant dense<0.000000e+00> : vector<8xf32>
    %374 = vector.multi_reduction <add>, %373, %cst_153 [1] : vector<8x8xf32> to vector<8xf32>
    %375 = vector.shape_cast %374 : vector<8xf32> to vector<8x1xf32>
    %376 = tpu.reciprocal %375 {approx = true} : vector<8x1xf32> -> vector<8x1xf32>
    %377 = vector.broadcast %376 : vector<8x1xf32> to vector<8x8xf32>
    %378 = arith.mulf %373, %377 : vector<8x8xf32>
    %c0_154 = arith.constant 0 : index
    %c0_155 = arith.constant 0 : index
    %c0_156 = arith.constant 0 : index
    %c8_157 = arith.constant 8 : index
    %379 = vector.load %arg28[%c0_154, %c0_155, %c0_156, %c8_157] : memref<1x2x8x32xf32, #tpu.memory_space<vmem>>, vector<1x1x8x8xf32>
    %380 = vector.shape_cast %379 : vector<1x1x8x8xf32> to vector<8x8xf32>
    %381 = vector.shape_cast %378 : vector<8x8xf32> to vector<1x1x8x8xf32>
    tpu.vector_store %arg28[%c0_154, %c0_155, %c0_156, %c8_157], %381 {strides = array<i32>} : memref<1x2x8x32xf32, #tpu.memory_space<vmem>>, vector<1x1x8x8xf32>,
    %382 = vector.extract_strided_slice %322 {offsets = [0, 8], sizes = [8, 8], strides = [1, 1]} : vector<8x32xf32> to vector<8x8xf32>
    %383 = arith.truncf %378 : vector<8x8xf32> to vector<8x8xbf16>
    %384 = arith.truncf %382 : vector<8x8xf32> to vector<8x8xbf16>
    %cst_158 = arith.constant dense<0.000000e+00> : vector<8x8xf32>
    %385 = tpu.matmul %383, %384, %cst_158 {dimension_numbers = #tpu.dot_dimension_numbers<[1], [0], [0], [1], [0, 0, 1, 1], [], []>} : vector<8x8xbf16>, vector<8x8xbf16>, vector<8x8xf32> -> vector<8x8xf32>
    %386 = vector.extract_strided_slice %319 {offsets = [8, 0], sizes = [8, 32], strides = [1, 1]} : vector<32x32xbf16> to vector<8x32xbf16>
    %387 = arith.truncf %385 : vector<8x8xf32> to vector<8x8xbf16>
    %cst_159 = arith.constant dense<0.000000e+00> : vector<8x32xf32>
    %388 = tpu.matmul %387, %386, %cst_159 {dimension_numbers = #tpu.dot_dimension_numbers<[1], [0], [0], [1], [0, 0, 1, 1], [], []>} : vector<8x8xbf16>, vector<8x32xbf16>, vector<8x32xf32> -> vector<8x32xf32>
    %389 = arith.addf %357, %388 : vector<8x32xf32>
    %390 = vector.extract_strided_slice %320 {offsets = [0, 16], sizes = [8, 8], strides = [1, 1]} : vector<8x32xf32> to vector<8x8xf32>
    %391 = vector.extract_strided_slice %321 {offsets = [0, 16], sizes = [8, 8], strides = [1, 1]} : vector<8x32xf32> to vector<8x8xf32>
    %392 = arith.truncf %390 : vector<8x8xf32> to vector<8x8xbf16>
    %393 = arith.truncf %391 : vector<8x8xf32> to vector<8x8xbf16>
    %cst_160 = arith.constant dense<0.000000e+00> : vector<8x8xf32>
    %394 = tpu.matmul %392, %393, %cst_160 {dimension_numbers = #tpu.dot_dimension_numbers<[1], [1], [0], [0], [0, 0, 1, 0], [], []>} : vector<8x8xbf16>, vector<8x8xbf16>, vector<8x8xf32> -> vector<8x8xf32>
    %cst_161 = arith.constant 0.353553385 : f32
    %395 = vector.broadcast %cst_161 : f32 to vector<8x8xf32>
    %396 = arith.mulf %394, %395 : vector<8x8xf32>
    %cst_162 = arith.constant -1.000000e+30 : f32
    %397 = vector.shape_cast %326 : vector<1x8xi1> to vector<1x8xi1>
    %398 = vector.broadcast %397 : vector<1x8xi1> to vector<8x8xi1>
    %399 = vector.broadcast %cst_162 : f32 to vector<8x8xf32>
    %400 = arith.select %398, %399, %396 : vector<8x8xi1>, vector<8x8xf32>
    %cst_163 = arith.constant dense<0xFF800000> : vector<8xf32>
    %401 = vector.multi_reduction <maximumf>, %400, %cst_163 [1] : vector<8x8xf32> to vector<8xf32>
    %402 = vector.shape_cast %401 : vector<8xf32> to vector<8x1xf32>
    %403 = vector.broadcast %402 : vector<8x1xf32> to vector<8x8xf32>
    %404 = arith.subf %400, %403 : vector<8x8xf32>
    %405 = math.exp %404 : vector<8x8xf32>
    %cst_164 = arith.constant dense<0.000000e+00> : vector<8xf32>
    %406 = vector.multi_reduction <add>, %405, %cst_164 [1] : vector<8x8xf32> to vector<8xf32>
    %407 = vector.shape_cast %406 : vector<8xf32> to vector<8x1xf32>
    %408 = tpu.reciprocal %407 {approx = true} : vector<8x1xf32> -> vector<8x1xf32>
    %409 = vector.broadcast %408 : vector<8x1xf32> to vector<8x8xf32>
    %410 = arith.mulf %405, %409 : vector<8x8xf32>
    %c0_165 = arith.constant 0 : index
    %c0_166 = arith.constant 0 : index
    %c0_167 = arith.constant 0 : index
    %c16_168 = arith.constant 16 : index
    %411 = vector.load %arg28[%c0_165, %c0_166, %c0_167, %c16_168] : memref<1x2x8x32xf32, #tpu.memory_space<vmem>>, vector<1x1x8x8xf32>
    %412 = vector.shape_cast %411 : vector<1x1x8x8xf32> to vector<8x8xf32>
    %413 = vector.shape_cast %410 : vector<8x8xf32> to vector<1x1x8x8xf32>
    tpu.vector_store %arg28[%c0_165, %c0_166, %c0_167, %c16_168], %413 {strides = array<i32>} : memref<1x2x8x32xf32, #tpu.memory_space<vmem>>, vector<1x1x8x8xf32>,
    %414 = vector.extract_strided_slice %322 {offsets = [0, 16], sizes = [8, 8], strides = [1, 1]} : vector<8x32xf32> to vector<8x8xf32>
    %415 = arith.truncf %410 : vector<8x8xf32> to vector<8x8xbf16>
    %416 = arith.truncf %414 : vector<8x8xf32> to vector<8x8xbf16>
    %cst_169 = arith.constant dense<0.000000e+00> : vector<8x8xf32>
    %417 = tpu.matmul %415, %416, %cst_169 {dimension_numbers = #tpu.dot_dimension_numbers<[1], [0], [0], [1], [0, 0, 1, 1], [], []>} : vector<8x8xbf16>, vector<8x8xbf16>, vector<8x8xf32> -> vector<8x8xf32>
    %418 = vector.extract_strided_slice %319 {offsets = [16, 0], sizes = [8, 32], strides = [1, 1]} : vector<32x32xbf16> to vector<8x32xbf16>
    %419 = arith.truncf %417 : vector<8x8xf32> to vector<8x8xbf16>
    %cst_170 = arith.constant dense<0.000000e+00> : vector<8x32xf32>
    %420 = tpu.matmul %419, %418, %cst_170 {dimension_numbers = #tpu.dot_dimension_numbers<[1], [0], [0], [1], [0, 0, 1, 1], [], []>} : vector<8x8xbf16>, vector<8x32xbf16>, vector<8x32xf32> -> vector<8x32xf32>
    %421 = arith.addf %389, %420 : vector<8x32xf32>
    %422 = vector.extract_strided_slice %320 {offsets = [0, 24], sizes = [8, 8], strides = [1, 1]} : vector<8x32xf32> to vector<8x8xf32>
    %423 = vector.extract_strided_slice %321 {offsets = [0, 24], sizes = [8, 8], strides = [1, 1]} : vector<8x32xf32> to vector<8x8xf32>
    %424 = arith.truncf %422 : vector<8x8xf32> to vector<8x8xbf16>
    %425 = arith.truncf %423 : vector<8x8xf32> to vector<8x8xbf16>
    %cst_171 = arith.constant dense<0.000000e+00> : vector<8x8xf32>
    %426 = tpu.matmul %424, %425, %cst_171 {dimension_numbers = #tpu.dot_dimension_numbers<[1], [1], [0], [0], [0, 0, 1, 0], [], []>} : vector<8x8xbf16>, vector<8x8xbf16>, vector<8x8xf32> -> vector<8x8xf32>
    %cst_172 = arith.constant 0.353553385 : f32
    %427 = vector.broadcast %cst_172 : f32 to vector<8x8xf32>
    %428 = arith.mulf %426, %427 : vector<8x8xf32>
    %cst_173 = arith.constant -1.000000e+30 : f32
    %429 = vector.shape_cast %326 : vector<1x8xi1> to vector<1x8xi1>
    %430 = vector.broadcast %429 : vector<1x8xi1> to vector<8x8xi1>
    %431 = vector.broadcast %cst_173 : f32 to vector<8x8xf32>
    %432 = arith.select %430, %431, %428 : vector<8x8xi1>, vector<8x8xf32>
    %cst_174 = arith.constant dense<0xFF800000> : vector<8xf32>
    %433 = vector.multi_reduction <maximumf>, %432, %cst_174 [1] : vector<8x8xf32> to vector<8xf32>
    %434 = vector.shape_cast %433 : vector<8xf32> to vector<8x1xf32>
    %435 = vector.broadcast %434 : vector<8x1xf32> to vector<8x8xf32>
    %436 = arith.subf %432, %435 : vector<8x8xf32>
    %437 = math.exp %436 : vector<8x8xf32>
    %cst_175 = arith.constant dense<0.000000e+00> : vector<8xf32>
    %438 = vector.multi_reduction <add>, %437, %cst_175 [1] : vector<8x8xf32> to vector<8xf32>
    %439 = vector.shape_cast %438 : vector<8xf32> to vector<8x1xf32>
    %440 = tpu.reciprocal %439 {approx = true} : vector<8x1xf32> -> vector<8x1xf32>
    %441 = vector.broadcast %440 : vector<8x1xf32> to vector<8x8xf32>
    %442 = arith.mulf %437, %441 : vector<8x8xf32>
    %c0_176 = arith.constant 0 : index
    %c0_177 = arith.constant 0 : index
    %c0_178 = arith.constant 0 : index
    %c24_179 = arith.constant 24 : index
    %443 = vector.load %arg28[%c0_176, %c0_177, %c0_178, %c24_179] : memref<1x2x8x32xf32, #tpu.memory_space<vmem>>, vector<1x1x8x8xf32>
    %444 = vector.shape_cast %443 : vector<1x1x8x8xf32> to vector<8x8xf32>
    %445 = vector.shape_cast %442 : vector<8x8xf32> to vector<1x1x8x8xf32>
    tpu.vector_store %arg28[%c0_176, %c0_177, %c0_178, %c24_179], %445 {strides = array<i32>} : memref<1x2x8x32xf32, #tpu.memory_space<vmem>>, vector<1x1x8x8xf32>,
    %446 = vector.extract_strided_slice %322 {offsets = [0, 24], sizes = [8, 8], strides = [1, 1]} : vector<8x32xf32> to vector<8x8xf32>
    %447 = arith.truncf %442 : vector<8x8xf32> to vector<8x8xbf16>
    %448 = arith.truncf %446 : vector<8x8xf32> to vector<8x8xbf16>
    %cst_180 = arith.constant dense<0.000000e+00> : vector<8x8xf32>
    %449 = tpu.matmul %447, %448, %cst_180 {dimension_numbers = #tpu.dot_dimension_numbers<[1], [0], [0], [1], [0, 0, 1, 1], [], []>} : vector<8x8xbf16>, vector<8x8xbf16>, vector<8x8xf32> -> vector<8x8xf32>
    %450 = vector.extract_strided_slice %319 {offsets = [24, 0], sizes = [8, 32], strides = [1, 1]} : vector<32x32xbf16> to vector<8x32xbf16>
    %451 = arith.truncf %449 : vector<8x8xf32> to vector<8x8xbf16>
    %cst_181 = arith.constant dense<0.000000e+00> : vector<8x32xf32>
    %452 = tpu.matmul %451, %450, %cst_181 {dimension_numbers = #tpu.dot_dimension_numbers<[1], [0], [0], [1], [0, 0, 1, 1], [], []>} : vector<8x8xbf16>, vector<8x32xbf16>, vector<8x32xf32> -> vector<8x32xf32>
    %453 = arith.addf %421, %452 : vector<8x32xf32>
    %454 = vector.extract_strided_slice %307 {offsets = [8, 0], sizes = [8, 32], strides = [1, 1]} : vector<16x32xf32> to vector<8x32xf32>
    %455 = vector.extract_strided_slice %316 {offsets = [8, 0], sizes = [8, 32], strides = [1, 1]} : vector<16x32xf32> to vector<8x32xf32>
    %456 = vector.extract_strided_slice %317 {offsets = [8, 0], sizes = [8, 32], strides = [1, 1]} : vector<16x32xf32> to vector<8x32xf32>
    %c1_182 = arith.constant 1 : index
    %c0_183 = arith.constant 0 : index
    %c0_184 = arith.constant 0 : index
    %457 = vector.load %arg5[%c1_182, %c0_183, %c0_184] : memref<2x1x8xf32, #tpu.memory_space<vmem>>, vector<1x1x8xf32>
    %458 = vector.shape_cast %457 : vector<1x1x8xf32> to vector<1x8xf32>
    %cst_185 = arith.constant 5.000000e-01 : f32
    %459 = vector.broadcast %cst_185 : f32 to vector<1x8xf32>
    %460 = arith.cmpf ogt, %458, %459 : vector<1x8xf32>
    %461 = vector.extract_strided_slice %454 {offsets = [0, 0], sizes = [8, 8], strides = [1, 1]} : vector<8x32xf32> to vector<8x8xf32>
    %462 = vector.extract_strided_slice %455 {offsets = [0, 0], sizes = [8, 8], strides = [1, 1]} : vector<8x32xf32> to vector<8x8xf32>
    %463 = arith.truncf %461 : vector<8x8xf32> to vector<8x8xbf16>
    %464 = arith.truncf %462 : vector<8x8xf32> to vector<8x8xbf16>
    %cst_186 = arith.constant dense<0.000000e+00> : vector<8x8xf32>
    %465 = tpu.matmul %463, %464, %cst_186 {dimension_numbers = #tpu.dot_dimension_numbers<[1], [1], [0], [0], [0, 0, 1, 0], [], []>} : vector<8x8xbf16>, vector<8x8xbf16>, vector<8x8xf32> -> vector<8x8xf32>
    %cst_187 = arith.constant 0.353553385 : f32
    %466 = vector.broadcast %cst_187 : f32 to vector<8x8xf32>
    %467 = arith.mulf %465, %466 : vector<8x8xf32>
    %cst_188 = arith.constant -1.000000e+30 : f32
    %468 = vector.shape_cast %460 : vector<1x8xi1> to vector<1x8xi1>
    %469 = vector.broadcast %468 : vector<1x8xi1> to vector<8x8xi1>
    %470 = vector.broadcast %cst_188 : f32 to vector<8x8xf32>
    %471 = arith.select %469, %470, %467 : vector<8x8xi1>, vector<8x8xf32>
    %cst_189 = arith.constant dense<0xFF800000> : vector<8xf32>
    %472 = vector.multi_reduction <maximumf>, %471, %cst_189 [1] : vector<8x8xf32> to vector<8xf32>
    %473 = vector.shape_cast %472 : vector<8xf32> to vector<8x1xf32>
    %474 = vector.broadcast %473 : vector<8x1xf32> to vector<8x8xf32>
    %475 = arith.subf %471, %474 : vector<8x8xf32>
    %476 = math.exp %475 : vector<8x8xf32>
    %cst_190 = arith.constant dense<0.000000e+00> : vector<8xf32>
    %477 = vector.multi_reduction <add>, %476, %cst_190 [1] : vector<8x8xf32> to vector<8xf32>
    %478 = vector.shape_cast %477 : vector<8xf32> to vector<8x1xf32>
    %479 = tpu.reciprocal %478 {approx = true} : vector<8x1xf32> -> vector<8x1xf32>
    %480 = vector.broadcast %479 : vector<8x1xf32> to vector<8x8xf32>
    %481 = arith.mulf %476, %480 : vector<8x8xf32>
    %c0_191 = arith.constant 0 : index
    %c1_192 = arith.constant 1 : index
    %c0_193 = arith.constant 0 : index
    %c0_194 = arith.constant 0 : index
    %482 = vector.load %arg28[%c0_191, %c1_192, %c0_193, %c0_194] : memref<1x2x8x32xf32, #tpu.memory_space<vmem>>, vector<1x1x8x8xf32>
    %483 = vector.shape_cast %482 : vector<1x1x8x8xf32> to vector<8x8xf32>
    %484 = vector.shape_cast %481 : vector<8x8xf32> to vector<1x1x8x8xf32>
    tpu.vector_store %arg28[%c0_191, %c1_192, %c0_193, %c0_194], %484 {strides = array<i32>} : memref<1x2x8x32xf32, #tpu.memory_space<vmem>>, vector<1x1x8x8xf32>,
    %485 = vector.extract_strided_slice %456 {offsets = [0, 0], sizes = [8, 8], strides = [1, 1]} : vector<8x32xf32> to vector<8x8xf32>
    %486 = arith.truncf %481 : vector<8x8xf32> to vector<8x8xbf16>
    %487 = arith.truncf %485 : vector<8x8xf32> to vector<8x8xbf16>
    %cst_195 = arith.constant dense<0.000000e+00> : vector<8x8xf32>
    %488 = tpu.matmul %486, %487, %cst_195 {dimension_numbers = #tpu.dot_dimension_numbers<[1], [0], [0], [1], [0, 0, 1, 1], [], []>} : vector<8x8xbf16>, vector<8x8xbf16>, vector<8x8xf32> -> vector<8x8xf32>
    %489 = vector.extract_strided_slice %319 {offsets = [0, 0], sizes = [8, 32], strides = [1, 1]} : vector<32x32xbf16> to vector<8x32xbf16>
    %490 = arith.truncf %488 : vector<8x8xf32> to vector<8x8xbf16>
    %cst_196 = arith.constant dense<0.000000e+00> : vector<8x32xf32>
    %491 = tpu.matmul %490, %489, %cst_196 {dimension_numbers = #tpu.dot_dimension_numbers<[1], [0], [0], [1], [0, 0, 1, 1], [], []>} : vector<8x8xbf16>, vector<8x32xbf16>, vector<8x32xf32> -> vector<8x32xf32>
    %492 = vector.extract_strided_slice %454 {offsets = [0, 8], sizes = [8, 8], strides = [1, 1]} : vector<8x32xf32> to vector<8x8xf32>
    %493 = vector.extract_strided_slice %455 {offsets = [0, 8], sizes = [8, 8], strides = [1, 1]} : vector<8x32xf32> to vector<8x8xf32>
    %494 = arith.truncf %492 : vector<8x8xf32> to vector<8x8xbf16>
    %495 = arith.truncf %493 : vector<8x8xf32> to vector<8x8xbf16>
    %cst_197 = arith.constant dense<0.000000e+00> : vector<8x8xf32>
    %496 = tpu.matmul %494, %495, %cst_197 {dimension_numbers = #tpu.dot_dimension_numbers<[1], [1], [0], [0], [0, 0, 1, 0], [], []>} : vector<8x8xbf16>, vector<8x8xbf16>, vector<8x8xf32> -> vector<8x8xf32>
    %cst_198 = arith.constant 0.353553385 : f32
    %497 = vector.broadcast %cst_198 : f32 to vector<8x8xf32>
    %498 = arith.mulf %496, %497 : vector<8x8xf32>
    %cst_199 = arith.constant -1.000000e+30 : f32
    %499 = vector.shape_cast %460 : vector<1x8xi1> to vector<1x8xi1>
    %500 = vector.broadcast %499 : vector<1x8xi1> to vector<8x8xi1>
    %501 = vector.broadcast %cst_199 : f32 to vector<8x8xf32>
    %502 = arith.select %500, %501, %498 : vector<8x8xi1>, vector<8x8xf32>
    %cst_200 = arith.constant dense<0xFF800000> : vector<8xf32>
    %503 = vector.multi_reduction <maximumf>, %502, %cst_200 [1] : vector<8x8xf32> to vector<8xf32>
    %504 = vector.shape_cast %503 : vector<8xf32> to vector<8x1xf32>
    %505 = vector.broadcast %504 : vector<8x1xf32> to vector<8x8xf32>
    %506 = arith.subf %502, %505 : vector<8x8xf32>
    %507 = math.exp %506 : vector<8x8xf32>
    %cst_201 = arith.constant dense<0.000000e+00> : vector<8xf32>
    %508 = vector.multi_reduction <add>, %507, %cst_201 [1] : vector<8x8xf32> to vector<8xf32>
    %509 = vector.shape_cast %508 : vector<8xf32> to vector<8x1xf32>
    %510 = tpu.reciprocal %509 {approx = true} : vector<8x1xf32> -> vector<8x1xf32>
    %511 = vector.broadcast %510 : vector<8x1xf32> to vector<8x8xf32>
    %512 = arith.mulf %507, %511 : vector<8x8xf32>
    %c0_202 = arith.constant 0 : index
    %c1_203 = arith.constant 1 : index
    %c0_204 = arith.constant 0 : index
    %c8_205 = arith.constant 8 : index
    %513 = vector.load %arg28[%c0_202, %c1_203, %c0_204, %c8_205] : memref<1x2x8x32xf32, #tpu.memory_space<vmem>>, vector<1x1x8x8xf32>
    %514 = vector.shape_cast %513 : vector<1x1x8x8xf32> to vector<8x8xf32>
    %515 = vector.shape_cast %512 : vector<8x8xf32> to vector<1x1x8x8xf32>
    tpu.vector_store %arg28[%c0_202, %c1_203, %c0_204, %c8_205], %515 {strides = array<i32>} : memref<1x2x8x32xf32, #tpu.memory_space<vmem>>, vector<1x1x8x8xf32>,
    %516 = vector.extract_strided_slice %456 {offsets = [0, 8], sizes = [8, 8], strides = [1, 1]} : vector<8x32xf32> to vector<8x8xf32>
    %517 = arith.truncf %512 : vector<8x8xf32> to vector<8x8xbf16>
    %518 = arith.truncf %516 : vector<8x8xf32> to vector<8x8xbf16>
    %cst_206 = arith.constant dense<0.000000e+00> : vector<8x8xf32>
    %519 = tpu.matmul %517, %518, %cst_206 {dimension_numbers = #tpu.dot_dimension_numbers<[1], [0], [0], [1], [0, 0, 1, 1], [], []>} : vector<8x8xbf16>, vector<8x8xbf16>, vector<8x8xf32> -> vector<8x8xf32>
    %520 = vector.extract_strided_slice %319 {offsets = [8, 0], sizes = [8, 32], strides = [1, 1]} : vector<32x32xbf16> to vector<8x32xbf16>
    %521 = arith.truncf %519 : vector<8x8xf32> to vector<8x8xbf16>
    %cst_207 = arith.constant dense<0.000000e+00> : vector<8x32xf32>
    %522 = tpu.matmul %521, %520, %cst_207 {dimension_numbers = #tpu.dot_dimension_numbers<[1], [0], [0], [1], [0, 0, 1, 1], [], []>} : vector<8x8xbf16>, vector<8x32xbf16>, vector<8x32xf32> -> vector<8x32xf32>
    %523 = arith.addf %491, %522 : vector<8x32xf32>
    %524 = vector.extract_strided_slice %454 {offsets = [0, 16], sizes = [8, 8], strides = [1, 1]} : vector<8x32xf32> to vector<8x8xf32>
    %525 = vector.extract_strided_slice %455 {offsets = [0, 16], sizes = [8, 8], strides = [1, 1]} : vector<8x32xf32> to vector<8x8xf32>
    %526 = arith.truncf %524 : vector<8x8xf32> to vector<8x8xbf16>
    %527 = arith.truncf %525 : vector<8x8xf32> to vector<8x8xbf16>
    %cst_208 = arith.constant dense<0.000000e+00> : vector<8x8xf32>
    %528 = tpu.matmul %526, %527, %cst_208 {dimension_numbers = #tpu.dot_dimension_numbers<[1], [1], [0], [0], [0, 0, 1, 0], [], []>} : vector<8x8xbf16>, vector<8x8xbf16>, vector<8x8xf32> -> vector<8x8xf32>
    %cst_209 = arith.constant 0.353553385 : f32
    %529 = vector.broadcast %cst_209 : f32 to vector<8x8xf32>
    %530 = arith.mulf %528, %529 : vector<8x8xf32>
    %cst_210 = arith.constant -1.000000e+30 : f32
    %531 = vector.shape_cast %460 : vector<1x8xi1> to vector<1x8xi1>
    %532 = vector.broadcast %531 : vector<1x8xi1> to vector<8x8xi1>
    %533 = vector.broadcast %cst_210 : f32 to vector<8x8xf32>
    %534 = arith.select %532, %533, %530 : vector<8x8xi1>, vector<8x8xf32>
    %cst_211 = arith.constant dense<0xFF800000> : vector<8xf32>
    %535 = vector.multi_reduction <maximumf>, %534, %cst_211 [1] : vector<8x8xf32> to vector<8xf32>
    %536 = vector.shape_cast %535 : vector<8xf32> to vector<8x1xf32>
    %537 = vector.broadcast %536 : vector<8x1xf32> to vector<8x8xf32>
    %538 = arith.subf %534, %537 : vector<8x8xf32>
    %539 = math.exp %538 : vector<8x8xf32>
    %cst_212 = arith.constant dense<0.000000e+00> : vector<8xf32>
    %540 = vector.multi_reduction <add>, %539, %cst_212 [1] : vector<8x8xf32> to vector<8xf32>
    %541 = vector.shape_cast %540 : vector<8xf32> to vector<8x1xf32>
    %542 = tpu.reciprocal %541 {approx = true} : vector<8x1xf32> -> vector<8x1xf32>
    %543 = vector.broadcast %542 : vector<8x1xf32> to vector<8x8xf32>
    %544 = arith.mulf %539, %543 : vector<8x8xf32>
    %c0_213 = arith.constant 0 : index
    %c1_214 = arith.constant 1 : index
    %c0_215 = arith.constant 0 : index
    %c16_216 = arith.constant 16 : index
    %545 = vector.load %arg28[%c0_213, %c1_214, %c0_215, %c16_216] : memref<1x2x8x32xf32, #tpu.memory_space<vmem>>, vector<1x1x8x8xf32>
    %546 = vector.shape_cast %545 : vector<1x1x8x8xf32> to vector<8x8xf32>
    %547 = vector.shape_cast %544 : vector<8x8xf32> to vector<1x1x8x8xf32>
    tpu.vector_store %arg28[%c0_213, %c1_214, %c0_215, %c16_216], %547 {strides = array<i32>} : memref<1x2x8x32xf32, #tpu.memory_space<vmem>>, vector<1x1x8x8xf32>,
    %548 = vector.extract_strided_slice %456 {offsets = [0, 16], sizes = [8, 8], strides = [1, 1]} : vector<8x32xf32> to vector<8x8xf32>
    %549 = arith.truncf %544 : vector<8x8xf32> to vector<8x8xbf16>
    %550 = arith.truncf %548 : vector<8x8xf32> to vector<8x8xbf16>
    %cst_217 = arith.constant dense<0.000000e+00> : vector<8x8xf32>
    %551 = tpu.matmul %549, %550, %cst_217 {dimension_numbers = #tpu.dot_dimension_numbers<[1], [0], [0], [1], [0, 0, 1, 1], [], []>} : vector<8x8xbf16>, vector<8x8xbf16>, vector<8x8xf32> -> vector<8x8xf32>
    %552 = vector.extract_strided_slice %319 {offsets = [16, 0], sizes = [8, 32], strides = [1, 1]} : vector<32x32xbf16> to vector<8x32xbf16>
    %553 = arith.truncf %551 : vector<8x8xf32> to vector<8x8xbf16>
    %cst_218 = arith.constant dense<0.000000e+00> : vector<8x32xf32>
    %554 = tpu.matmul %553, %552, %cst_218 {dimension_numbers = #tpu.dot_dimension_numbers<[1], [0], [0], [1], [0, 0, 1, 1], [], []>} : vector<8x8xbf16>, vector<8x32xbf16>, vector<8x32xf32> -> vector<8x32xf32>
    %555 = arith.addf %523, %554 : vector<8x32xf32>
    %556 = vector.extract_strided_slice %454 {offsets = [0, 24], sizes = [8, 8], strides = [1, 1]} : vector<8x32xf32> to vector<8x8xf32>
    %557 = vector.extract_strided_slice %455 {offsets = [0, 24], sizes = [8, 8], strides = [1, 1]} : vector<8x32xf32> to vector<8x8xf32>
    %558 = arith.truncf %556 : vector<8x8xf32> to vector<8x8xbf16>
    %559 = arith.truncf %557 : vector<8x8xf32> to vector<8x8xbf16>
    %cst_219 = arith.constant dense<0.000000e+00> : vector<8x8xf32>
    %560 = tpu.matmul %558, %559, %cst_219 {dimension_numbers = #tpu.dot_dimension_numbers<[1], [1], [0], [0], [0, 0, 1, 0], [], []>} : vector<8x8xbf16>, vector<8x8xbf16>, vector<8x8xf32> -> vector<8x8xf32>
    %cst_220 = arith.constant 0.353553385 : f32
    %561 = vector.broadcast %cst_220 : f32 to vector<8x8xf32>
    %562 = arith.mulf %560, %561 : vector<8x8xf32>
    %cst_221 = arith.constant -1.000000e+30 : f32
    %563 = vector.shape_cast %460 : vector<1x8xi1> to vector<1x8xi1>
    %564 = vector.broadcast %563 : vector<1x8xi1> to vector<8x8xi1>
    %565 = vector.broadcast %cst_221 : f32 to vector<8x8xf32>
    %566 = arith.select %564, %565, %562 : vector<8x8xi1>, vector<8x8xf32>
    %cst_222 = arith.constant dense<0xFF800000> : vector<8xf32>
    %567 = vector.multi_reduction <maximumf>, %566, %cst_222 [1] : vector<8x8xf32> to vector<8xf32>
    %568 = vector.shape_cast %567 : vector<8xf32> to vector<8x1xf32>
    %569 = vector.broadcast %568 : vector<8x1xf32> to vector<8x8xf32>
    %570 = arith.subf %566, %569 : vector<8x8xf32>
    %571 = math.exp %570 : vector<8x8xf32>
    %cst_223 = arith.constant dense<0.000000e+00> : vector<8xf32>
    %572 = vector.multi_reduction <add>, %571, %cst_223 [1] : vector<8x8xf32> to vector<8xf32>
    %573 = vector.shape_cast %572 : vector<8xf32> to vector<8x1xf32>
    %574 = tpu.reciprocal %573 {approx = true} : vector<8x1xf32> -> vector<8x1xf32>
    %575 = vector.broadcast %574 : vector<8x1xf32> to vector<8x8xf32>
    %576 = arith.mulf %571, %575 : vector<8x8xf32>
    %c0_224 = arith.constant 0 : index
    %c1_225 = arith.constant 1 : index
    %c0_226 = arith.constant 0 : index
    %c24_227 = arith.constant 24 : index
    %577 = vector.load %arg28[%c0_224, %c1_225, %c0_226, %c24_227] : memref<1x2x8x32xf32, #tpu.memory_space<vmem>>, vector<1x1x8x8xf32>
    %578 = vector.shape_cast %577 : vector<1x1x8x8xf32> to vector<8x8xf32>
    %579 = vector.shape_cast %576 : vector<8x8xf32> to vector<1x1x8x8xf32>
    tpu.vector_store %arg28[%c0_224, %c1_225, %c0_226, %c24_227], %579 {strides = array<i32>} : memref<1x2x8x32xf32, #tpu.memory_space<vmem>>, vector<1x1x8x8xf32>,
    %580 = vector.extract_strided_slice %456 {offsets = [0, 24], sizes = [8, 8], strides = [1, 1]} : vector<8x32xf32> to vector<8x8xf32>
    %581 = arith.truncf %576 : vector<8x8xf32> to vector<8x8xbf16>
    %582 = arith.truncf %580 : vector<8x8xf32> to vector<8x8xbf16>
    %cst_228 = arith.constant dense<0.000000e+00> : vector<8x8xf32>
    %583 = tpu.matmul %581, %582, %cst_228 {dimension_numbers = #tpu.dot_dimension_numbers<[1], [0], [0], [1], [0, 0, 1, 1], [], []>} : vector<8x8xbf16>, vector<8x8xbf16>, vector<8x8xf32> -> vector<8x8xf32>
    %584 = vector.extract_strided_slice %319 {offsets = [24, 0], sizes = [8, 32], strides = [1, 1]} : vector<32x32xbf16> to vector<8x32xbf16>
    %585 = arith.truncf %583 : vector<8x8xf32> to vector<8x8xbf16>
    %cst_229 = arith.constant dense<0.000000e+00> : vector<8x32xf32>
    %586 = tpu.matmul %585, %584, %cst_229 {dimension_numbers = #tpu.dot_dimension_numbers<[1], [0], [0], [1], [0, 0, 1, 1], [], []>} : vector<8x8xbf16>, vector<8x32xbf16>, vector<8x32xf32> -> vector<8x32xf32>
    %587 = arith.addf %555, %586 : vector<8x32xf32>
    %588 = tpu.concatenate %453, %587 in 0 : vector<8x32xf32>, vector<8x32xf32> -> vector<16x32xf32>
    %c0_230 = arith.constant 0 : index
    %c0_231 = arith.constant 0 : index
    %c0_232 = arith.constant 0 : index
    %589 = vector.load %arg15[%c0_230, %c0_231, %c0_232] : memref<1x1x32xf32, #tpu.memory_space<vmem>>, vector<1x1x32xf32>
    %590 = vector.shape_cast %589 : vector<1x1x32xf32> to vector<1x32xf32>
    %591 = vector.broadcast %590 : vector<1x32xf32> to vector<16x32xf32>
    %592 = arith.addf %588, %591 : vector<16x32xf32>
    %593 = arith.addf %299, %592 : vector<16x32xf32>
    %c0_233 = arith.constant 0 : index
    %c0_234 = arith.constant 0 : index
    %c0_235 = arith.constant 0 : index
    %594 = vector.load %arg18[%c0_233, %c0_234, %c0_235] : memref<1x1x32xf32, #tpu.memory_space<vmem>>, vector<1x1x32xf32>
    %595 = vector.shape_cast %594 : vector<1x1x32xf32> to vector<1x32xf32>
    %c0_236 = arith.constant 0 : index
    %c0_237 = arith.constant 0 : index
    %c0_238 = arith.constant 0 : index
    %596 = vector.load %arg19[%c0_236, %c0_237, %c0_238] : memref<1x1x32xf32, #tpu.memory_space<vmem>>, vector<1x1x32xf32>
    %597 = vector.shape_cast %596 : vector<1x1x32xf32> to vector<1x32xf32>
    %cst_239 = arith.constant dense<0.000000e+00> : vector<16xf32>
    %598 = vector.multi_reduction <add>, %593, %cst_239 [1] : vector<16x32xf32> to vector<16xf32>
    %599 = vector.shape_cast %598 : vector<16xf32> to vector<16x1xf32>
    %cst_240 = arith.constant 3.200000e+01 : f32
    %600 = vector.broadcast %cst_240 : f32 to vector<16x1xf32>
    %601 = arith.divf %599, %600 : vector<16x1xf32>
    %602 = vector.broadcast %601 : vector<16x1xf32> to vector<16x32xf32>
    %603 = arith.subf %593, %602 : vector<16x32xf32>
    %604 = arith.mulf %603, %603 : vector<16x32xf32>
    %cst_241 = arith.constant dense<0.000000e+00> : vector<16xf32>
    %605 = vector.multi_reduction <add>, %604, %cst_241 [1] : vector<16x32xf32> to vector<16xf32>
    %606 = vector.shape_cast %605 : vector<16xf32> to vector<16x1xf32>
    %cst_242 = arith.constant 3.200000e+01 : f32
    %607 = vector.broadcast %cst_242 : f32 to vector<16x1xf32>
    %608 = arith.divf %606, %607 : vector<16x1xf32>
    %609 = vector.broadcast %601 : vector<16x1xf32> to vector<16x32xf32>
    %610 = arith.subf %593, %609 : vector<16x32xf32>
    %cst_243 = arith.constant 9.99999974E-6 : f32
    %611 = vector.broadcast %cst_243 : f32 to vector<16x1xf32>
    %612 = arith.addf %608, %611 : vector<16x1xf32>
    %613 = math.rsqrt %612 : vector<16x1xf32>
    %614 = vector.broadcast %613 : vector<16x1xf32> to vector<16x32xf32>
    %615 = arith.mulf %610, %614 : vector<16x32xf32>
    %616 = vector.broadcast %595 : vector<1x32xf32> to vector<16x32xf32>
    %617 = arith.mulf %615, %616 : vector<16x32xf32>
    %618 = vector.broadcast %597 : vector<1x32xf32> to vector<16x32xf32>
    %619 = arith.addf %617, %618 : vector<16x32xf32>
    %c0_244 = arith.constant 0 : index
    %c0_245 = arith.constant 0 : index
    %c0_246 = arith.constant 0 : index
    %620 = vector.load %arg22[%c0_244, %c0_245, %c0_246] : memref<1x32x128xbf16, #tpu.memory_space<vmem>>, vector<1x32x128xbf16>
    %621 = vector.shape_cast %620 : vector<1x32x128xbf16> to vector<32x128xbf16>
    %622 = arith.truncf %619 : vector<16x32xf32> to vector<16x32xbf16>
    %cst_247 = arith.constant dense<0.000000e+00> : vector<16x128xf32>
    %623 = tpu.matmul %622, %621, %cst_247 {dimension_numbers = #tpu.dot_dimension_numbers<[1], [0], [0], [1], [0, 0, 1, 1], [], []>} : vector<16x32xbf16>, vector<32x128xbf16>, vector<16x128xf32> -> vector<16x128xf32>
    %c0_248 = arith.constant 0 : index
    %c0_249 = arith.constant 0 : index
    %c0_250 = arith.constant 0 : index
    %624 = vector.load %arg23[%c0_248, %c0_249, %c0_250] : memref<1x1x128xf32, #tpu.memory_space<vmem>>, vector<1x1x128xf32>
    %625 = vector.shape_cast %624 : vector<1x1x128xf32> to vector<1x128xf32>
    %626 = vector.broadcast %625 : vector<1x128xf32> to vector<16x128xf32>
    %627 = arith.addf %623, %626 : vector<16x128xf32>
    %cst_251 = arith.constant 5.000000e-01 : f32
    %628 = vector.broadcast %cst_251 : f32 to vector<16x128xf32>
    %629 = arith.mulf %628, %627 : vector<16x128xf32>
    %cst_252 = arith.constant 0.707106769 : f32
    %630 = vector.broadcast %cst_252 : f32 to vector<16x128xf32>
    %631 = arith.mulf %627, %630 : vector<16x128xf32>
    %632 = math.erf %631 : vector<16x128xf32>
    %cst_253 = arith.constant 1.000000e+00 : f32
    %633 = vector.broadcast %cst_253 : f32 to vector<16x128xf32>
    %634 = arith.addf %633, %632 : vector<16x128xf32>
    %635 = arith.mulf %629, %634 : vector<16x128xf32>
    %c0_254 = arith.constant 0 : index
    %c0_255 = arith.constant 0 : index
    %c0_256 = arith.constant 0 : index
    %636 = vector.load %arg24[%c0_254, %c0_255, %c0_256] : memref<1x128x32xbf16, #tpu.memory_space<vmem>>, vector<1x128x32xbf16>
    %637 = vector.shape_cast %636 : vector<1x128x32xbf16> to vector<128x32xbf16>
    %638 = arith.truncf %635 : vector<16x128xf32> to vector<16x128xbf16>
    %cst_257 = arith.constant dense<0.000000e+00> : vector<16x32xf32>
    %639 = tpu.matmul %638, %637, %cst_257 {dimension_numbers = #tpu.dot_dimension_numbers<[1], [0], [0], [1], [0, 0, 1, 1], [], []>} : vector<16x128xbf16>, vector<128x32xbf16>, vector<16x32xf32> -> vector<16x32xf32>
    %c0_258 = arith.constant 0 : index
    %c0_259 = arith.constant 0 : index
    %c0_260 = arith.constant 0 : index
    %640 = vector.load %arg25[%c0_258, %c0_259, %c0_260] : memref<1x1x32xf32, #tpu.memory_space<vmem>>, vector<1x1x32xf32>
    %641 = vector.shape_cast %640 : vector<1x1x32xf32> to vector<1x32xf32>
    %642 = vector.broadcast %641 : vector<1x32xf32> to vector<16x32xf32>
    %643 = arith.addf %639, %642 : vector<16x32xf32>
    %644 = arith.addf %619, %643 : vector<16x32xf32>
    %c0_261 = arith.constant 0 : index
    %c0_262 = arith.constant 0 : index
    %c0_263 = arith.constant 0 : index
    %645 = vector.load %arg20[%c0_261, %c0_262, %c0_263] : memref<1x1x32xf32, #tpu.memory_space<vmem>>, vector<1x1x32xf32>
    %646 = vector.shape_cast %645 : vector<1x1x32xf32> to vector<1x32xf32>
    %c0_264 = arith.constant 0 : index
    %c0_265 = arith.constant 0 : index
    %c0_266 = arith.constant 0 : index
    %647 = vector.load %arg21[%c0_264, %c0_265, %c0_266] : memref<1x1x32xf32, #tpu.memory_space<vmem>>, vector<1x1x32xf32>
    %648 = vector.shape_cast %647 : vector<1x1x32xf32> to vector<1x32xf32>
    %cst_267 = arith.constant dense<0.000000e+00> : vector<16xf32>
    %649 = vector.multi_reduction <add>, %644, %cst_267 [1] : vector<16x32xf32> to vector<16xf32>
    %650 = vector.shape_cast %649 : vector<16xf32> to vector<16x1xf32>
    %cst_268 = arith.constant 3.200000e+01 : f32
    %651 = vector.broadcast %cst_268 : f32 to vector<16x1xf32>
    %652 = arith.divf %650, %651 : vector<16x1xf32>
    %653 = vector.broadcast %652 : vector<16x1xf32> to vector<16x32xf32>
    %654 = arith.subf %644, %653 : vector<16x32xf32>
    %655 = arith.mulf %654, %654 : vector<16x32xf32>
    %cst_269 = arith.constant dense<0.000000e+00> : vector<16xf32>
    %656 = vector.multi_reduction <add>, %655, %cst_269 [1] : vector<16x32xf32> to vector<16xf32>
    %657 = vector.shape_cast %656 : vector<16xf32> to vector<16x1xf32>
    %cst_270 = arith.constant 3.200000e+01 : f32
    %658 = vector.broadcast %cst_270 : f32 to vector<16x1xf32>
    %659 = arith.divf %657, %658 : vector<16x1xf32>
    %660 = vector.broadcast %652 : vector<16x1xf32> to vector<16x32xf32>
    %661 = arith.subf %644, %660 : vector<16x32xf32>
    %cst_271 = arith.constant 9.99999974E-6 : f32
    %662 = vector.broadcast %cst_271 : f32 to vector<16x1xf32>
    %663 = arith.addf %659, %662 : vector<16x1xf32>
    %664 = math.rsqrt %663 : vector<16x1xf32>
    %665 = vector.broadcast %664 : vector<16x1xf32> to vector<16x32xf32>
    %666 = arith.mulf %661, %665 : vector<16x32xf32>
    %667 = vector.broadcast %646 : vector<1x32xf32> to vector<16x32xf32>
    %668 = arith.mulf %666, %667 : vector<16x32xf32>
    %669 = vector.broadcast %648 : vector<1x32xf32> to vector<16x32xf32>
    %670 = arith.addf %668, %669 : vector<16x32xf32>
    %671 = arith.addf %619, %670 : vector<16x32xf32>
    %672 = vector.shape_cast %671 : vector<16x32xf32> to vector<2x8x32xf32>
    %c0_272 = arith.constant 0 : index
    %c0_273 = arith.constant 0 : index
    %c0_274 = arith.constant 0 : index
    %673 = vector.load %arg26[%c0_272, %c0_273, %c0_274] : memref<2x8x32xf32, #tpu.memory_space<vmem>>, vector<2x8x32xf32>
    tpu.vector_store %arg26[%c0_272, %c0_273, %c0_274], %672 {strides = array<i32>} : memref<2x8x32xf32, #tpu.memory_space<vmem>>, vector<2x8x32xf32>,
    return
  }
  func.func @transform_0(%arg0: i32, %arg1: i32) -> (i32, i32, i32) {
    %c0_i32 = arith.constant 0 : i32
    %c0_i32_0 = arith.constant 0 : i32
    %c0_i32_1 = arith.constant 0 : i32
    return %arg0, %c0_i32, %c0_i32_0 : i32, i32, i32
  }
  func.func @transform_1(%arg0: i32, %arg1: i32) -> (i32, i32, i32) {
    %c0_i32 = arith.constant 0 : i32
    %c0_i32_0 = arith.constant 0 : i32
    %c0_i32_1 = arith.constant 0 : i32
    return %arg0, %c0_i32, %c0_i32_0 : i32, i32, i32
  }
  func.func @transform_2(%arg0: i32, %arg1: i32) -> (i32, i32, i32) {
    %c0_i32 = arith.constant 0 : i32
    %c0_i32_0 = arith.constant 0 : i32
    %c0_i32_1 = arith.constant 0 : i32
    %c0_i32_2 = arith.constant 0 : i32
    return %c0_i32, %c0_i32_0, %c0_i32_1 : i32, i32, i32
  }
  func.func @transform_3(%arg0: i32, %arg1: i32) -> (i32, i32, i32) {
    %c0_i32 = arith.constant 0 : i32
    %c0_i32_0 = arith.constant 0 : i32
    %c0_i32_1 = arith.constant 0 : i32
    return %arg0, %c0_i32, %c0_i32_0 : i32, i32, i32
  }
  func.func @transform_4(%arg0: i32, %arg1: i32) -> (i32, i32, i32) {
    %c0_i32 = arith.constant 0 : i32
    %c0_i32_0 = arith.constant 0 : i32
    %c0_i32_1 = arith.constant 0 : i32
    return %arg1, %c0_i32, %c0_i32_0 : i32, i32, i32
  }
  func.func @transform_5(%arg0: i32, %arg1: i32) -> (i32, i32, i32) {
    %c0_i32 = arith.constant 0 : i32
    %c0_i32_0 = arith.constant 0 : i32
    %c0_i32_1 = arith.constant 0 : i32
    return %arg1, %c0_i32, %c0_i32_0 : i32, i32, i32
  }
  func.func @transform_6(%arg0: i32, %arg1: i32) -> (i32, i32, i32) {
    %c0_i32 = arith.constant 0 : i32
    %c0_i32_0 = arith.constant 0 : i32
    %c0_i32_1 = arith.constant 0 : i32
    return %arg1, %c0_i32, %c0_i32_0 : i32, i32, i32
  }
  func.func @transform_7(%arg0: i32, %arg1: i32) -> (i32, i32, i32) {
    %c0_i32 = arith.constant 0 : i32
    %c0_i32_0 = arith.constant 0 : i32
    %c0_i32_1 = arith.constant 0 : i32
    return %arg1, %c0_i32, %c0_i32_0 : i32, i32, i32
  }
  func.func @transform_8(%arg0: i32, %arg1: i32) -> (i32, i32, i32) {
    %c0_i32 = arith.constant 0 : i32
    %c0_i32_0 = arith.constant 0 : i32
    %c0_i32_1 = arith.constant 0 : i32
    return %arg1, %c0_i32, %c0_i32_0 : i32, i32, i32
  }
  func.func @transform_9(%arg0: i32, %arg1: i32) -> (i32, i32, i32) {
    %c0_i32 = arith.constant 0 : i32
    %c0_i32_0 = arith.constant 0 : i32
    %c0_i32_1 = arith.constant 0 : i32
    return %arg1, %c0_i32, %c0_i32_0 : i32, i32, i32
  }
  func.func @transform_10(%arg0: i32, %arg1: i32) -> (i32, i32, i32) {
    %c0_i32 = arith.constant 0 : i32
    %c0_i32_0 = arith.constant 0 : i32
    %c0_i32_1 = arith.constant 0 : i32
    return %arg1, %c0_i32, %c0_i32_0 : i32, i32, i32
  }
  func.func @transform_11(%arg0: i32, %arg1: i32) -> (i32, i32, i32) {
    %c0_i32 = arith.constant 0 : i32
    %c0_i32_0 = arith.constant 0 : i32
    %c0_i32_1 = arith.constant 0 : i32
    return %arg1, %c0_i32, %c0_i32_0 : i32, i32, i32
  }
  func.func @transform_12(%arg0: i32, %arg1: i32) -> (i32, i32, i32) {
    %c0_i32 = arith.constant 0 : i32
    %c0_i32_0 = arith.constant 0 : i32
    %c0_i32_1 = arith.constant 0 : i32
    return %arg1, %c0_i32, %c0_i32_0 : i32, i32, i32
  }
  func.func @transform_13(%arg0: i32, %arg1: i32) -> (i32, i32, i32) {
    %c0_i32 = arith.constant 0 : i32
    %c0_i32_0 = arith.constant 0 : i32
    %c0_i32_1 = arith.constant 0 : i32
    return %arg1, %c0_i32, %c0_i32_0 : i32, i32, i32
  }
  func.func @transform_14(%arg0: i32, %arg1: i32) -> (i32, i32, i32) {
    %c0_i32 = arith.constant 0 : i32
    %c0_i32_0 = arith.constant 0 : i32
    %c0_i32_1 = arith.constant 0 : i32
    return %arg1, %c0_i32, %c0_i32_0 : i32, i32, i32
  }
  func.func @transform_15(%arg0: i32, %arg1: i32) -> (i32, i32, i32) {
    %c0_i32 = arith.constant 0 : i32
    %c0_i32_0 = arith.constant 0 : i32
    %c0_i32_1 = arith.constant 0 : i32
    return %arg1, %c0_i32, %c0_i32_0 : i32, i32, i32
  }
  func.func @transform_16(%arg0: i32, %arg1: i32) -> (i32, i32, i32) {
    %c0_i32 = arith.constant 0 : i32
    %c0_i32_0 = arith.constant 0 : i32
    %c0_i32_1 = arith.constant 0 : i32
    return %arg1, %c0_i32, %c0_i32_0 : i32, i32, i32
  }
  func.func @transform_17(%arg0: i32, %arg1: i32) -> (i32, i32, i32) {
    %c0_i32 = arith.constant 0 : i32
    %c0_i32_0 = arith.constant 0 : i32
    %c0_i32_1 = arith.constant 0 : i32
    return %arg1, %c0_i32, %c0_i32_0 : i32, i32, i32
  }
  func.func @transform_18(%arg0: i32, %arg1: i32) -> (i32, i32, i32) {
    %c0_i32 = arith.constant 0 : i32
    %c0_i32_0 = arith.constant 0 : i32
    %c0_i32_1 = arith.constant 0 : i32
    return %arg1, %c0_i32, %c0_i32_0 : i32, i32, i32
  }
  func.func @transform_19(%arg0: i32, %arg1: i32) -> (i32, i32, i32) {
    %c0_i32 = arith.constant 0 : i32
    %c0_i32_0 = arith.constant 0 : i32
    %c0_i32_1 = arith.constant 0 : i32
    return %arg1, %c0_i32, %c0_i32_0 : i32, i32, i32
  }
  func.func @transform_20(%arg0: i32, %arg1: i32) -> (i32, i32, i32) {
    %c0_i32 = arith.constant 0 : i32
    %c0_i32_0 = arith.constant 0 : i32
    %c0_i32_1 = arith.constant 0 : i32
    return %arg1, %c0_i32, %c0_i32_0 : i32, i32, i32
  }
  func.func @transform_21(%arg0: i32, %arg1: i32) -> (i32, i32, i32) {
    %c0_i32 = arith.constant 0 : i32
    %c0_i32_0 = arith.constant 0 : i32
    %c0_i32_1 = arith.constant 0 : i32
    return %arg1, %c0_i32, %c0_i32_0 : i32, i32, i32
  }
  func.func @transform_22(%arg0: i32, %arg1: i32) -> (i32, i32, i32) {
    %c0_i32 = arith.constant 0 : i32
    %c0_i32_0 = arith.constant 0 : i32
    %c0_i32_1 = arith.constant 0 : i32
    return %arg1, %c0_i32, %c0_i32_0 : i32, i32, i32
  }
  func.func @transform_23(%arg0: i32, %arg1: i32) -> (i32, i32, i32) {
    %c0_i32 = arith.constant 0 : i32
    %c0_i32_0 = arith.constant 0 : i32
    %c0_i32_1 = arith.constant 0 : i32
    return %arg1, %c0_i32, %c0_i32_0 : i32, i32, i32
  }
  func.func @transform_24(%arg0: i32, %arg1: i32) -> (i32, i32, i32) {
    %c0_i32 = arith.constant 0 : i32
    %c0_i32_0 = arith.constant 0 : i32
    %c0_i32_1 = arith.constant 0 : i32
    return %arg0, %c0_i32, %c0_i32_0 : i32, i32, i32
  }
  func.func @transform_25(%arg0: i32, %arg1: i32) -> (i32, i32, i32, i32) {
    %c0_i32 = arith.constant 0 : i32
    %c0_i32_0 = arith.constant 0 : i32
    %c0_i32_1 = arith.constant 0 : i32
    return %arg1, %arg0, %c0_i32, %c0_i32_0 : i32, i32, i32, i32
  }
  func.func @transform_26(%arg0: i32, %arg1: i32) -> (i32, i32, i32, i32) {
    %c0_i32 = arith.constant 0 : i32
    %c0_i32_0 = arith.constant 0 : i32
    %c0_i32_1 = arith.constant 0 : i32
    return %arg1, %arg0, %c0_i32, %c0_i32_0 : i32, i32, i32, i32
  }
}

</mosaic_0001>

<bundles_post_ra>
// kernel: squeeze.11
= control target key start
LH: loop header
LB: loop body
LE: loop exit
PB: predicated region body
PF: predicated region fallthrough
CT: control target
= control target key end

     0   :  { %vm3_vm0 = vcmask 64512   ;;  %s399_s12 = smov 120   ;;  %s401_s15 = smov 104   ;;  %s552_s0 = inlined_call_operand.vmem [shape: f32[1,4,8,32], index: 0, kind: input, shape index: {}]   ;;  %s553_s1 = inlined_call_operand.vmem [shape: f32[4,8,4,8], index: 1, kind: output, shape index: {}]  }
   0x1   :  { %v357_v0 = vld [vmem:[%s552_s0 + $0x10] sm:$0xff]   ;;  %v27_v1 = vld [vmem:[%s552_s0] sm:$0xff]   ;;  %v358_v2 = vld [vmem:[%s552_s0 + $0x18] sm:$0xff]  }
   0x2   :  { %46 = vrot.lane.b32.xlu1 %v357_v0, %s399_s12  ;;  %28 = vrot.lane.b32.xlu0 %v27_v1, %s399_s12  ;;  %v356_v3 = vld [vmem:[%s552_s0 + $0x8] sm:$0xff]   ;;  %4 = vst.msk [vmem:[#allocation0] ss:$8 sm:$0xf] %vm3_vm0, %v27_v1   ;;  %s400_s0 = smov 112  }
   0x3   :  { %5 = vst.msk [vmem:[#allocation0] ss:$8 sm:$0xf0] %vm3_vm0, %v27_v1   ;;  %24 = vst.msk [vmem:[#allocation0 + $0xc0] ss:$8 sm:$0xf] %vm3_vm0, %v358_v2  }
   0x4   :  { %26 = vst.msk [vmem:[#allocation0 + $0xc0] ss:$8 sm:$0xf0] %vm3_vm0, %v358_v2   ;;  %17 = vst.msk [vmem:[#allocation0 + $0x80] ss:$8 sm:$0xf] %vm3_vm0, %v357_v0  }
   0x5   :  { %19 = vst.msk [vmem:[#allocation0 + $0x80] ss:$8 sm:$0xf0] %vm3_vm0, %v357_v0   ;;  %12 = vst.msk [vmem:[#allocation0 + $0x40] ss:$8 sm:$0xf0] %vm3_vm0, %v356_v3  }
   0x6   :  { %10 = vst.msk [vmem:[#allocation0 + $0x40] ss:$8 sm:$0xf] %vm3_vm0, %v356_v3   ;;  %55 = vrot.lane.b32.xlu1 %v358_v2, %s399_s12  ;;  %37 = vrot.lane.b32.xlu0 %v356_v3, %s399_s12 }
   0xa   :  { %72 = vrot.lane.b32.xlu1 %v356_v3, %s400_s0  ;;  %63 = vrot.lane.b32.xlu0 %v27_v1, %s400_s0 }
   0xe   :  { %90 = vrot.lane.b32.xlu1 %v358_v2, %s400_s0  ;;  %81 = vrot.lane.b32.xlu0 %v357_v0, %s400_s0 }
  0x12   :  { %107 = vrot.lane.b32.xlu1 %v356_v3, %s401_s15  ;;  %98 = vrot.lane.b32.xlu0 %v27_v1, %s401_s15 }
  0x16   :  { %125 = vrot.lane.b32.xlu1 %v358_v2, %s401_s15  ;;  %116 = vrot.lane.b32.xlu0 %v357_v0, %s401_s15 }
  0x74   :  { %v47_v4 = vpop.permute.xlu1 %46   ;;  %v29_v5 = vpop.permute.xlu0 %28  }
  0x75   :  { %50 = vst.msk [vmem:[#allocation0 + $0x81] ss:$8 sm:$0xf] %vm3_vm0, %v47_v4   ;;  %52 = vst.msk [vmem:[#allocation0 + $0x81] ss:$8 sm:$0xf0] %vm3_vm0, %v47_v4  }
  0x76   :  { %32 = vst.msk [vmem:[#allocation0 + $0x1] ss:$8 sm:$0xf] %vm3_vm0, %v29_v5   ;;  %34 = vst.msk [vmem:[#allocation0 + $0x1] ss:$8 sm:$0xf0] %vm3_vm0, %v29_v5  }
  0x78   :  { %v56_v6 = vpop.permute.xlu1 %55   ;;  %v38_v7 = vpop.permute.xlu0 %37  }
  0x79   :  { %59 = vst.msk [vmem:[#allocation0 + $0xc1] ss:$8 sm:$0xf] %vm3_vm0, %v56_v6   ;;  %61 = vst.msk [vmem:[#allocation0 + $0xc1] ss:$8 sm:$0xf0] %vm3_vm0, %v56_v6  }
  0x7a   :  { %41 = vst.msk [vmem:[#allocation0 + $0x41] ss:$8 sm:$0xf] %vm3_vm0, %v38_v7   ;;  %43 = vst.msk [vmem:[#allocation0 + $0x41] ss:$8 sm:$0xf0] %vm3_vm0, %v38_v7  }
  0x7c   :  { %v73_v8 = vpop.permute.xlu1 %72   ;;  %v64_v9 = vpop.permute.xlu0 %63  }
  0x7d   :  { %76 = vst.msk [vmem:[#allocation0 + $0x42] ss:$8 sm:$0xf] %vm3_vm0, %v73_v8   ;;  %78 = vst.msk [vmem:[#allocation0 + $0x42] ss:$8 sm:$0xf0] %vm3_vm0, %v73_v8  }
  0x7e   :  { %67 = vst.msk [vmem:[#allocation0 + $0x2] ss:$8 sm:$0xf] %vm3_vm0, %v64_v9   ;;  %69 = vst.msk [vmem:[#allocation0 + $0x2] ss:$8 sm:$0xf0] %vm3_vm0, %v64_v9  }
  0x80   :  { %v91_v10 = vpop.permute.xlu1 %90   ;;  %v82_v11 = vpop.permute.xlu0 %81  }
  0x81   :  { %94 = vst.msk [vmem:[#allocation0 + $0xc2] ss:$8 sm:$0xf] %vm3_vm0, %v91_v10   ;;  %96 = vst.msk [vmem:[#allocation0 + $0xc2] ss:$8 sm:$0xf0] %vm3_vm0, %v91_v10  }
  0x82   :  { %85 = vst.msk [vmem:[#allocation0 + $0x82] ss:$8 sm:$0xf] %vm3_vm0, %v82_v11   ;;  %87 = vst.msk [vmem:[#allocation0 + $0x82] ss:$8 sm:$0xf0] %vm3_vm0, %v82_v11  }
  0x84   :  { %v108_v12 = vpop.permute.xlu1 %107   ;;  %v99_v13 = vpop.permute.xlu0 %98  }
  0x85   :  { %111 = vst.msk [vmem:[#allocation0 + $0x43] ss:$8 sm:$0xf] %vm3_vm0, %v108_v12   ;;  %113 = vst.msk [vmem:[#allocation0 + $0x43] ss:$8 sm:$0xf0] %vm3_vm0, %v108_v12  }
  0x86   :  { %102 = vst.msk [vmem:[#allocation0 + $0x3] ss:$8 sm:$0xf] %vm3_vm0, %v99_v13   ;;  %104 = vst.msk [vmem:[#allocation0 + $0x3] ss:$8 sm:$0xf0] %vm3_vm0, %v99_v13  }
  0x88   :  { %v126_v14 = vpop.permute.xlu1 %125   ;;  %v117_v15 = vpop.permute.xlu0 %116  }
  0x89   :  { %129 = vst.msk [vmem:[#allocation0 + $0xc3] ss:$8 sm:$0xf] %vm3_vm0, %v126_v14   ;;  %131 = vst.msk [vmem:[#allocation0 + $0xc3] ss:$8 sm:$0xf0] %vm3_vm0, %v126_v14  }
  0x8a   :  { %120 = vst.msk [vmem:[#allocation0 + $0x83] ss:$8 sm:$0xf] %vm3_vm0, %v117_v15   ;;  %122 = vst.msk [vmem:[#allocation0 + $0x83] ss:$8 sm:$0xf0] %vm3_vm0, %v117_v15  }
  0x8c   :  { %v180_v16 = vld [vmem:[#allocation0 + $0x40] sm:$0xf]  ;;  %v186_v17 = vld [vmem:[#allocation0 + $0x48] sm:$0xf]  ;;  %v192_v18 = vld [vmem:[#allocation0 + $0x50] sm:$0xf] }
  0x8d   :  { %372 = vst [vmem:[%s553_s1 + $0x20] sm:$0xf] %v180_v16  ;;  %373 = vst [vmem:[%s553_s1 + $0x24] sm:$0xf] %v186_v17  ;;  %v198_v19 = vld [vmem:[#allocation0 + $0x58] sm:$0xf] }
  0x8e   :  { %374 = vst [vmem:[%s553_s1 + $0x28] sm:$0xf] %v192_v18  ;;  %v204_v20 = vld [vmem:[#allocation0 + $0x60] sm:$0xf]  ;;  %v210_v21 = vld [vmem:[#allocation0 + $0x68] sm:$0xf] }
  0x8f   :  { %375 = vst [vmem:[%s553_s1 + $0x2c] sm:$0xf] %v198_v19  ;;  %v216_v22 = vld [vmem:[#allocation0 + $0x70] sm:$0xf]  ;;  %v222_v23 = vld [vmem:[#allocation0 + $0x78] sm:$0xf] }
  0x90   :  { %v135_v24 = vld [vmem:[#allocation0] sm:$0xf]  ;;  %376 = vst [vmem:[%s553_s1 + $0x30] sm:$0xf] %v204_v20  ;;  %377 = vst [vmem:[%s553_s1 + $0x34] sm:$0xf] %v210_v21 }
  0x91   :  { %137 = vst [vmem:[%s553_s1] sm:$0xf] %v135_v24  ;;  %v139_v25 = vld [vmem:[#allocation0 + $0x8] sm:$0xf]  ;;  %v144_v26 = vld [vmem:[#allocation0 + $0x10] sm:$0xf] }
  0x92   :  { %v150_v27 = vld [vmem:[#allocation0 + $0x18] sm:$0xf]  ;;  %378 = vst [vmem:[%s553_s1 + $0x38] sm:$0xf] %v216_v22  ;;  %379 = vst [vmem:[%s553_s1 + $0x3c] sm:$0xf] %v222_v23 }
  0x93   :  { %365 = vst [vmem:[%s553_s1 + $0x4] sm:$0xf] %v139_v25  ;;  %366 = vst [vmem:[%s553_s1 + $0x8] sm:$0xf] %v144_v26  ;;  %v156_v28 = vld [vmem:[#allocation0 + $0x20] sm:$0xf] }
  0x94   :  { %367 = vst [vmem:[%s553_s1 + $0xc] sm:$0xf] %v150_v27  ;;  %v162_v29 = vld [vmem:[#allocation0 + $0x28] sm:$0xf]  ;;  %v168_v30 = vld [vmem:[#allocation0 + $0x30] sm:$0xf] }
  0x95   :  { %368 = vst [vmem:[%s553_s1 + $0x10] sm:$0xf] %v156_v28  ;;  %369 = vst [vmem:[%s553_s1 + $0x14] sm:$0xf] %v162_v29  ;;  %v174_v31 = vld [vmem:[#allocation0 + $0x38] sm:$0xf] }
  0x96   :  { %370 = vst [vmem:[%s553_s1 + $0x18] sm:$0xf] %v168_v30  ;;  %v276_v32 = vld [vmem:[#allocation0 + $0xc0] sm:$0xf]  ;;  %v282_v33 = vld [vmem:[#allocation0 + $0xc8] sm:$0xf] }
  0x97   :  { %371 = vst [vmem:[%s553_s1 + $0x1c] sm:$0xf] %v174_v31  ;;  %388 = vst [vmem:[%s553_s1 + $0x60] sm:$0xf] %v276_v32  ;;  %v288_v34 = vld [vmem:[#allocation0 + $0xd0] sm:$0xf] }
  0x98   :  { %389 = vst [vmem:[%s553_s1 + $0x64] sm:$0xf] %v282_v33  ;;  %v294_v35 = vld [vmem:[#allocation0 + $0xd8] sm:$0xf]  ;;  %v300_v36 = vld [vmem:[#allocation0 + $0xe0] sm:$0xf] }
  0x99   :  { %390 = vst [vmem:[%s553_s1 + $0x68] sm:$0xf] %v288_v34  ;;  %391 = vst [vmem:[%s553_s1 + $0x6c] sm:$0xf] %v294_v35  ;;  %v306_v37 = vld [vmem:[#allocation0 + $0xe8] sm:$0xf] }
  0x9a   :  { %392 = vst [vmem:[%s553_s1 + $0x70] sm:$0xf] %v300_v36  ;;  %v312_v38 = vld [vmem:[#allocation0 + $0xf0] sm:$0xf]  ;;  %v318_v39 = vld [vmem:[#allocation0 + $0xf8] sm:$0xf] }
  0x9b   :  { %393 = vst [vmem:[%s553_s1 + $0x74] sm:$0xf] %v306_v37  ;;  %394 = vst [vmem:[%s553_s1 + $0x78] sm:$0xf] %v312_v38  ;;  %v228_v40 = vld [vmem:[#allocation0 + $0x80] sm:$0xf] }
  0x9c   :  { %395 = vst [vmem:[%s553_s1 + $0x7c] sm:$0xf] %v318_v39  ;;  %v234_v41 = vld [vmem:[#allocation0 + $0x88] sm:$0xf]  ;;  %v240_v42 = vld [vmem:[#allocation0 + $0x90] sm:$0xf] }
  0x9d   :  { %380 = vst [vmem:[%s553_s1 + $0x40] sm:$0xf] %v228_v40  ;;  %381 = vst [vmem:[%s553_s1 + $0x44] sm:$0xf] %v234_v41  ;;  %v246_v43 = vld [vmem:[#allocation0 + $0x98] sm:$0xf] }
  0x9e   :  { %382 = vst [vmem:[%s553_s1 + $0x48] sm:$0xf] %v240_v42  ;;  %v252_v44 = vld [vmem:[#allocation0 + $0xa0] sm:$0xf]  ;;  %v258_v45 = vld [vmem:[#allocation0 + $0xa8] sm:$0xf] }
  0x9f   :  { %383 = vst [vmem:[%s553_s1 + $0x4c] sm:$0xf] %v246_v43  ;;  %384 = vst [vmem:[%s553_s1 + $0x50] sm:$0xf] %v252_v44  ;;  %v264_v46 = vld [vmem:[#allocation0 + $0xb0] sm:$0xf] }
  0xa0   :  { %385 = vst [vmem:[%s553_s1 + $0x54] sm:$0xf] %v258_v45  ;;  %v270_v47 = vld [vmem:[#allocation0 + $0xb8] sm:$0xf]  ;;  %386 = vst [vmem:[%s553_s1 + $0x58] sm:$0xf] %v264_v46 }
  0xa1   :  { %387 = vst [vmem:[%s553_s1 + $0x5c] sm:$0xf] %v270_v47 }

// kernel: decoder_forward.1
= control target key start
LH: loop header
LB: loop body
LE: loop exit
PB: predicated region body
PF: predicated region fallthrough
CT: control target
= control target key end

     0   :  { %s6869_s0 = inlined_call_operand.vmem [shape: f32[4,8,32], index: 0, kind: input, shape index: {}]   ;;  %s6870_s1 = inlined_call_operand.vmem [shape: f32[4,8,32], index: 1, kind: input, shape index: {}]   ;;  %s6871_s2 = inlined_call_operand.vmem [shape: f32[1,8,8], index: 2, kind: input, shape index: {}]   ;;  %s6872_s3 = inlined_call_operand.vmem [shape: f32[4,1,8], index: 3, kind: input, shape index: {}]   ;;  %s6873_s4 = inlined_call_operand.vmem [shape: bf16[2,32,96], index: 4, kind: input, shape index: {}]   ;;  %s6874_s5 = inlined_call_operand.vmem [shape: f32[2,1,96], index: 5, kind: input, shape index: {}]   ;;  %s6875_s6 = inlined_call_operand.vmem [shape: bf16[2,32,32], index: 6, kind: input, shape index: {}]   ;;  %s6876_s7 = inlined_call_operand.vmem [shape: f32[2,1,32], index: 7, kind: input, shape index: {}]   ;;  %s6877_s8 = inlined_call_operand.vmem [shape: bf16[2,32,32], index: 8, kind: input, shape index: {}]   ;;  %s6878_s9 = inlined_call_operand.vmem [shape: f32[2,1,32], index: 9, kind: input, shape index: {}]   ;;  %s6879_s10 = inlined_call_operand.vmem [shape: bf16[2,32,64], index: 10, kind: input, shape index: {}]   ;;  %s6880_s11 = inlined_call_operand.vmem [shape: f32[2,1,64], index: 11, kind: input, shape index: {}]   ;;  %s6881_s12 = inlined_call_operand.vmem [shape: bf16[2,32,32], index: 12, kind: input, shape index: {}]   ;;  %s6882_s13 = inlined_call_operand.vmem [shape: f32[2,1,32], index: 13, kind: input, shape index: {}]   ;;  %s6883_s14 = inlined_call_operand.vmem [shape: f32[2,1,32], index: 14, kind: input, shape index: {}]   ;;  %s6884_s15 = inlined_call_operand.vmem [shape: f32[2,1,32], index: 15, kind: input, shape index: {}]   ;;  %s6885_s16 = inlined_call_operand.vmem [shape: f32[2,1,32], index: 16, kind: input, shape index: {}]   ;;  %s6886_s17 = inlined_call_operand.vmem [shape: f32[2,1,32], index: 17, kind: input, shape index: {}]   ;;  %s6887_s18 = inlined_call_operand.vmem [shape: f32[2,1,32], index: 18, kind: input, shape index: {}]   ;;  %s6888_s19 = inlined_call_operand.vmem [shape: f32[2,1,32], index: 19, kind: input, shape index: {}]   ;;  %s6889_s20 = inlined_call_operand.vmem [shape: bf16[2,32,128], index: 20, kind: input, shape index: {}]   ;;  %s6890_s21 = inlined_call_operand.vmem [shape: f32[2,1,128], index: 21, kind: input, shape index: {}]   ;;  %s6891_s22 = inlined_call_operand.vmem [shape: bf16[2,128,32], index: 22, kind: input, shape index: {}]   ;;  %s6892_s23 = inlined_call_operand.vmem [shape: f32[2,1,32], index: 23, kind: input, shape index: {}]   ;;  %s6893_s24 = inlined_call_operand.hbm [shape: f32[4,8,32], index: 24, kind: output, shape index: {0}]   ;;  %s6894_s25 = inlined_call_operand.vmem [shape: f32[2,4,8,32], index: 25, kind: output, shape index: {1}]   ;;  %s6895_s26 = inlined_call_operand.vmem [shape: f32[2,4,8,32], index: 26, kind: output, shape index: {2}]  }
   0x1   :  { %6917 = sst [smem:[#allocation24_spill]] %s6869_s0 }
   0x2   :  { %6918 = sst [smem:[#allocation25_spill]] %s6870_s1 }
   0x3   :  { %6919 = sst [smem:[#allocation26_spill]] %s6871_s2 }
   0x4   :  { %6920 = sst [smem:[#allocation27_spill]] %s6872_s3 }
   0x5   :  { %6921 = sst [smem:[#allocation28_spill]] %s6873_s4 }
   0x6   :  { %6922 = sst [smem:[#allocation29_spill]] %s6874_s5 }
   0x7   :  { %6923 = sst [smem:[#allocation30_spill]] %s6875_s6 }
   0x8   :  { %6924 = sst [smem:[#allocation31_spill]] %s6876_s7 }
   0x9   :  { %6925 = sst [smem:[#allocation32_spill]] %s6877_s8 }
   0xa   :  { %6926 = sst [smem:[#allocation33_spill]] %s6878_s9 }
   0xb   :  { %6927 = sst [smem:[#allocation34_spill]] %s6879_s10 }
   0xc   :  { %6928 = sst [smem:[#allocation35_spill]] %s6881_s12 }
   0xd   :  { %6929 = sst [smem:[#allocation36_spill]] %s6885_s16 }
   0xe   :  { %6930 = sst [smem:[#allocation37_spill]] %s6886_s17 }
   0xf   :  { %6931 = sst [smem:[#allocation38_spill]] %s6888_s19 }
  0x10   :  { %6932 = sst [smem:[#allocation39_spill]] %s6889_s20 }
  0x11   :  { %6933 = sst [smem:[#allocation40_spill]] %s6890_s21 }
  0x12   :  { %6934 = sst [smem:[#allocation41_spill]] %s6891_s22 }
  0x13   :  { %6935 = sst [smem:[#allocation42_spill]] %s6892_s23 }
  0x14   :  { %6936 = sst [smem:[#allocation43_spill]] %s6893_s24 }
  0x15   :  { %6937 = sst [smem:[#allocation44_spill]] %s6894_s25 }
  0x16   :  { %6938 = sst [smem:[#allocation45_spill]] %s6895_s26 }
  0x17   :  { %32 = vsyncpa [#allocation3], 0 }
  0x18   :  { %34 = vsyncpa [#allocation3 + $0x1], 0  ;;  %s5848_s27 = smov 0   ;;  %s5850_s3 = smov 0  }
  0x19   :  { %s5852_s7 = smov 0   ;;  %s5854_s28 = smov 0  }
  0x1a   :  { %s5856_s8 = smov 0   ;;  %s5858_s4 = smov 0  }
  0x1b   :  { %s5860_s29 = smov 0   ;;  %s5862_s0 = smov 0  }
  0x1c LB: > { %6939 = sst [smem:[#allocation5_spill]] %s5664_s27  ;;  %s4821_s9 = sadd.s32 4294967295, %s5692_s0   ;;  %s5692_s0 = sphi %s5862_s0, %s40_s0   ;;  %s5688_s29 = sphi %s5860_s29, %s7022_s29   ;;  %s5684_s4 = sphi %s5858_s4, %s7021_s4   ;;  %s5680_s8 = sphi %s5856_s8, %s7020_s8   ;;  %s5676_s28 = sphi %s5854_s28, %s7019_s28   ;;  %s5672_s7 = sphi %s5852_s7, %s7018_s7   ;;  %s5668_s3 = sphi %s5850_s3, %s7017_s3   ;;  %s5664_s27 = sphi %s5848_s27, %s7016_s27  }
  0x1d   : > { %6940 = sst [smem:[#allocation6_spill]] %s5668_s3  ;;  %s4822_s30 = sadd.s32 4294967294, %s5692_s0  }
  0x1e   : > { %6941 = sst [smem:[#allocation7_spill]] %s5672_s7  ;;  %s49_s2 = sadd.s32 1, %s5684_s4 }
  0x1f   : > { %6942 = sst [smem:[#allocation8_spill]] %s5676_s28  ;;  %p50_p0 = scmp.ge.s32.totalorder %s49_s2, 2 }
  0x20   : > { %6943 = sst [smem:[#allocation9_spill]] %s5680_s8  ;;  %s52_s5 = sadd.s32 1, %s5688_s29 }
  0x21   : > { %6944 = sst [smem:[#allocation10_spill]] %s5684_s4  ;;  %p688_p1 = scmp.ne.s32.totalorder %s5672_s7, %s5668_s3 }
  0x22   : > { %6945 = sst [smem:[#allocation11_spill]] %s5688_s29  ;;  %p689_p2 = scmp.eq.s32.totalorder %s4821_s9, 3 }
  0x23   : > { %6946 = sst [smem:[#allocation12_spill]] %s5692_s0  ;;  %s7024_s2 = smov (%p50_p0, %s49_s2), 0 }
  0x24   : > { %6947 = sst [smem:[#allocation13_spill]] %s7024_s2  ;;  %s7026_s5 = smov (!%p50_p0, %s52_s5), %s5688_s29 }
  0x25   : > { %p5897_p3 = por %p689_p2, %p688_p1  ;;  %p694_p4 = scmp.ne.s32.totalorder %s5668_s3, %s5664_s27 }
  0x26   : > { %p54_p5 = scmp.ge.s32.totalorder %s7026_s5, 2  ;;  %p695_p6 = scmp.eq.s32.totalorder %s4822_s30, 3 }
  0x27   : > { %s6948_s10 = scalar_select %p5897_p3, 1, 0 }
  0x28   : > { %p4825_p7 = scmp.ge.s32.totalorder %s5692_s0, 1  ;;  %p932_p8 = scmp.lt.s32.totalorder %s5692_s0, 5 }
  0x29   : > { %6949 = sst [smem:[#allocation14_spill]] %s6948_s10  ;;  %s7028_s5 = smov (%p54_p5, %s7026_s5), 0 }
  0x2a   : > { %6950 = sst [smem:[#allocation15_spill]] %s7028_s5  ;;  %p5907_p9 = por %p695_p6, %p694_p4 }
  0x2b   : > { %p933_p10 = pnand %p4825_p7, %p932_p8  ;;  %s675_s1 = ssub.s32 %s5688_s29, %s7028_s5 }
  0x2c   : > { %s6951_s6 = scalar_select %p5907_p9, 1, 0 }
  0x2d   : > { %s678_s9 = sadd.s32 1, %s5672_s7  ;;  %p676_p11 = scmp.eq.s32.totalorder %s675_s1, 0 }
  0x2e   : > { %6952 = sst [smem:[#allocation16_spill]] %s6951_s6  ;;  %936 = sbr.rel (%p933_p10) target bundleno = 10918 (0x2aa6), region = 116 }
  0x2f   : > { %s5915_s2 = scalar_select %p676_p11, %s5672_s7, %s678_s9  }
  0x31   : > { %6953 = sst [smem:[#allocation17_spill]] %s5915_s2 }
  0x35   : > { %s6900_s30 = sand.u32 1, %s5668_s3   ;;  %s4827_s4 = sshll.u32 %s5680_s8, 1 }
  0x36   : > { %s5921_s27 = sshll.u32 %s6900_s30, 4  ;;  %p1104_p12 = scmp.lt.s32.totalorder %s4827_s4, 3 }
  0x37   : > { %p1120_p13 = scmp.lt.s32.totalorder %s5676_s28, 1  ;;  %s6954_s30 = sld [smem:[#allocation27_spill]] }
  0x38   : > { %s7030_s4 = smov (!%p1104_p12, %s4827_s4), 3  ;;  %s6956_s0 = sld [smem:[#allocation24_spill]] }
  0x39   : > { %s5927_s1 = scalar_select %p1120_p13, %s5676_s28, 1 }
  0x3a   : > { %s4828_s9 = sshll.u32 %s7030_s4, 3  ;;  %s6958_s8 = sld [smem:[#allocation25_spill]] }
  0x3b   : > { %s4948_s26 = sshll.u32 %s5927_s1, 4  ;;  %s6961_s22 = sld [smem:[#allocation28_spill]] }
  0x3c   : > { %s6966_s25 = sld [smem:[#allocation32_spill]]  ;;  %s6968_s6 = sld [smem:[#allocation34_spill]] }
  0x3d   : > { %s5934_s2 = scalar_lea.vmem %s6954_s30, %s7030_s4  ;;  %s6969_s12 = sld [smem:[#allocation35_spill]] }
  0x3e   : > { %6955 = sst [smem:[#allocation18_spill]] %s5934_s2  ;;  %s5939_s24 = scalar_lea.vmem %s6956_s0, %s4828_s9 }
  0x3f   : > { %6957 = sst [smem:[#allocation19_spill]] %s5939_s24  ;;  %s6963_s24 = sld [smem:[#allocation30_spill]] }
  0x40   : > { %s5944_s28 = scalar_lea.vmem %s6958_s8, %s4828_s9  ;;  %s6974_s20 = sld [smem:[#allocation39_spill]] }
  0x41   : > { %6959 = sst [smem:[#allocation20_spill]] %s5944_s28  ;;  %s5954_s7 = scalar_lea.vmem %s6961_s22, %s4948_s26 }
  0x42   : > { %6962 = sst [smem:[#allocation21_spill]] %s5954_s7  ;;  %s5968_s29 = scalar_lea.vmem %s6966_s25, %s4948_s26 }
  0x43   : > { %s5986_s23 = scalar_lea.vmem %s6969_s12, %s4948_s26  ;;  %s4954_s16 = sshll.u32 %s5927_s1, 6 }
  0x44   : > { %6970 = sst [smem:[#allocation23_spill]] %s5986_s23  ;;  %s6976_s12 = sld [smem:[#allocation41_spill]] }
  0x45   : > { %s5959_s3 = scalar_lea.vmem %s6963_s24, %s4948_s26  ;;  %s5977_s24 = scalar_lea.vmem %s6968_s6, %s4948_s26 }
  0x46   : > { %6964 = sst [smem:[#allocation22_spill]] %s5959_s3  ;;  %s6019_s6 = scalar_lea.vmem %s6974_s20, %s4948_s26 }
  0x47   : > { %s6977_s5 = sld [smem:[#allocation42_spill]]  ;;  %s4847_s30 = sshll.u32 %s5927_s1, 2 }
  0x48   : > { %s1201_s22 = sadd.s32 %s4847_s30, %s7030_s4  ;;  %s6978_s0 = sld [smem:[#allocation44_spill]] }
  0x49   : > { %s4848_s19 = sshll.u32 %s1201_s22, 3  ;;  %s6979_s8 = sld [smem:[#allocation45_spill]] }
  0x4a   : > { %s6029_s17 = scalar_lea.vmem %s6976_s12, %s4954_s16  ;;  %s6048_s9 = scalar_lea.vmem [#allocation2], %s5921_s27 }
  0x4b   : > { %s6980_s12 = sld [smem:[#allocation8_spill]] }
  0x4d   : > { %s1193_s2 = scalar_lea.vmem %s6977_s5, %s5927_s1 }
  0x4e   : > { %s6040_s20 = scalar_lea.vmem %s6978_s0, %s4848_s19 }
  0x4f   : > { %s6045_s28 = scalar_lea.vmem %s6979_s8, %s4848_s19 }
  0x51   : > { %p4852_p0 = scmp.ne.s32.totalorder %s6980_s12, 0 }
  0x52   : > { %s6981_s16 = sld [smem:[#allocation19_spill]] (!%p4852_p0)  ;;  %vm1222_vm0 = vcmask (!%p4852_p0), 261120  }
  0x53   : > { %1219 = sbr.rel (%p4852_p0) target bundleno = 90 (0x5a), region = 120 }
  0x58   : > { %v1220_v0 = vld [vmem:[%s6981_s16] sm:$0xff] (!%p4852_p0)  ;;  %v1221_v1 = vld [vmem:[%s6981_s16 + $0x8] sm:$0xff] (!%p4852_p0) }
  0x59   : > { %1223 = vst.msk [vmem:[%s6048_s9] sm:$0xff] (!%p4852_p0), %vm1222_vm0, %v1220_v0  ;;  %1224 = vst.msk [vmem:[%s6048_s9 + $0x8] sm:$0xff] (!%p4852_p0), %vm1222_vm0, %v1221_v1 }
  0x5a PF: > { %s6982_s4 = sld [smem:[#allocation21_spill]]  ;;  %v5694_v3 = vmov 0.0   ;;  %vm5695_vm1 = vmmov 0   ;;  %vm1253_vm2 = vcmask 261120   ;;  %s6983_s5 = sld [smem:[#allocation29_spill]]  ;;  %vm1308_vm3 = vcmask 64512  }
  0x5b   : > { %5073 = vmatprep.subr.bf16.mxu1 %v5694_v3  ;;  %5099 = vmatprep.subr.bf16.mxu0 %v5694_v3  ;;  %s5696_s21 = smov 64   ;;  %s5697_s23 = smov 96   ;;  %vm1375_vm4 = vcmask 1043456   ;;  %vm1487_vm10 = vcmask 130112   ;;  %vm1698_vm11 = vcmask 195712   ;;  %vm1864_vm12 = vcmask 261312  }
  0x5c   : > { %5077 = vmatprep.mubr.msk.bf16.mxu1 %vm5695_vm1, %v5694_v3  ;;  %5101 = vmatprep.mubr.msk.bf16.mxu0 %vm5695_vm1, %v5694_v3  ;;  %s6985_s7 = sld [smem:[#allocation26_spill]]  ;;  %s5698_s26 = smov 88  }
  0x5d   : > { %s5699_s0 = smov 120   ;;  %s6986_s3 = sld [smem:[#allocation22_spill]] }
  0x5e   : > { %s5700_s10 = smov 56   ;;  %s5701_s8 = smov 80  }
  0x5f   : > { %s5702_s12 = smov 112   ;;  %s5703_s16 = smov 48  }
  0x60   : > { %v5502_v2 = vld [vmem:[%s6982_s4] sm:$0xff]   ;;  %v5503_v4 = vld [vmem:[%s6982_s4 + $0x8] sm:$0xff]   ;;  %s6984_s22 = scalar_lea.vmem %s6983_s5, %s5927_s1  ;;  %s5704_s4 = smov 72  }
  0x61   : > { %5074 = vmatpush3.bf16.msra.mxu1 %v5502_v2  ;;  %v6062_v5 = vld [vmem:[%s6048_s9] sm:$0xff]  ;;  %v6065_v6 = vld [vmem:[%s6048_s9 + $0x8] sm:$0xff]  ;;  %s5705_s19 = smov 104   ;;  %s5706_s27 = smov 40  }
  0x62   : > { %5075 = vmatprep.subr.bf16.mxu1 %v5694_v3  ;;  %v1233_v7 = vpack.c.bf16 %v6065_v6, %v6062_v5  ;;  %v4853_v8 = vld [vmem:[%s6984_s22] ss:$0 sm:$0xff]  ;;  %s6989_s30 = sld [smem:[#allocation20_spill]]  ;;  %s6992_s22 = scalar_lea.vmem %s6880_s11, %s5927_s1 }
  0x63   : > { %v6100_v20 = vld [vmem:[%s6985_s7] sm:$0xff]  ;;  %s6995_s7 = sld [smem:[#allocation18_spill]] }
  0x64   : > { %vm1303_vm5 = vcmp.gt.f32.partialorder %v6100_v20, 0.5  ;;  %v1299_v56 = vld [vmem:[%s6986_s3 + $0x4] sm:$0xf]  ;;  %v1298_v62 = vld [vmem:[%s6986_s3] sm:$0xf]  ;;  %s7011_s5 = sld [smem:[#allocation43_spill]] }
  0x65   : > { %5076 = vmatpush3.bf16.msra.mxu1 %v5503_v4  ;;  %v6133_v57 = vsel %vm1375_vm4, %v1299_v56, 0  ;;  %v6145_v1 = vsel %vm1375_vm4, %v1298_v62, 0 }
  0x66   : > { %5081 = vmatprep.subr.bf16.mxu1 %v5694_v3 }
  0x68   : > { %5078 = vmatmul.mubr.msk.bf16.vlgmr.msra.gmra.mrb[0].mxu1 %vm1253_vm2, %v1233_v7 }
  0x69   : > { %5083 = vmatprep.mubr.msk.bf16.mxu1 %vm5695_vm1, %v5694_v3 }
 0x13b   : > { %v1291_v9 = vpop.f32.mrb[0].mxu1 }
 0x13c   : > { %v1292_v10 = vadd.f32 %v4853_v8, %v1291_v9  ;;  %v5079_v11 = vpop.f32.mrb[1].mxu1 }
 0x13d   : > { %v1294_v12 = vpop.f32.mrb[2].mxu1 }
 0x13e   : > { %v6081_v13 = vpack.c.bf16 %v1292_v10, %v1292_v10  ;;  %v6083_v14 = vadd.f32 %v4853_v8, %v1294_v12  ;;  %v5080_v15 = vpop.f32.mrb[3].mxu1 }
 0x140   : > { %1370 = vrot.lane.b32.xlu1 %v6081_v13, %s5696_s21  ;;  %1306 = vrot.lane.b32.xlu0 %v6081_v13, %s5697_s23 }
 0x1b2   : > { %v1307_v16 = vpop.permute.xlu0 %1306  ;;  %v1371_v18 = vpop.permute.xlu1 %1370 }
 0x1b3   : > { %v1313_v17 = vsel %vm1308_vm3, %v1307_v16, 0  ;;  %v1377_v19 = vsel %vm1375_vm4, %v1371_v18, 0 }
 0x1b4   : > { %5082 = vmatpush3.bf16.xpose.msra.mxu1 %v1313_v17 }
 0x1b5   : > { %5087 = vmatprep.subr.bf16.mxu1 %v5694_v3 }
 0x1bb   : > { %5084 = vmatmul.mubr.msk.bf16.vlgmr.msra.gmra.mrb[4].mxu1 %vm1308_vm3, %v6081_v13 }
 0x1bc   : > { %5088 = vmatpush3.bf16.msra.mxu1 %v1377_v19  ;;  %5089 = vmatprep.mubr.msk.bf16.mxu1 %vm5695_vm1, %v5694_v3 }
 0x1bd   : > { %5093 = vmatprep.subr.bf16.mxu1 %v5694_v3 }
 0x28e   : > { %v1349_v21 = vpop.f32.mrb[4].mxu1 }
 0x28f   : > { %v1355_v22 = vmul.f32 0.35355338, %v1349_v21  ;;  %v5085_v23 = vpop.f32.mrb[5].mxu1 }
 0x290   : > { %v1352_v24 = vpop.f32.mrb[6].mxu1 }
 0x291   : > { %v5086_v25 = vpop.f32.mrb[7].mxu1  ;;  %v1356_v26 = vsel %vm1303_vm5, -1e+30, %v1355_v22 }
 0x292   : > { %v1357_v27 = vsel %vm1308_vm3, %v1356_v26, -inf }
 0x293   : > { %1358 = vmax.xlane.f32.xlu0 %v1357_v27 }
 0x320   : > { %v1359_v28 = vpop.xlane.xlu0 %1358 }
 0x321   : > { %v1360_v29 = vsub.f32 %v1356_v26, %v1359_v28 }
 0x323   : > { %v1361_v30 = vmul.f32 1.442695, %v1360_v29 }
 0x325   : > { %5518 = vpow2.f32 %v1361_v30 }
 0x32f   : > { %v5519_v31 = vpop.eup %5518 }
 0x330   : > { %v1363_v32 = vsel %vm1308_vm3, %v5519_v31, 0.0 }
 0x331   : > { %1364 = vadd.xlane.f32.xlu1 %v1363_v32 }
 0x342   : > { %1422 = vrot.lane.b32.xlu1 %v6081_v13, %s5698_s26 }
 0x346   : > { %1420 = vrot.lane.b32.xlu1 %v6081_v13, %s5699_s0 }
 0x3be   : > { %v1365_v33 = vpop.xlane.xlu1 %1364 }
 0x3bf   : > { %5520 = vrcp.f32 %v1365_v33 }
 0x3c2   : > { %v1423_v36 = vpop.permute.xlu1 %1422 }
 0x3c3   : > { %v1428_v38 = vsel %vm1308_vm3, %v1423_v36, 0 }
 0x3c6   : > { %v1421_v39 = vpop.permute.xlu1 %1420 }
 0x3c9   : > { %v5521_v34 = vpop.eup %5520 }
 0x3ca   : > { %v1367_v35 = vmul.f32 %v5521_v34, %v5519_v31 }
 0x3cc   : > { %1368 = vst.msk [vmem:[%s6040_s20] sm:$0xff] %vm1308_vm3, %v1367_v35  ;;  %v1369_v37 = vpack.c.bf16 %v1367_v35, %v1367_v35 }
 0x3ce   : > { %5090 = vmatmul.mubr.msk.bf16.vlgmr.msra.gmra.mrb[8].mxu1 %vm1308_vm3, %v1369_v37 }
 0x3cf   : > { %5094 = vmatpush3.bf16.xpose.msra.mxu1 %v1428_v38  ;;  %5095 = vmatprep.mubr.msk.bf16.mxu1 %vm5695_vm1, %v5694_v3 }
 0x3d0   : > { %5105 = vmatprep.subr.bf16.mxu1 %v5694_v3 }
 0x3d6   : > { %5096 = vmatmul.mubr.msk.bf16.vlgmr.msra.gmra.mrb[12].mxu1 %vm1308_vm3, %v1421_v39 }
 0x3d7   : > { %5107 = vmatprep.mubr.msk.bf16.mxu1 %vm5695_vm1, %v5694_v3  ;;  %5106 = vmatpush3.bf16.msra.mxu1 %v6133_v57 }
 0x3d8   : > { %5117 = vmatprep.subr.bf16.mxu1 %v5694_v3 }
 0x4a1   : > { %v1413_v40 = vpop.f32.mrb[8].mxu1 }
 0x4a2   : > { %v5091_v41 = vpop.f32.mrb[9].mxu1  ;;  %v1419_v2 = vpack.c.bf16 %v1413_v40, %v1413_v40  ;;  %v1300_v40 = vld [vmem:[%s6986_s3 + $0x8] sm:$0xf] }
 0x4a3   : > { %v1416_v42 = vpop.f32.mrb[10].mxu1  ;;  %v6181_v41 = vsel %vm1375_vm4, %v1300_v40, 0 }
 0x4a4   : > { %v5092_v43 = vpop.f32.mrb[11].mxu1 }
 0x4a9   : > { %v1464_v44 = vpop.f32.mrb[12].mxu1 }
 0x4aa   : > { %v1470_v45 = vmul.f32 0.35355338, %v1464_v44  ;;  %v5097_v46 = vpop.f32.mrb[13].mxu1 }
 0x4ab   : > { %v1467_v47 = vpop.f32.mrb[14].mxu1 }
 0x4ac   : > { %v5098_v48 = vpop.f32.mrb[15].mxu1  ;;  %v1471_v49 = vsel %vm1303_vm5, -1e+30, %v1470_v45 }
 0x4ad   : > { %v1472_v50 = vsel %vm1308_vm3, %v1471_v49, -inf }
 0x4ae   : > { %1473 = vmax.xlane.f32.xlu1 %v1472_v50 }
 0x53b   : > { %v1474_v51 = vpop.xlane.xlu1 %1473 }
 0x53c   : > { %v1475_v52 = vsub.f32 %v1471_v49, %v1474_v51 }
 0x53e   : > { %v1476_v53 = vmul.f32 1.442695, %v1475_v52 }
 0x540   : > { %5522 = vpow2.f32 %v1476_v53 }
 0x54a   : > { %v5523_v54 = vpop.eup %5522 }
 0x54b   : > { %v1478_v55 = vsel %vm1308_vm3, %v5523_v54, 0.0 }
 0x54c   : > { %1479 = vadd.xlane.f32.xlu0 %v1478_v55 }
 0x562   : > { %1490 = vrot.lane.b32.xlu0 %v6081_v13, %s5700_s10 }
 0x566   : > { %1633 = vrot.lane.b32.xlu0 %v6081_v13, %s5701_s8 }
 0x56a   : > { %1631 = vrot.lane.b32.xlu0 %v6081_v13, %s5702_s12 }
 0x5d9   : > { %v1480_v58 = vpop.xlane.xlu0 %1479 }
 0x5da   : > { %5524 = vrcp.f32 %v1480_v58 }
 0x5dd   : > { %v1491_v59 = vpop.permute.xlu0 %1490 }
 0x5de   : > { %v1496_v60 = vsel %vm1375_vm4, %v1491_v59, 0 }
 0x5df   : > { %5100 = vmatpush3.bf16.msra.mxu0 %v1496_v60 }
 0x5e0   : > { %5111 = vmatprep.subr.bf16.mxu0 %v5694_v3 }
 0x5e1   : > { %v1634_v4 = vpop.permute.xlu0 %1633 }
 0x5e2   : > { %v1639_v11 = vsel %vm1308_vm3, %v1634_v4, 0 }
 0x5e4   : > { %v5525_v61 = vpop.eup %5524 }
 0x5e5   : > { %v6140_v63 = vmul.f32 %v5525_v61, %v5523_v54  ;;  %v1632_v17 = vpop.permute.xlu0 %1631 }
 0x5e7   : > { %v1489_v0 = vpack.c.bf16 %v6140_v63, %v6140_v63 }
 0x5e9   : > { %5102 = vmatmul.mubr.msk.bf16.vlgmr.msra.gmra.mrb[0].mxu0 %vm1308_vm3, %v1489_v0  ;;  %v6207_v0 = vpack.c.bf16 %v6083_v14, %v6083_v14 }
 0x5ea   : > { %5112 = vmatpush3.bf16.msra.mxu0 %v6145_v1  ;;  %5113 = vmatprep.mubr.msk.bf16.mxu0 %vm5695_vm1, %v5694_v3 }
 0x5eb   : > { %5123 = vmatprep.subr.bf16.mxu0 %v5694_v3 }
 0x5f1   : > { %5114 = vmatmul.mubr.msk.bf16.vlgmr.msra.gmra.mrb[4].mxu0 %vm1308_vm3, %v1419_v2 }
 0x5f2   : > { %5125 = vmatprep.mubr.msk.bf16.mxu0 %vm5695_vm1, %v5694_v3 }
 0x6bc   : > { %v1532_v7 = vpop.f32.mrb[0].mxu0 }
 0x6bd   : > { %v1538_v8 = vpack.c.bf16 %v1532_v7, %v1532_v7  ;;  %v5103_v9 = vpop.f32.mrb[1].mxu0 }
 0x6be   : > { %v1535_v10 = vpop.f32.mrb[2].mxu0 }
 0x6bf   : > { %v5104_v12 = vpop.f32.mrb[3].mxu0  ;;  %5108 = vmatmul.mubr.msk.bf16.vlgmr.msra.gmra.mrb[16].mxu1 %vm1308_vm3, %v1538_v8 }
 0x6c0   : > { %5118 = vmatpush3.bf16.xpose.msra.mxu1 %v1639_v11  ;;  %5119 = vmatprep.mubr.msk.bf16.mxu1 %vm5695_vm1, %v5694_v3 }
 0x6c1   : > { %5129 = vmatprep.subr.bf16.mxu1 %v5694_v3 }
 0x6c4   : > { %v1625_v15 = vpop.f32.mrb[4].mxu0 }
 0x6c5   : > { %v5115_v16 = vpop.f32.mrb[5].mxu0 }
 0x6c6   : > { %v1628_v18 = vpop.f32.mrb[6].mxu0 }
 0x6c7   : > { %v5116_v19 = vpop.f32.mrb[7].mxu0  ;;  %5120 = vmatmul.mubr.msk.bf16.vlgmr.msra.gmra.mrb[20].mxu1 %vm1308_vm3, %v1632_v17 }
 0x6c8   : > { %5131 = vmatprep.mubr.msk.bf16.mxu1 %vm5695_vm1, %v5694_v3  ;;  %5130 = vmatpush3.bf16.msra.mxu1 %v6181_v41 }
 0x6c9   : > { %5141 = vmatprep.subr.bf16.mxu1 %v5694_v3 }
 0x792   : > { %v1579_v21 = vpop.f32.mrb[16].mxu1 }
 0x793   : > { %v6163_v22 = vadd.f32 %v1625_v15, %v1579_v21  ;;  %v5109_v23 = vpop.f32.mrb[17].mxu1 }
 0x794   : > { %v1582_v24 = vpop.f32.mrb[18].mxu1 }
 0x795   : > { %v5110_v25 = vpop.f32.mrb[19].mxu1 }
 0x79a   : > { %v1675_v26 = vpop.f32.mrb[20].mxu1 }
 0x79b   : > { %v1681_v27 = vmul.f32 0.35355338, %v1675_v26  ;;  %v5121_v28 = vpop.f32.mrb[21].mxu1  ;;  %v1301_v26 = vld [vmem:[%s6986_s3 + $0xc] sm:$0xf]  ;;  %s7009_s3 = sld [smem:[#allocation6_spill]] }
 0x79c   : > { %v1678_v29 = vpop.f32.mrb[22].mxu1 }
 0x79d   : > { %v5122_v30 = vpop.f32.mrb[23].mxu1  ;;  %v1682_v31 = vsel %vm1303_vm5, -1e+30, %v1681_v27  ;;  %v6241_v27 = vsel %vm1375_vm4, %v1301_v26, 0 }
 0x79e   : > { %v1683_v32 = vsel %vm1308_vm3, %v1682_v31, -inf }
 0x79f   : > { %1684 = vmax.xlane.f32.xlu1 %v1683_v32 }
 0x7b0   : > { %1701 = vrot.lane.b32.xlu1 %v6081_v13, %s5703_s16 }
 0x7b4   : > { %1799 = vrot.lane.b32.xlu1 %v6081_v13, %s5704_s4 }
 0x7b8   : > { %1797 = vrot.lane.b32.xlu1 %v6081_v13, %s5705_s19 }
 0x82c   : > { %v1685_v33 = vpop.xlane.xlu1 %1684 }
 0x82d   : > { %v1686_v34 = vsub.f32 %v1682_v31, %v1685_v33 }
 0x82f   : > { %v1687_v35 = vmul.f32 1.442695, %v1686_v34 }
 0x830   : > { %v1702_v36 = vpop.permute.xlu1 %1701 }
 0x831   : > { %5526 = vpow2.f32 %v1687_v35  ;;  %v1707_v37 = vsel %vm1375_vm4, %v1702_v36, 0 }
 0x832   : > { %5124 = vmatpush3.bf16.msra.mxu0 %v1707_v37 }
 0x833   : > { %5135 = vmatprep.subr.bf16.mxu0 %v5694_v3 }
 0x834   : > { %v1800_v45 = vpop.permute.xlu1 %1799 }
 0x835   : > { %v1805_v47 = vsel %vm1308_vm3, %v1800_v45, 0 }
 0x83b   : > { %v5527_v38 = vpop.eup %5526 }
 0x83c   : > { %v1689_v39 = vsel %vm1308_vm3, %v5527_v38, 0.0 }
 0x83d   : > { %1690 = vadd.xlane.f32.xlu0 %v1689_v39 }
 0x853   : > { %1867 = vrot.lane.b32.xlu0 %v6081_v13, %s5706_s27  ;;  %v1798_v13 = vpop.permute.xlu1 %1797 }
 0x8ca   : > { %v1691_v42 = vpop.xlane.xlu0 %1690 }
 0x8cb   : > { %5528 = vrcp.f32 %v1691_v42 }
 0x8ce   : > { %v1868_v48 = vpop.permute.xlu0 %1867 }
 0x8cf   : > { %v1873_v53 = vsel %vm1375_vm4, %v1868_v48, 0 }
 0x8d5   : > { %v5529_v43 = vpop.eup %5528 }
 0x8d6   : > { %v6185_v44 = vmul.f32 %v5529_v43, %v5527_v38 }
 0x8d8   : > { %v1700_v46 = vpack.c.bf16 %v6185_v44, %v6185_v44 }
 0x8da   : > { %5126 = vmatmul.mubr.msk.bf16.vlgmr.msra.gmra.mrb[8].mxu0 %vm1308_vm3, %v1700_v46 }
 0x8db   : > { %5136 = vmatpush3.bf16.xpose.msra.mxu0 %v1805_v47  ;;  %5137 = vmatprep.mubr.msk.bf16.mxu0 %vm5695_vm1, %v5694_v3 }
 0x8dc   : > { %5147 = vmatprep.subr.bf16.mxu0 %v5694_v3 }
 0x8e2   : > { %5138 = vmatmul.mubr.msk.bf16.vlgmr.msra.gmra.mrb[12].mxu0 %vm1308_vm3, %v1798_v13 }
 0x8e3   : > { %5149 = vmatprep.mubr.msk.bf16.mxu0 %vm5695_vm1, %v5694_v3  ;;  %5148 = vmatpush3.bf16.msra.mxu0 %v6241_v27 }
 0x8e4   : > { %5159 = vmatprep.subr.bf16.mxu0 %v5694_v3 }
 0x9ad   : > { %v1743_v49 = vpop.f32.mrb[8].mxu0 }
 0x9ae   : > { %v1749_v50 = vpack.c.bf16 %v1743_v49, %v1743_v49  ;;  %v5127_v51 = vpop.f32.mrb[9].mxu0 }
 0x9af   : > { %v1746_v52 = vpop.f32.mrb[10].mxu0 }
 0x9b0   : > { %v5128_v54 = vpop.f32.mrb[11].mxu0  ;;  %5132 = vmatmul.mubr.msk.bf16.vlgmr.msra.gmra.mrb[24].mxu1 %vm1308_vm3, %v1749_v50 }
 0x9b1   : > { %5142 = vmatpush3.bf16.msra.mxu1 %v1873_v53  ;;  %5143 = vmatprep.mubr.msk.bf16.mxu1 %vm5695_vm1, %v5694_v3 }
 0x9b2   : > { %5153 = vmatprep.subr.bf16.mxu1 %v5694_v3 }
 0x9b5   : > { %v1841_v55 = vpop.f32.mrb[12].mxu0 }
 0x9b6   : > { %v1847_v56 = vmul.f32 0.35355338, %v1841_v55  ;;  %v5139_v58 = vpop.f32.mrb[13].mxu0 }
 0x9b7   : > { %v1844_v59 = vpop.f32.mrb[14].mxu0 }
 0x9b8   : > { %v5140_v60 = vpop.f32.mrb[15].mxu0  ;;  %v1848_v61 = vsel %vm1303_vm5, -1e+30, %v1847_v56 }
 0x9b9   : > { %v1849_v62 = vsel %vm1308_vm3, %v1848_v61, -inf }
 0x9ba   : > { %1850 = vmax.xlane.f32.xlu1 %v1849_v62 }
 0x9cb   : > { %2078 = vrot.lane.b32.xlu1 %v6207_v0, %s5699_s0 }
 0xa47   : > { %v1851_v2 = vpop.xlane.xlu1 %1850 }
 0xa48   : > { %v1852_v4 = vsub.f32 %v1848_v61, %v1851_v2 }
 0xa4a   : > { %v1853_v7 = vmul.f32 1.442695, %v1852_v4 }
 0xa4b   : > { %v2079_v25 = vpop.permute.xlu1 %2078 }
 0xa4c   : > { %5530 = vpow2.f32 %v1853_v7 }
 0xa56   : > { %v5531_v8 = vpop.eup %5530 }
 0xa57   : > { %v1855_v9 = vsel %vm1308_vm3, %v5531_v8, 0.0 }
 0xa58   : > { %1856 = vadd.xlane.f32.xlu0 %v1855_v9 }
 0xa6e   : > { %1965 = vrot.lane.b32.xlu0 %v6207_v0, %s5697_s23 }
 0xa72   : > { %2080 = vrot.lane.b32.xlu0 %v6207_v0, %s5698_s26 }
 0xa83   : > { %v1790_v10 = vpop.f32.mrb[24].mxu1 }
 0xa84   : > { %v6217_v14 = vadd.f32 %v1790_v10, %v6163_v22  ;;  %v5133_v11 = vpop.f32.mrb[25].mxu1 }
 0xa85   : > { %v1793_v12 = vpop.f32.mrb[26].mxu1 }
 0xa86   : > { %v5134_v15 = vpop.f32.mrb[27].mxu1 }
 0xae5   : > { %v1857_v16 = vpop.xlane.xlu0 %1856 }
 0xae6   : > { %5532 = vrcp.f32 %v1857_v16 }
 0xae9   : > { %v1966_v19 = vpop.permute.xlu0 %1965 }
 0xaea   : > { %v1971_v23 = vsel %vm1308_vm3, %v1966_v19, 0 }
 0xaed   : > { %v2081_v22 = vpop.permute.xlu0 %2080 }
 0xaee   : > { %v2086_v24 = vsel %vm1308_vm3, %v2081_v22, 0 }
 0xaf0   : > { %v5533_v17 = vpop.eup %5532 }
 0xaf1   : > { %v6219_v18 = vmul.f32 %v5533_v17, %v5531_v8 }
 0xaf3   : > { %v1866_v21 = vpack.c.bf16 %v6219_v18, %v6219_v18 }
 0xaf5   : > { %5144 = vmatmul.mubr.msk.bf16.vlgmr.msra.gmra.mrb[28].mxu1 %vm1308_vm3, %v1866_v21 }
 0xaf6   : > { %5154 = vmatpush3.bf16.xpose.msra.mxu1 %v1971_v23  ;;  %5155 = vmatprep.mubr.msk.bf16.mxu1 %vm5695_vm1, %v5694_v3 }
 0xaf7   : > { %5165 = vmatprep.subr.bf16.mxu1 %v5694_v3 }
 0xafd   : > { %5156 = vmatmul.mubr.msk.bf16.vlgmr.msra.gmra.mrb[32].mxu1 %vm1308_vm3, %v6207_v0 }
 0xafe   : > { %5166 = vmatpush3.bf16.xpose.msra.mxu1 %v2086_v24  ;;  %5167 = vmatprep.mubr.msk.bf16.mxu1 %vm5695_vm1, %v5694_v3 }
 0xaff   : > { %5177 = vmatprep.subr.bf16.mxu1 %v5694_v3 }
 0xb05   : > { %5168 = vmatmul.mubr.msk.bf16.vlgmr.msra.gmra.mrb[36].mxu1 %vm1308_vm3, %v2079_v25 }
 0xb06   : > { %5178 = vmatpush3.bf16.msra.mxu1 %v6133_v57  ;;  %5179 = vmatprep.mubr.msk.bf16.mxu1 %vm5695_vm1, %v5694_v3 }
 0xb07   : > { %5189 = vmatprep.subr.bf16.mxu1 %v5694_v3 }
 0xbc8   : > { %v1909_v28 = vpop.f32.mrb[28].mxu1 }
 0xbc9   : > { %v1915_v29 = vpack.c.bf16 %v1909_v28, %v1909_v28  ;;  %v5145_v30 = vpop.f32.mrb[29].mxu1 }
 0xbca   : > { %v1912_v31 = vpop.f32.mrb[30].mxu1 }
 0xbcb   : > { %v5146_v32 = vpop.f32.mrb[31].mxu1  ;;  %5150 = vmatmul.mubr.msk.bf16.vlgmr.msra.gmra.mrb[16].mxu0 %vm1308_vm3, %v1915_v29 }
 0xbcc   : > { %5161 = vmatprep.mubr.msk.bf16.mxu0 %vm5695_vm1, %v5694_v3 }
 0xbd0   : > { %v2007_v57 = vpop.f32.mrb[32].mxu1 }
 0xbd1   : > { %v2013_v33 = vmul.f32 0.35355338, %v2007_v57  ;;  %v5157_v34 = vpop.f32.mrb[33].mxu1 }
 0xbd2   : > { %v2010_v35 = vpop.f32.mrb[34].mxu1 }
 0xbd3   : > { %v5158_v36 = vpop.f32.mrb[35].mxu1  ;;  %v2014_v37 = vsel %vm1303_vm5, -1e+30, %v2013_v33 }
 0xbd4   : > { %v2015_v38 = vsel %vm1308_vm3, %v2014_v37, -inf }
 0xbd5   : > { %2016 = vmax.xlane.f32.xlu0 %v2015_v38 }
 0xbd8   : > { %v2122_v39 = vpop.f32.mrb[36].mxu1 }
 0xbd9   : > { %v2128_v40 = vmul.f32 0.35355338, %v2122_v39  ;;  %v5169_v42 = vpop.f32.mrb[37].mxu1 }
 0xbda   : > { %v2125_v43 = vpop.f32.mrb[38].mxu1 }
 0xbdb   : > { %v5170_v45 = vpop.f32.mrb[39].mxu1  ;;  %v2129_v46 = vsel %vm1303_vm5, -1e+30, %v2128_v40 }
 0xbdc   : > { %v2130_v47 = vsel %vm1308_vm3, %v2129_v46, -inf }
 0xbdd   : > { %2131 = vmax.xlane.f32.xlu1 %v2130_v47 }
 0xbee   : > { %2147 = vrot.lane.b32.xlu1 %v6207_v0, %s5700_s10  ;;  %s4444_s10 = sshll.u32 %s6048_s9, 4  ;;  %s6810_s10 = int_to_ptr.vmem [resolvable:$true] %s4444_s10 }
 0xc62   : > { %v2017_v13 = vpop.xlane.xlu0 %2016 }
 0xc63   : > { %v2018_v48 = vsub.f32 %v2014_v37, %v2017_v13 }
 0xc65   : > { %v2019_v49 = vmul.f32 1.442695, %v2018_v48 }
 0xc67   : > { %5534 = vpow2.f32 %v2019_v49 }
 0xc6a   : > { %v2132_v50 = vpop.xlane.xlu1 %2131 }
 0xc6b   : > { %v2133_v51 = vsub.f32 %v2129_v46, %v2132_v50 }
 0xc6d   : > { %v2134_v52 = vmul.f32 1.442695, %v2133_v51 }
 0xc6e   : > { %v2148_v11 = vpop.permute.xlu1 %2147 }
 0xc6f   : > { %5536 = vpow2.f32 %v2134_v52 }
 0xc71   : > { %v5535_v53 = vpop.eup %5534 }
 0xc72   : > { %v2021_v54 = vsel %vm1308_vm3, %v5535_v53, 0.0 }
 0xc73   : > { %2022 = vadd.xlane.f32.xlu0 %v2021_v54 }
 0xc79   : > { %v5537_v55 = vpop.eup %5536 }
 0xc7a   : > { %v2136_v56 = vsel %vm1308_vm3, %v5537_v55, 0.0 }
 0xc7b   : > { %2137 = vadd.xlane.f32.xlu0 %v2136_v56 }
 0xc91   : > { %2029 = vrot.lane.b32.xlu0 %v6207_v0, %s5696_s21  ;;  %s6987_s21 = sld [smem:[#allocation31_spill]] }
 0xc95   : > { %2284 = vrot.lane.b32.xlu0 %v6207_v0, %s5701_s8 }
 0xc97   : > { %s6988_s25 = scalar_lea.vmem %s6987_s21, %s5927_s1  ;;  %s7002_s21 = sld [smem:[#allocation40_spill]] }
 0xc98   : > { %v4885_v20 = vld [vmem:[%s6988_s25] ss:$0 sm:$0xff] }
 0xc99   : > { %2282 = vrot.lane.b32.xlu0 %v6207_v0, %s5702_s12 }
 0xc9d   : > { %s7003_s25 = scalar_lea.vmem %s7002_s21, %s5927_s1 }
 0xc9e   : > { %v1956_v58 = vpop.f32.mrb[16].mxu0 }
 0xc9f   : > { %v6265_v59 = vadd.f32 %v1956_v58, %v6217_v14  ;;  %v5151_v60 = vpop.f32.mrb[17].mxu0  ;;  %v2153_v14 = vsel %vm1375_vm4, %v2148_v11, 0 }
 0xca0   : > { %v1959_v61 = vpop.f32.mrb[18].mxu0 }
 0xca1   : > { %v5152_v62 = vpop.f32.mrb[19].mxu0 }
 0xd00   : > { %v2023_v2 = vpop.xlane.xlu0 %2022 }
 0xd01   : > { %5538 = vrcp.f32 %v2023_v2 }
 0xd08   : > { %v2138_v4 = vpop.xlane.xlu0 %2137 }
 0xd09   : > { %5540 = vrcp.f32 %v2138_v4 }
 0xd0b   : > { %v5539_v7 = vpop.eup %5538 }
 0xd0c   : > { %v2025_v8 = vmul.f32 %v5539_v7, %v5535_v53  ;;  %v2030_v9 = vpop.permute.xlu0 %2029 }
 0xd0d   : > { %v2035_v10 = vsel %vm1375_vm4, %v2030_v9, 0 }
 0xd0e   : > { %4870 = vst.msk [vmem:[%s6040_s20 + $0x8] sm:$0xff] %vm1308_vm3, %v2025_v8  ;;  %5160 = vmatpush3.bf16.msra.mxu0 %v2035_v10  ;;  %v2028_v12 = vpack.c.bf16 %v2025_v8, %v2025_v8 }
 0xd0f   : > { %5171 = vmatprep.subr.bf16.mxu0 %v5694_v3 }
 0xd10   : > { %v2285_v25 = vpop.permute.xlu0 %2284 }
 0xd11   : > { %5162 = vmatmul.mubr.msk.bf16.vlgmr.msra.gmra.mrb[20].mxu0 %vm1308_vm3, %v2028_v12  ;;  %v2290_v30 = vsel %vm1308_vm3, %v2285_v25, 0 }
 0xd12   : > { %5172 = vmatpush3.bf16.msra.mxu0 %v2153_v14  ;;  %5173 = vmatprep.mubr.msk.bf16.mxu0 %vm5695_vm1, %v5694_v3 }
 0xd13   : > { %v5541_v15 = vpop.eup %5540  ;;  %5183 = vmatprep.subr.bf16.mxu0 %v5694_v3 }
 0xd14   : > { %v6276_v16 = vmul.f32 %v5541_v15, %v5537_v55  ;;  %v2283_v32 = vpop.permute.xlu0 %2282 }
 0xd16   : > { %v2146_v17 = vpack.c.bf16 %v6276_v16, %v6276_v16 }
 0xd19   : > { %5174 = vmatmul.mubr.msk.bf16.vlgmr.msra.gmra.mrb[24].mxu0 %vm1308_vm3, %v2146_v17 }
 0xd1a   : > { %5184 = vmatpush3.bf16.msra.mxu0 %v6145_v1  ;;  %5185 = vmatprep.mubr.msk.bf16.mxu0 %vm5695_vm1, %v5694_v3 }
 0xd1b   : > { %5195 = vmatprep.subr.bf16.mxu0 %v5694_v3 }
 0xde4   : > { %v2071_v19 = vpop.f32.mrb[20].mxu0 }
 0xde5   : > { %v2077_v21 = vpack.c.bf16 %v2071_v19, %v2071_v19  ;;  %v5163_v23 = vpop.f32.mrb[21].mxu0 }
 0xde6   : > { %v2074_v22 = vpop.f32.mrb[22].mxu0 }
 0xde7   : > { %v5164_v24 = vpop.f32.mrb[23].mxu0  ;;  %5186 = vmatmul.mubr.msk.bf16.vlgmr.msra.gmra.mrb[28].mxu0 %vm1308_vm3, %v2077_v21 }
 0xde8   : > { %5197 = vmatprep.mubr.msk.bf16.mxu0 %vm5695_vm1, %v5694_v3 }
 0xdec   : > { %v2189_v26 = vpop.f32.mrb[24].mxu0 }
 0xded   : > { %v2195_v28 = vpack.c.bf16 %v2189_v26, %v2189_v26  ;;  %v5175_v29 = vpop.f32.mrb[25].mxu0  ;;  %v2613_v26 = vadd.f32 %v4885_v20, %v6265_v59 }
 0xdee   : > { %v2192_v1 = vpop.f32.mrb[26].mxu0 }
 0xdef   : > { %v5176_v31 = vpop.f32.mrb[27].mxu0  ;;  %5180 = vmatmul.mubr.msk.bf16.vlgmr.msra.gmra.mrb[40].mxu1 %vm1308_vm3, %v2195_v28  ;;  %v2615_v29 = vadd.f32 %v2613_v26, %v6062_v5 }
 0xdf0   : > { %5190 = vmatpush3.bf16.xpose.msra.mxu1 %v2290_v30  ;;  %5191 = vmatprep.mubr.msk.bf16.mxu1 %vm5695_vm1, %v5694_v3 }
 0xdf1   : > { %5201 = vmatprep.subr.bf16.mxu1 %v5694_v3  ;;  %v2619_v1 = vsel %vm1253_vm2, %v2615_v29, 0.0 }
 0xdf7   : > { %5192 = vmatmul.mubr.msk.bf16.vlgmr.msra.gmra.mrb[44].mxu1 %vm1308_vm3, %v2283_v32 }
 0xdf8   : > { %5202 = vmatpush3.bf16.msra.mxu1 %v6181_v41  ;;  %5203 = vmatprep.mubr.msk.bf16.mxu1 %vm5695_vm1, %v5694_v3 }
 0xdf9   : > { %5213 = vmatprep.subr.bf16.mxu1 %v5694_v3 }
 0xeba   : > { %v2276_v57 = vpop.f32.mrb[28].mxu0 }
 0xebb   : > { %v5187_v33 = vpop.f32.mrb[29].mxu0 }
 0xebc   : > { %v2279_v34 = vpop.f32.mrb[30].mxu0 }
 0xebd   : > { %v5188_v35 = vpop.f32.mrb[31].mxu0 }
 0xec2   : > { %v2233_v36 = vpop.f32.mrb[40].mxu1 }
 0xec3   : > { %v6298_v37 = vadd.f32 %v2276_v57, %v2233_v36  ;;  %v5181_v38 = vpop.f32.mrb[41].mxu1 }
 0xec4   : > { %v2236_v39 = vpop.f32.mrb[42].mxu1 }
 0xec5   : > { %v5182_v40 = vpop.f32.mrb[43].mxu1 }
 0xeca   : > { %v2326_v42 = vpop.f32.mrb[44].mxu1 }
 0xecb   : > { %v2332_v43 = vmul.f32 0.35355338, %v2326_v42  ;;  %v5193_v45 = vpop.f32.mrb[45].mxu1 }
 0xecc   : > { %v2329_v46 = vpop.f32.mrb[46].mxu1 }
 0xecd   : > { %v5194_v41 = vpop.f32.mrb[47].mxu1  ;;  %v2333_v47 = vsel %vm1303_vm5, -1e+30, %v2332_v43 }
 0xece   : > { %v2334_v13 = vsel %vm1308_vm3, %v2333_v47, -inf }
 0xecf   : > { %2335 = vmax.xlane.f32.xlu1 %v2334_v13 }
 0xee0   : > { %2446 = vrot.lane.b32.xlu1 %v6207_v0, %s5704_s4 }
 0xee4   : > { %2444 = vrot.lane.b32.xlu1 %v6207_v0, %s5705_s19 }
 0xf5c   : > { %v2336_v48 = vpop.xlane.xlu1 %2335 }
 0xf5d   : > { %v2337_v49 = vsub.f32 %v2333_v47, %v2336_v48 }
 0xf5f   : > { %v2338_v50 = vmul.f32 1.442695, %v2337_v49 }
 0xf60   : > { %v2447_v60 = vpop.permute.xlu1 %2446 }
 0xf61   : > { %5542 = vpow2.f32 %v2338_v50  ;;  %v2452_v62 = vsel %vm1308_vm3, %v2447_v60, 0 }
 0xf64   : > { %v2445_v2 = vpop.permute.xlu1 %2444 }
 0xf6b   : > { %v5543_v51 = vpop.eup %5542 }
 0xf6c   : > { %v2340_v52 = vsel %vm1308_vm3, %v5543_v51, 0.0 }
 0xf6d   : > { %2341 = vadd.xlane.f32.xlu0 %v2340_v52 }
 0xf83   : > { %2351 = vrot.lane.b32.xlu0 %v6207_v0, %s5703_s16  ;;  %s6991_s16 = scalar_lea.vmem %s6884_s15, %s5927_s1 }
 0xffa   : > { %v2342_v53 = vpop.xlane.xlu0 %2341 }
 0xffb   : > { %5544 = vrcp.f32 %v2342_v53 }
 0xffe   : > { %v2352_v54 = vpop.permute.xlu0 %2351 }
 0xfff   : > { %v2357_v55 = vsel %vm1375_vm4, %v2352_v54, 0 }
0x1000   : > { %5196 = vmatpush3.bf16.msra.mxu0 %v2357_v55 }
0x1001   : > { %5207 = vmatprep.subr.bf16.mxu0 %v5694_v3 }
0x1005   : > { %v5545_v56 = vpop.eup %5544 }
0x1006   : > { %v6312_v58 = vmul.f32 %v5545_v56, %v5543_v51 }
0x1008   : > { %v2350_v61 = vpack.c.bf16 %v6312_v58, %v6312_v58 }
0x100a   : > { %5198 = vmatmul.mubr.msk.bf16.vlgmr.msra.gmra.mrb[32].mxu0 %vm1308_vm3, %v2350_v61 }
0x100b   : > { %5208 = vmatpush3.bf16.xpose.msra.mxu0 %v2452_v62  ;;  %5209 = vmatprep.mubr.msk.bf16.mxu0 %vm5695_vm1, %v5694_v3  ;;  %v5504_v62 = vld [vmem:[%s5977_s24] sm:$0xff]  }
0x100c   : > { %5219 = vmatprep.subr.bf16.mxu0 %v5694_v3 }
0x1012   : > { %5210 = vmatmul.mubr.msk.bf16.vlgmr.msra.gmra.mrb[36].mxu0 %vm1308_vm3, %v2445_v2  ;;  %v1227_v2 = vld [vmem:[%s6989_s30] sm:$0xff] }
0x1013   : > { %5220 = vmatpush3.bf16.msra.mxu0 %v6241_v27  ;;  %5221 = vmatprep.mubr.msk.bf16.mxu0 %vm5695_vm1, %v5694_v3 }
0x1014   : > { %5233 = vmatprep.subr.bf16.mxu0 %v5694_v3 }
0x10dd   : > { %v2393_v4 = vpop.f32.mrb[32].mxu0 }
0x10de   : > { %v2399_v7 = vpack.c.bf16 %v2393_v4, %v2393_v4  ;;  %v5199_v8 = vpop.f32.mrb[33].mxu0  ;;  %v1228_v4 = vld [vmem:[%s6989_s30 + $0x8] sm:$0xff]  ;;  %s6993_s30 = sld [smem:[#allocation33_spill]] }
0x10df   : > { %v2396_v9 = vpop.f32.mrb[34].mxu0  ;;  %v5506_v8 = vld [vmem:[%s5968_s29] sm:$0xff]  }
0x10e0   : > { %v5200_v10 = vpop.f32.mrb[35].mxu0  ;;  %5204 = vmatmul.mubr.msk.bf16.vlgmr.msra.gmra.mrb[48].mxu1 %vm1308_vm3, %v2399_v7  ;;  %v2734_v7 = vpack.c.bf16 %v1228_v4, %v1227_v2  ;;  %v5507_v9 = vld [vmem:[%s5968_s29 + $0x8] sm:$0xff]   ;;  %s6990_s29 = scalar_lea.vmem %s6883_s14, %s5927_s1 }
0x10e1   : > { %5215 = vmatprep.mubr.msk.bf16.mxu1 %vm5695_vm1, %v5694_v3 }
0x10e5   : > { %v2488_v11 = vpop.f32.mrb[36].mxu0 }
0x10e6   : > { %v2494_v12 = vmul.f32 0.35355338, %v2488_v11  ;;  %v5211_v14 = vpop.f32.mrb[37].mxu0 }
0x10e7   : > { %v2491_v27 = vpop.f32.mrb[38].mxu0 }
0x10e8   : > { %v5212_v15 = vpop.f32.mrb[39].mxu0  ;;  %v2495_v17 = vsel %vm1303_vm5, -1e+30, %v2494_v12 }
0x10e9   : > { %v2496_v19 = vsel %vm1308_vm3, %v2495_v17, -inf }
0x10ea   : > { %2497 = vmax.xlane.f32.xlu0 %v2496_v19 }
0x1100   : > { %2513 = vrot.lane.b32.xlu0 %v6207_v0, %s5706_s27 }
0x1177   : > { %v2498_v21 = vpop.xlane.xlu0 %2497 }
0x1178   : > { %v2499_v23 = vsub.f32 %v2495_v17, %v2498_v21  ;;  %v4886_v21 = vld [vmem:[%s6990_s29] ss:$0 sm:$0xff]  ;;  %s6996_s29 = sld [smem:[#allocation23_spill]] }
0x117a   : > { %v2500_v22 = vmul.f32 1.442695, %v2499_v23 }
0x117b   : > { %v2514_v24 = vpop.permute.xlu0 %2513 }
0x117c   : > { %5546 = vpow2.f32 %v2500_v22  ;;  %v2519_v25 = vsel %vm1375_vm4, %v2514_v24, 0 }
0x117d   : > { %5214 = vmatpush3.bf16.msra.mxu1 %v2519_v25  ;;  %v4887_v25 = vld [vmem:[%s6991_s16] ss:$0 sm:$0xff]  ;;  %s7000_s16 = sld [smem:[#allocation37_spill]] }
0x117e   : > { %5225 = vmatprep.subr.bf16.mxu1 %v5694_v3 }
0x1183   : > { %s7001_s27 = scalar_lea.vmem %s7000_s16, %s5927_s1 }
0x1186   : > { %v5547_v28 = vpop.eup %5546 }
0x1187   : > { %v2502_v0 = vsel %vm1308_vm3, %v5547_v28, 0.0 }
0x1188   : > { %2503 = vadd.xlane.f32.xlu1 %v2502_v0 }
0x118c   : > { %2620 = vadd.xlane.f32.xlu1 %v2619_v1 }
0x11b3   : > { %v2437_v30 = vpop.f32.mrb[48].mxu1 }
0x11b4   : > { %v2443_v31 = vadd.f32 %v2437_v30, %v6298_v37  ;;  %v5205_v32 = vpop.f32.mrb[49].mxu1 }
0x11b5   : > { %v2440_v57 = vpop.f32.mrb[50].mxu1 }
0x11b6   : > { %v5206_v33 = vpop.f32.mrb[51].mxu1 }
0x1215   : > { %v2504_v34 = vpop.xlane.xlu1 %2503 }
0x1216   : > { %5548 = vrcp.f32 %v2504_v34 }
0x1219   : > { %v2621_v42 = vpop.xlane.xlu1 %2620 }
0x121a   : > { %v2626_v43 = vmul.f32 0.03125, %v2621_v42 }
0x121c   : > { %v2628_v13 = vsub.f32 %v2615_v29, %v2626_v43  ;;  %v4892_v29 = vld [vmem:[%s6992_s22] ss:$0 sm:$0xff] }
0x121e   : > { %v2630_v52 = vmul.f32 %v2628_v13, %v2628_v13 }
0x1220   : > { %v5549_v35 = vpop.eup %5548  ;;  %v2632_v53 = vsel %vm1253_vm2, %v2630_v52, 0.0 }
0x1221   : > { %v6346_v36 = vmul.f32 %v5549_v35, %v5547_v28 }
0x1223   : > { %v2512_v59 = vpack.c.bf16 %v6346_v36, %v6346_v36 }
0x1225   : > { %5216 = vmatmul.mubr.msk.bf16.vlgmr.msra.gmra.mrb[52].mxu1 %vm1308_vm3, %v2512_v59 }
0x1226   : > { %5229 = vmatprep.mubr.msk.bf16.mxu1 %vm5695_vm1, %v5694_v3  ;;  %5226 = vmatpush3.bf16.msra.mxu1 %v5506_v8 }
0x1227   : > { %5227 = vmatprep.subr.bf16.mxu1 %v5694_v3 }
0x122a   : > { %5228 = vmatpush3.bf16.msra.mxu1 %v5507_v9 }
0x122b   : > { %5241 = vmatprep.subr.bf16.mxu1 %v5694_v3 }
0x12f8   : > { %v2555_v5 = vpop.f32.mrb[52].mxu1 }
0x12f9   : > { %v2561_v38 = vpack.c.bf16 %v2555_v5, %v2555_v5  ;;  %v5217_v39 = vpop.f32.mrb[53].mxu1 }
0x12fa   : > { %v2558_v37 = vpop.f32.mrb[54].mxu1 }
0x12fb   : > { %v5218_v40 = vpop.f32.mrb[55].mxu1  ;;  %5222 = vmatmul.mubr.msk.bf16.vlgmr.msra.gmra.mrb[40].mxu0 %vm1308_vm3, %v2561_v38 }
0x12fc   : > { %5237 = vmatprep.mubr.msk.bf16.mxu0 %vm5695_vm1, %v5694_v3  ;;  %5234 = vmatpush3.bf16.msra.mxu0 %v5504_v62 }
0x12fd   : > { %5235 = vmatprep.subr.bf16.mxu0 %v5694_v3 }
0x13ce   : > { %v2599_v45 = vpop.f32.mrb[40].mxu0 }
0x13cf   : > { %v2605_v46 = vadd.f32 %v2599_v45, %v2443_v31  ;;  %v5223_v41 = vpop.f32.mrb[41].mxu0 }
0x13d0   : > { %v2602_v47 = vpop.f32.mrb[42].mxu0 }
0x13d1   : > { %v2614_v48 = vadd.f32 %v4885_v20, %v2605_v46  ;;  %v5224_v49 = vpop.f32.mrb[43].mxu0  ;;  %v2854_v47 = vlaneseq }
0x13d3   : > { %v2616_v50 = vadd.f32 %v2614_v48, %v6065_v6  ;;  %v5505_v6 = vld [vmem:[%s5977_s24 + $0x8] sm:$0xff]   ;;  %s6994_s24 = scalar_lea.vmem %s6993_s30, %s5927_s1  ;;  %v6427_v48 = vshrl.u32 %v2854_v47, 7 }
0x13d4   : > { %5236 = vmatpush3.bf16.msra.mxu0 %v5505_v6  ;;  %v4888_v59 = vld [vmem:[%s6994_s24] ss:$0 sm:$0xff] }
0x13d5   : > { %v2622_v51 = vsel %vm1253_vm2, %v2616_v50, 0.0  ;;  %5247 = vmatprep.subr.bf16.mxu0 %v5694_v3  ;;  %v2856_v49 = vsub.s32 0, %v6427_v48 }
0x13d6   : > { %2623 = vadd.xlane.f32.xlu1 %v2622_v51 }
0x13d7   : > { %5238 = vmatmul.mubr.msk.bf16.vlgmr.msra.gmra.mrb[44].mxu0 %vm1253_vm2, %v2734_v7 }
0x13d8   : > { %5249 = vmatprep.mubr.msk.bf16.mxu0 %vm5695_vm1, %v5694_v3 }
0x13da   : > { %2633 = vadd.xlane.f32.xlu1 %v2632_v53 }
0x1463   : > { %v2624_v54 = vpop.xlane.xlu1 %2623 }
0x1464   : > { %v2627_v55 = vmul.f32 0.03125, %v2624_v54 }
0x1466   : > { %v2629_v56 = vsub.f32 %v2616_v50, %v2627_v55  ;;  %v5707_v50 = vmov 0  }
0x1467   : > { %v2634_v10 = vpop.xlane.xlu1 %2633 }
0x1468   : > { %v2631_v60 = vmul.f32 %v2629_v56, %v2629_v56  ;;  %v2638_v11 = vmul.f32 0.03125, %v2634_v10 }
0x146a   : > { %v2635_v61 = vsel %vm1253_vm2, %v2631_v60, 0.0  ;;  %v2640_v12 = vadd.f32 1e-05, %v2638_v11 }
0x146b   : > { %2636 = vadd.xlane.f32.xlu1 %v2635_v61 }
0x146c   : > { %5550 = vrsqrt.f32 %v2640_v12 }
0x1476   : > { %v5551_v17 = vpop.eup %5550 }
0x1477   : > { %v2644_v19 = vmul.f32 %v5551_v17, %v2628_v13  ;;  %v2802_v13 = vld [vmem:[%s6995_s7] sm:$0x1] }
0x1478   : > { %vm2803_vm6 = vcmp.gt.f32.partialorder %v2802_v13, 0.5 }
0x1479   : > { %v2652_v22 = vmul.f32 %v4886_v21, %v2644_v19  ;;  %v2853_v51 = vsel %vm2803_vm6, 1, %v5707_v50 }
0x147a   : > { %v6433_v52 = vrot.slane %v2853_v51, %v2856_v49 }
0x147b   : > { %v6383_v26 = vadd.f32 %v4887_v25, %v2652_v22 }
0x147c   : > { %vm2858_vm7 = vcmp.eq.s32.totalorder %v6433_v52, 1 }
0x14aa   : > { %v2791_v1 = vpop.f32.mrb[44].mxu0 }
0x14ab   : > { %v2792_v30 = vadd.f32 %v4892_v29, %v2791_v1  ;;  %v5239_v31 = vpop.f32.mrb[45].mxu0 }
0x14ac   : > { %v2794_v32 = vpop.f32.mrb[46].mxu0 }
0x14ad   : > { %v6397_v57 = vpack.c.bf16 %v2792_v30, %v2792_v30  ;;  %v6399_v33 = vadd.f32 %v4892_v29, %v2794_v32  ;;  %v5240_v34 = vpop.f32.mrb[47].mxu0 }
0x14af   : > { %2926 = vrot.lane.b32.xlu0 %v6397_v57, %s5699_s0  ;;  %v2810_v35 = vsel %vm1308_vm3, %v6397_v57, 0 }
0x14f8   : > { %v2637_v14 = vpop.xlane.xlu1 %2636 }
0x14f9   : > { %v2639_v27 = vmul.f32 0.03125, %v2637_v14 }
0x14fb   : > { %v2641_v15 = vadd.f32 1e-05, %v2639_v27 }
0x14fd   : > { %5552 = vrsqrt.f32 %v2641_v15 }
0x1507   : > { %v5553_v23 = vpop.eup %5552 }
0x1508   : > { %v2645_v24 = vmul.f32 %v5553_v23, %v2629_v56 }
0x150a   : > { %v2653_v20 = vmul.f32 %v4886_v21, %v2645_v24 }
0x150c   : > { %v6385_v28 = vadd.f32 %v4887_v25, %v2653_v20 }
0x150e   : > { %v2666_v0 = vpack.c.bf16 %v6385_v28, %v6383_v26 }
0x1510   : > { %5230 = vmatmul.mubr.msk.bf16.vlgmr.msra.gmra.mrb[56].mxu1 %vm1253_vm2, %v2666_v0 }
0x1511   : > { %5243 = vmatprep.mubr.msk.bf16.mxu1 %vm5695_vm1, %v5694_v3  ;;  %5242 = vmatpush3.bf16.xpose.msra.mxu1 %v2810_v35 }
0x1512   : > { %5253 = vmatprep.subr.bf16.mxu1 %v5694_v3 }
0x1521   : > { %v2927_v38 = vpop.permute.xlu0 %2926 }
0x1522   : > { %v2932_v46 = vsel %vm1308_vm3, %v2927_v38, 0 }
0x15e3   : > { %v2723_v5 = vpop.f32.mrb[56].mxu1 }
0x15e4   : > { %v2724_v39 = vadd.f32 %v4888_v59, %v2723_v5  ;;  %v5231_v37 = vpop.f32.mrb[57].mxu1  ;;  %v2798_v5 = vld [vmem:[%s6996_s29] sm:$0xf] }
0x15e5   : > { %v2726_v40 = vpop.f32.mrb[58].mxu1  ;;  %v6470_v38 = vsel %vm1375_vm4, %v2798_v5, 0  ;;  %v2800_v5 = vld [vmem:[%s6996_s29 + $0x8] sm:$0xf] }
0x15e6   : > { %v6411_v42 = vpack.c.bf16 %v2724_v39, %v2724_v39  ;;  %v6413_v43 = vadd.f32 %v4888_v59, %v2726_v40  ;;  %v5232_v45 = vpop.f32.mrb[59].mxu1  ;;  %v2799_v39 = vld [vmem:[%s6996_s29 + $0x4] sm:$0xf] }
0x15e7   : > { %v6475_v37 = vsel %vm1375_vm4, %v2799_v39, 0  ;;  %v6519_v39 = vsel %vm1375_vm4, %v2800_v5, 0 }
0x15e8   : > { %2924 = vrot.lane.b32.xlu1 %v6411_v42, %s5699_s0  ;;  %5244 = vmatmul.mubr.msk.bf16.vlgmr.msra.gmra.mrb[60].mxu1 %vm1308_vm3, %v6411_v42 }
0x15e9   : > { %5254 = vmatpush3.bf16.xpose.msra.mxu1 %v2932_v46  ;;  %5255 = vmatprep.mubr.msk.bf16.mxu1 %vm5695_vm1, %v5694_v3 }
0x15ea   : > { %5265 = vmatprep.subr.bf16.mxu1 %v5694_v3 }
0x165a   : > { %v2925_v41 = vpop.permute.xlu1 %2924 }
0x165b   : > { %5256 = vmatmul.mubr.msk.bf16.vlgmr.msra.gmra.mrb[64].mxu1 %vm1308_vm3, %v2925_v41 }
0x165c   : > { %5267 = vmatprep.mubr.msk.bf16.mxu1 %vm5695_vm1, %v5694_v3  ;;  %5266 = vmatpush3.bf16.msra.mxu1 %v6475_v37 }
0x165d   : > { %5277 = vmatprep.subr.bf16.mxu1 %v5694_v3 }
0x16bb   : > { %v2846_v53 = vpop.f32.mrb[60].mxu1 }
0x16bc   : > { %v2852_v54 = vmul.f32 0.35355338, %v2846_v53  ;;  %v5245_v55 = vpop.f32.mrb[61].mxu1 }
0x16bd   : > { %v2849_v56 = vpop.f32.mrb[62].mxu1 }
0x16be   : > { %v5246_v60 = vpop.f32.mrb[63].mxu1  ;;  %v2859_v61 = vsel %vm2858_vm7, -1e+30, %v2852_v54 }
0x16bf   : > { %v2860_v62 = vsel %vm1308_vm3, %v2859_v61, -inf }
0x16c0   : > { %2861 = vmax.xlane.f32.xlu0 %v2860_v62 }
0x172e   : > { %v2968_v6 = vpop.f32.mrb[64].mxu1 }
0x172f   : > { %v2974_v2 = vmul.f32 0.35355338, %v2968_v6  ;;  %v5257_v4 = vpop.f32.mrb[65].mxu1 }
0x1730   : > { %v2971_v7 = vpop.f32.mrb[66].mxu1 }
0x1731   : > { %v5258_v8 = vpop.f32.mrb[67].mxu1  ;;  %v2975_v9 = vsel %vm2858_vm7, -1e+30, %v2974_v2 }
0x1732   : > { %v2976_v10 = vsel %vm1308_vm3, %v2975_v9, -inf }
0x1733   : > { %2977 = vmax.xlane.f32.xlu1 %v2976_v10 }
0x1744   : > { %2993 = vrot.lane.b32.xlu1 %v6397_v57, %s5698_s26 }
0x174d   : > { %v2862_v11 = vpop.xlane.xlu0 %2861 }
0x174e   : > { %v2863_v12 = vsub.f32 %v2859_v61, %v2862_v11 }
0x1750   : > { %v2864_v14 = vmul.f32 1.442695, %v2863_v12 }
0x1752   : > { %5554 = vpow2.f32 %v2864_v14 }
0x175c   : > { %v5555_v27 = vpop.eup %5554 }
0x175d   : > { %v2866_v15 = vsel %vm1308_vm3, %v5555_v27, 0.0 }
0x175e   : > { %2867 = vadd.xlane.f32.xlu0 %v2866_v15 }
0x17c0   : > { %v2978_v17 = vpop.xlane.xlu1 %2977 }
0x17c1   : > { %v2979_v19 = vsub.f32 %v2975_v9, %v2978_v17 }
0x17c3   : > { %v2980_v21 = vmul.f32 1.442695, %v2979_v19 }
0x17c4   : > { %v2994_v30 = vpop.permute.xlu1 %2993 }
0x17c5   : > { %5556 = vpow2.f32 %v2980_v21  ;;  %v2999_v32 = vsel %vm1375_vm4, %v2994_v30, 0 }
0x17cf   : > { %v5557_v23 = vpop.eup %5556 }
0x17d0   : > { %v2982_v22 = vsel %vm1308_vm3, %v5557_v23, 0.0 }
0x17d1   : > { %2983 = vadd.xlane.f32.xlu0 %v2982_v22 }
0x17e7   : > { %2874 = vrot.lane.b32.xlu0 %v6397_v57, %s5697_s23 }
0x17eb   : > { %v2868_v24 = vpop.xlane.xlu0 %2867  ;;  %3136 = vrot.lane.b32.xlu0 %v6397_v57, %s5702_s12 }
0x17ec   : > { %5558 = vrcp.f32 %v2868_v24 }
0x17ef   : > { %3134 = vrot.lane.b32.xlu0 %v6411_v42, %s5702_s12 }
0x17f6   : > { %v5559_v25 = vpop.eup %5558 }
0x17f7   : > { %v2870_v20 = vmul.f32 %v5559_v25, %v5555_v27 }
0x17f9   : > { %2871 = vst.msk [vmem:[%s6045_s28] sm:$0xff] %vm1308_vm3, %v2870_v20  ;;  %v2872_v31 = vpack.c.bf16 %v2870_v20, %v2870_v20 }
0x185e   : > { %v2984_v0 = vpop.xlane.xlu0 %2983 }
0x185f   : > { %5560 = vrcp.f32 %v2984_v0 }
0x1862   : > { %v2875_v29 = vpop.permute.xlu0 %2874 }
0x1863   : > { %v2880_v1 = vsel %vm1375_vm4, %v2875_v29, 0 }
0x1864   : > { %5248 = vmatpush3.bf16.msra.mxu0 %v2880_v1 }
0x1865   : > { %5259 = vmatprep.subr.bf16.mxu0 %v5694_v3 }
0x1866   : > { %v3137_v13 = vpop.permute.xlu0 %3136 }
0x1867   : > { %5250 = vmatmul.mubr.msk.bf16.vlgmr.msra.gmra.mrb[48].mxu0 %vm1308_vm3, %v2872_v31  ;;  %v3142_v56 = vsel %vm1308_vm3, %v3137_v13, 0 }
0x1868   : > { %5260 = vmatpush3.bf16.msra.mxu0 %v2999_v32  ;;  %5261 = vmatprep.mubr.msk.bf16.mxu0 %vm5695_vm1, %v5694_v3 }
0x1869   : > { %v5561_v34 = vpop.eup %5560  ;;  %5271 = vmatprep.subr.bf16.mxu0 %v5694_v3 }
0x186a   : > { %v6461_v35 = vmul.f32 %v5561_v34, %v5557_v23  ;;  %v3135_v61 = vpop.permute.xlu0 %3134 }
0x186c   : > { %v2992_v59 = vpack.c.bf16 %v6461_v35, %v6461_v35 }
0x186f   : > { %5262 = vmatmul.mubr.msk.bf16.vlgmr.msra.gmra.mrb[52].mxu0 %vm1308_vm3, %v2992_v59 }
0x1870   : > { %5273 = vmatprep.mubr.msk.bf16.mxu0 %vm5695_vm1, %v5694_v3  ;;  %5272 = vmatpush3.bf16.msra.mxu0 %v6470_v38 }
0x1871   : > { %5283 = vmatprep.subr.bf16.mxu0 %v5694_v3 }
0x193a   : > { %v2916_v40 = vpop.f32.mrb[48].mxu0 }
0x193b   : > { %v2922_v45 = vpack.c.bf16 %v2916_v40, %v2916_v40  ;;  %v5251_v46 = vpop.f32.mrb[49].mxu0 }
0x193c   : > { %v2919_v41 = vpop.f32.mrb[50].mxu0 }
0x193d   : > { %v5252_v47 = vpop.f32.mrb[51].mxu0  ;;  %5274 = vmatmul.mubr.msk.bf16.vlgmr.msra.gmra.mrb[56].mxu0 %vm1308_vm3, %v2922_v45 }
0x193e   : > { %5285 = vmatprep.mubr.msk.bf16.mxu0 %vm5695_vm1, %v5694_v3 }
0x1942   : > { %v3035_v51 = vpop.f32.mrb[52].mxu0 }
0x1943   : > { %v3041_v53 = vpack.c.bf16 %v3035_v51, %v3035_v51  ;;  %v5263_v54 = vpop.f32.mrb[53].mxu0 }
0x1944   : > { %v3038_v55 = vpop.f32.mrb[54].mxu0 }
0x1945   : > { %v5264_v60 = vpop.f32.mrb[55].mxu0  ;;  %5268 = vmatmul.mubr.msk.bf16.vlgmr.msra.gmra.mrb[68].mxu1 %vm1308_vm3, %v3041_v53 }
0x1946   : > { %5278 = vmatpush3.bf16.xpose.msra.mxu1 %v3142_v56  ;;  %5279 = vmatprep.mubr.msk.bf16.mxu1 %vm5695_vm1, %v5694_v3 }
0x1947   : > { %5289 = vmatprep.subr.bf16.mxu1 %v5694_v3 }
0x194d   : > { %5280 = vmatmul.mubr.msk.bf16.vlgmr.msra.gmra.mrb[72].mxu1 %vm1308_vm3, %v3135_v61  ;;  %v6533_v61 = vpack.c.bf16 %v6413_v43, %v6413_v43  ;;  %v6542_v43 = vpack.c.bf16 %v6399_v33, %v6399_v33 }
0x194e   : > { %5291 = vmatprep.mubr.msk.bf16.mxu1 %vm5695_vm1, %v5694_v3  ;;  %5290 = vmatpush3.bf16.msra.mxu1 %v6519_v39 }
0x194f   : > { %5301 = vmatprep.subr.bf16.mxu1 %v5694_v3  ;;  %v3473_v33 = vsel %vm1308_vm3, %v6542_v43, 0 }
0x1a10   : > { %v3128_v62 = vpop.f32.mrb[56].mxu0 }
0x1a11   : > { %v5275_v6 = vpop.f32.mrb[57].mxu0 }
0x1a12   : > { %v3131_v2 = vpop.f32.mrb[58].mxu0 }
0x1a13   : > { %v5276_v4 = vpop.f32.mrb[59].mxu0 }
0x1a18   : > { %v3082_v7 = vpop.f32.mrb[68].mxu1 }
0x1a19   : > { %v6491_v8 = vadd.f32 %v3128_v62, %v3082_v7  ;;  %v5269_v9 = vpop.f32.mrb[69].mxu1 }
0x1a1a   : > { %v3085_v10 = vpop.f32.mrb[70].mxu1 }
0x1a1b   : > { %v5270_v11 = vpop.f32.mrb[71].mxu1 }
0x1a20   : > { %v3178_v12 = vpop.f32.mrb[72].mxu1 }
0x1a21   : > { %v3184_v14 = vmul.f32 0.35355338, %v3178_v12  ;;  %v5281_v27 = vpop.f32.mrb[73].mxu1 }
0x1a22   : > { %v3181_v15 = vpop.f32.mrb[74].mxu1 }
0x1a23   : > { %v5282_v17 = vpop.f32.mrb[75].mxu1  ;;  %v3185_v19 = vsel %vm2858_vm7, -1e+30, %v3184_v14 }
0x1a24   : > { %v3186_v21 = vsel %vm1308_vm3, %v3185_v19, -inf }
0x1a25   : > { %3187 = vmax.xlane.f32.xlu1 %v3186_v21 }
0x1a36   : > { %3301 = vrot.lane.b32.xlu1 %v6397_v57, %s5705_s19 }
0x1a3a   : > { %3299 = vrot.lane.b32.xlu1 %v6411_v42, %s5705_s19 }
0x1ab2   : > { %v3188_v23 = vpop.xlane.xlu1 %3187 }
0x1ab3   : > { %v3189_v22 = vsub.f32 %v3185_v19, %v3188_v23 }
0x1ab5   : > { %v3190_v24 = vmul.f32 1.442695, %v3189_v22  ;;  %v2801_v22 = vld [vmem:[%s6996_s29 + $0xc] sm:$0xf]  ;;  %s7005_s29 = sld [smem:[#allocation9_spill]] }
0x1ab6   : > { %v3302_v31 = vpop.permute.xlu1 %3301 }
0x1ab7   : > { %5562 = vpow2.f32 %v3190_v24  ;;  %v3307_v34 = vsel %vm1308_vm3, %v3302_v31, 0  ;;  %v6572_v24 = vsel %vm1375_vm4, %v2801_v22, 0 }
0x1aba   : > { %v3300_v59 = vpop.permute.xlu1 %3299 }
0x1ac1   : > { %v5563_v25 = vpop.eup %5562 }
0x1ac2   : > { %v3192_v20 = vsel %vm1308_vm3, %v5563_v25, 0.0 }
0x1ac3   : > { %3193 = vadd.xlane.f32.xlu0 %v3192_v20 }
0x1ad9   : > { %3203 = vrot.lane.b32.xlu0 %v6397_v57, %s5701_s8 }
0x1b50   : > { %v3194_v0 = vpop.xlane.xlu0 %3193 }
0x1b51   : > { %5564 = vrcp.f32 %v3194_v0 }
0x1b54   : > { %v3204_v29 = vpop.permute.xlu0 %3203 }
0x1b55   : > { %v3209_v1 = vsel %vm1375_vm4, %v3204_v29, 0 }
0x1b56   : > { %5284 = vmatpush3.bf16.msra.mxu0 %v3209_v1 }
0x1b57   : > { %5295 = vmatprep.subr.bf16.mxu0 %v5694_v3 }
0x1b5b   : > { %v5565_v42 = vpop.eup %5564 }
0x1b5c   : > { %v6505_v30 = vmul.f32 %v5565_v42, %v5563_v25  ;;  %v4908_v25 = vld [vmem:[%s6995_s7 + $0x1] sm:$0x1]  ;;  %s5710_s7 = smov 16  }
0x1b5d   : > { %vm3466_vm8 = vcmp.gt.f32.partialorder %v4908_v25, 0.5 }
0x1b5e   : > { %v3202_v32 = vpack.c.bf16 %v6505_v30, %v6505_v30 }
0x1b60   : > { %5286 = vmatmul.mubr.msk.bf16.vlgmr.msra.gmra.mrb[60].mxu0 %vm1308_vm3, %v3202_v32 }
0x1b61   : > { %5296 = vmatpush3.bf16.xpose.msra.mxu0 %v3307_v34  ;;  %5297 = vmatprep.mubr.msk.bf16.mxu0 %vm5695_vm1, %v5694_v3 }
0x1b62   : > { %5307 = vmatprep.subr.bf16.mxu0 %v5694_v3 }
0x1b68   : > { %5298 = vmatmul.mubr.msk.bf16.vlgmr.msra.gmra.mrb[64].mxu0 %vm1308_vm3, %v3300_v59 }
0x1b69   : > { %5309 = vmatprep.mubr.msk.bf16.mxu0 %vm5695_vm1, %v5694_v3  ;;  %5308 = vmatpush3.bf16.msra.mxu0 %v6572_v24 }
0x1b6a   : > { %5319 = vmatprep.subr.bf16.mxu0 %v5694_v3 }
0x1c33   : > { %v3245_v40 = vpop.f32.mrb[60].mxu0 }
0x1c34   : > { %v3251_v45 = vpack.c.bf16 %v3245_v40, %v3245_v40  ;;  %v5287_v46 = vpop.f32.mrb[61].mxu0 }
0x1c35   : > { %v3248_v41 = vpop.f32.mrb[62].mxu0 }
0x1c36   : > { %v5288_v47 = vpop.f32.mrb[63].mxu0  ;;  %5292 = vmatmul.mubr.msk.bf16.vlgmr.msra.gmra.mrb[76].mxu1 %vm1308_vm3, %v3251_v45 }
0x1c37   : > { %5303 = vmatprep.mubr.msk.bf16.mxu1 %vm5695_vm1, %v5694_v3 }
0x1c3b   : > { %v3343_v13 = vpop.f32.mrb[64].mxu0 }
0x1c3c   : > { %v3349_v51 = vmul.f32 0.35355338, %v3343_v13  ;;  %v5299_v53 = vpop.f32.mrb[65].mxu0 }
0x1c3d   : > { %v3346_v54 = vpop.f32.mrb[66].mxu0 }
0x1c3e   : > { %v5300_v55 = vpop.f32.mrb[67].mxu0  ;;  %v3350_v56 = vsel %vm2858_vm7, -1e+30, %v3349_v51 }
0x1c3f   : > { %v3351_v60 = vsel %vm1308_vm3, %v3350_v56, -inf }
0x1c40   : > { %3352 = vmax.xlane.f32.xlu0 %v3351_v60 }
0x1c56   : > { %3368 = vrot.lane.b32.xlu0 %v6397_v57, %s5704_s4 }
0x1c5a   : > { %3588 = vrot.lane.b32.xlu0 %v6533_v61, %s5699_s0 }
0x1ccd   : > { %v3353_v62 = vpop.xlane.xlu0 %3352 }
0x1cce   : > { %v3354_v6 = vsub.f32 %v3350_v56, %v3353_v62 }
0x1cd0   : > { %v3355_v2 = vmul.f32 1.442695, %v3354_v6 }
0x1cd1   : > { %v3369_v4 = vpop.permute.xlu0 %3368 }
0x1cd2   : > { %5566 = vpow2.f32 %v3355_v2  ;;  %v3374_v52 = vsel %vm1375_vm4, %v3369_v4, 0 }
0x1cd3   : > { %5302 = vmatpush3.bf16.msra.mxu1 %v3374_v52 }
0x1cd4   : > { %5313 = vmatprep.subr.bf16.mxu1 %v5694_v3 }
0x1cd5   : > { %v3589_v23 = vpop.permute.xlu0 %3588 }
0x1cdc   : > { %v5567_v7 = vpop.eup %5566 }
0x1cdd   : > { %v3357_v57 = vsel %vm1308_vm3, %v5567_v7, 0.0 }
0x1cde   : > { %3358 = vadd.xlane.f32.xlu1 %v3357_v57 }
0x1cef   : > { %3590 = vrot.lane.b32.xlu1 %v6542_v43, %s5699_s0  ;;  %s6997_s0 = scalar_lea.vmem %s6882_s13, %s5927_s1 }
0x1d09   : > { %v3292_v9 = vpop.f32.mrb[76].mxu1 }
0x1d0a   : > { %v6547_v10 = vadd.f32 %v3292_v9, %v6491_v8  ;;  %v5293_v11 = vpop.f32.mrb[77].mxu1 }
0x1d0b   : > { %v3295_v12 = vpop.f32.mrb[78].mxu1 }
0x1d0c   : > { %v5294_v14 = vpop.f32.mrb[79].mxu1 }
0x1d6b   : > { %v3359_v27 = vpop.xlane.xlu1 %3358 }
0x1d6c   : > { %5568 = vrcp.f32 %v3359_v27 }
0x1d6f   : > { %v3591_v8 = vpop.permute.xlu1 %3590 }
0x1d70   : > { %v3596_v21 = vsel %vm1308_vm3, %v3591_v8, 0 }
0x1d76   : > { %v5569_v15 = vpop.eup %5568 }
0x1d77   : > { %v6549_v17 = vmul.f32 %v5569_v15, %v5567_v7 }
0x1d79   : > { %v3367_v19 = vpack.c.bf16 %v6549_v17, %v6549_v17 }
0x1d7b   : > { %5304 = vmatmul.mubr.msk.bf16.vlgmr.msra.gmra.mrb[80].mxu1 %vm1308_vm3, %v3367_v19 }
0x1d7c   : > { %5314 = vmatpush3.bf16.xpose.msra.mxu1 %v3473_v33  ;;  %5315 = vmatprep.mubr.msk.bf16.mxu1 %vm5695_vm1, %v5694_v3 }
0x1d7d   : > { %5325 = vmatprep.subr.bf16.mxu1 %v5694_v3 }
0x1d83   : > { %5316 = vmatmul.mubr.msk.bf16.vlgmr.msra.gmra.mrb[84].mxu1 %vm1308_vm3, %v6533_v61 }
0x1d84   : > { %5326 = vmatpush3.bf16.xpose.msra.mxu1 %v3596_v21  ;;  %5327 = vmatprep.mubr.msk.bf16.mxu1 %vm5695_vm1, %v5694_v3 }
0x1d85   : > { %5337 = vmatprep.subr.bf16.mxu1 %v5694_v3 }
0x1d8b   : > { %5328 = vmatmul.mubr.msk.bf16.vlgmr.msra.gmra.mrb[88].mxu1 %vm1308_vm3, %v3589_v23 }
0x1d8c   : > { %5338 = vmatpush3.bf16.msra.mxu1 %v6475_v37  ;;  %5339 = vmatprep.mubr.msk.bf16.mxu1 %vm5695_vm1, %v5694_v3  ;;  %v3516_v37 = vsel %vm3466_vm8, 1, %v5707_v50 }
0x1d8d   : > { %5349 = vmatprep.subr.bf16.mxu1 %v5694_v3  ;;  %v6581_v31 = vrot.slane %v3516_v37, %v2856_v49 }
0x1d8f   : > { %vm3521_vm9 = vcmp.eq.s32.totalorder %v6581_v31, 1  ;;  %v4925_v31 = vld [vmem:[%s6997_s0] ss:$0 sm:$0xff]  ;;  %s7006_s0 = scalar_lea.vmem %s6887_s18, %s5927_s1 }
0x1e4e   : > { %v3410_v20 = vpop.f32.mrb[80].mxu1 }
0x1e4f   : > { %v3416_v0 = vpack.c.bf16 %v3410_v20, %v3410_v20  ;;  %v5305_v29 = vpop.f32.mrb[81].mxu1 }
0x1e50   : > { %v3413_v1 = vpop.f32.mrb[82].mxu1 }
0x1e51   : > { %v5306_v42 = vpop.f32.mrb[83].mxu1  ;;  %5310 = vmatmul.mubr.msk.bf16.vlgmr.msra.gmra.mrb[68].mxu0 %vm1308_vm3, %v3416_v0 }
0x1e52   : > { %5321 = vmatprep.mubr.msk.bf16.mxu0 %vm5695_vm1, %v5694_v3 }
0x1e56   : > { %v3509_v32 = vpop.f32.mrb[84].mxu1 }
0x1e57   : > { %v3515_v34 = vmul.f32 0.35355338, %v3509_v32  ;;  %v5317_v59 = vpop.f32.mrb[85].mxu1 }
0x1e58   : > { %v3512_v5 = vpop.f32.mrb[86].mxu1 }
0x1e59   : > { %v5318_v40 = vpop.f32.mrb[87].mxu1  ;;  %v3522_v50 = vsel %vm3521_vm9, -1e+30, %v3515_v34 }
0x1e5a   : > { %v3523_v45 = vsel %vm1308_vm3, %v3522_v50, -inf }
0x1e5b   : > { %3524 = vmax.xlane.f32.xlu1 %v3523_v45 }
0x1e5e   : > { %v3632_v46 = vpop.f32.mrb[88].mxu1 }
0x1e5f   : > { %v3638_v48 = vmul.f32 0.35355338, %v3632_v46  ;;  %v5329_v49 = vpop.f32.mrb[89].mxu1 }
0x1e60   : > { %v3635_v41 = vpop.f32.mrb[90].mxu1 }
0x1e61   : > { %v5330_v47 = vpop.f32.mrb[91].mxu1  ;;  %v3639_v13 = vsel %vm3521_vm9, -1e+30, %v3638_v48 }
0x1e62   : > { %v3640_v51 = vsel %vm1308_vm3, %v3639_v13, -inf }
0x1e63   : > { %3641 = vmax.xlane.f32.xlu0 %v3640_v51 }
0x1ee8   : > { %v3525_v53 = vpop.xlane.xlu1 %3524 }
0x1ee9   : > { %v3526_v54 = vsub.f32 %v3522_v50, %v3525_v53 }
0x1eeb   : > { %v3527_v55 = vmul.f32 1.442695, %v3526_v54 }
0x1eed   : > { %5570 = vpow2.f32 %v3527_v55 }
0x1ef0   : > { %v3642_v56 = vpop.xlane.xlu0 %3641 }
0x1ef1   : > { %v3643_v60 = vsub.f32 %v3639_v13, %v3642_v56 }
0x1ef3   : > { %v3644_v62 = vmul.f32 1.442695, %v3643_v60 }
0x1ef5   : > { %5572 = vpow2.f32 %v3644_v62 }
0x1ef7   : > { %v5571_v6 = vpop.eup %5570 }
0x1ef8   : > { %v3529_v2 = vsel %vm1308_vm3, %v5571_v6, 0.0 }
0x1ef9   : > { %3530 = vadd.xlane.f32.xlu0 %v3529_v2 }
0x1eff   : > { %v5573_v4 = vpop.eup %5572 }
0x1f00   : > { %v3646_v52 = vsel %vm1308_vm3, %v5573_v4, 0.0 }
0x1f01   : > { %3647 = vadd.xlane.f32.xlu1 %v3646_v52 }
0x1f0f   : > { %3538 = vrot.lane.b32.xlu0 %v6542_v43, %s5697_s23 }
0x1f12   : > { %3657 = vrot.lane.b32.xlu1 %v6542_v43, %s5698_s26 }
0x1f13   : > { %3792 = vrot.lane.b32.xlu0 %v6533_v61, %s5702_s12 }
0x1f16   : > { %3794 = vrot.lane.b32.xlu1 %v6542_v43, %s5702_s12 }
0x1f24   : > { %v3457_v7 = vpop.f32.mrb[68].mxu0 }
0x1f25   : > { %v6603_v57 = vadd.f32 %v3457_v7, %v6547_v10  ;;  %v5311_v9 = vpop.f32.mrb[69].mxu0 }
0x1f26   : > { %v3460_v11 = vpop.f32.mrb[70].mxu0 }
0x1f27   : > { %v5312_v12 = vpop.f32.mrb[71].mxu0 }
0x1f86   : > { %v3531_v14 = vpop.xlane.xlu0 %3530 }
0x1f87   : > { %5574 = vrcp.f32 %v3531_v14 }
0x1f8a   : > { %v3539_v27 = vpop.permute.xlu0 %3538 }
0x1f8b   : > { %v3544_v15 = vsel %vm1375_vm4, %v3539_v27, 0 }
0x1f8c   : > { %5320 = vmatpush3.bf16.msra.mxu0 %v3544_v15 }
0x1f8d   : > { %5331 = vmatprep.subr.bf16.mxu0 %v5694_v3 }
0x1f8e   : > { %v3648_v19 = vpop.xlane.xlu1 %3647  ;;  %v3793_v45 = vpop.permute.xlu0 %3792 }
0x1f8f   : > { %5576 = vrcp.f32 %v3648_v19 }
0x1f91   : > { %v5575_v33 = vpop.eup %5574 }
0x1f92   : > { %v3533_v8 = vmul.f32 %v5575_v33, %v5571_v6  ;;  %v3658_v21 = vpop.permute.xlu1 %3657 }
0x1f93   : > { %v3663_v23 = vsel %vm1375_vm4, %v3658_v21, 0 }
0x1f94   : > { %4910 = vst.msk [vmem:[%s6045_s28 + $0x8] sm:$0xff] %vm1308_vm3, %v3533_v8  ;;  %v3536_v10 = vpack.c.bf16 %v3533_v8, %v3533_v8 }
0x1f96   : > { %5322 = vmatmul.mubr.msk.bf16.vlgmr.msra.gmra.mrb[72].mxu0 %vm1308_vm3, %v3536_v10  ;;  %v3795_v32 = vpop.permute.xlu1 %3794 }
0x1f97   : > { %5332 = vmatpush3.bf16.msra.mxu0 %v3663_v23  ;;  %5333 = vmatprep.mubr.msk.bf16.mxu0 %vm5695_vm1, %v5694_v3  ;;  %v3800_v40 = vsel %vm1308_vm3, %v3795_v32, 0 }
0x1f98   : > { %5343 = vmatprep.subr.bf16.mxu0 %v5694_v3 }
0x1f99   : > { %v5577_v22 = vpop.eup %5576 }
0x1f9a   : > { %v6614_v25 = vmul.f32 %v5577_v22, %v5573_v4 }
0x1f9c   : > { %v3656_v20 = vpack.c.bf16 %v6614_v25, %v6614_v25 }
0x1f9e   : > { %5334 = vmatmul.mubr.msk.bf16.vlgmr.msra.gmra.mrb[76].mxu0 %vm1308_vm3, %v3656_v20 }
0x1f9f   : > { %5344 = vmatpush3.bf16.msra.mxu0 %v6470_v38  ;;  %5345 = vmatprep.mubr.msk.bf16.mxu0 %vm5695_vm1, %v5694_v3 }
0x1fa0   : > { %5355 = vmatprep.subr.bf16.mxu0 %v5694_v3 }
0x2069   : > { %v3580_v0 = vpop.f32.mrb[72].mxu0 }
0x206a   : > { %v3586_v29 = vpack.c.bf16 %v3580_v0, %v3580_v0  ;;  %v5323_v37 = vpop.f32.mrb[73].mxu0 }
0x206b   : > { %v3583_v1 = vpop.f32.mrb[74].mxu0 }
0x206c   : > { %v5324_v42 = vpop.f32.mrb[75].mxu0  ;;  %5346 = vmatmul.mubr.msk.bf16.vlgmr.msra.gmra.mrb[80].mxu0 %vm1308_vm3, %v3586_v29 }
0x206d   : > { %5357 = vmatprep.mubr.msk.bf16.mxu0 %vm5695_vm1, %v5694_v3 }
0x2071   : > { %v3699_v34 = vpop.f32.mrb[76].mxu0 }
0x2072   : > { %v3705_v59 = vpack.c.bf16 %v3699_v34, %v3699_v34  ;;  %v5335_v5 = vpop.f32.mrb[77].mxu0 }
0x2073   : > { %v3702_v38 = vpop.f32.mrb[78].mxu0 }
0x2074   : > { %v5336_v50 = vpop.f32.mrb[79].mxu0  ;;  %5340 = vmatmul.mubr.msk.bf16.vlgmr.msra.gmra.mrb[92].mxu1 %vm1308_vm3, %v3705_v59 }
0x2075   : > { %5350 = vmatpush3.bf16.xpose.msra.mxu1 %v3800_v40  ;;  %5351 = vmatprep.mubr.msk.bf16.mxu1 %vm5695_vm1, %v5694_v3 }
0x2076   : > { %5361 = vmatprep.subr.bf16.mxu1 %v5694_v3 }
0x207c   : > { %5352 = vmatmul.mubr.msk.bf16.vlgmr.msra.gmra.mrb[96].mxu1 %vm1308_vm3, %v3793_v45  ;;  %v4123_v45 = vadd.f32 %v4925_v31, %v6603_v57 }
0x207d   : > { %5362 = vmatpush3.bf16.msra.mxu1 %v6519_v39  ;;  %5363 = vmatprep.mubr.msk.bf16.mxu1 %vm5695_vm1, %v5694_v3 }
0x207e   : > { %5373 = vmatprep.subr.bf16.mxu1 %v5694_v3 }
0x213f   : > { %v3786_v46 = vpop.f32.mrb[80].mxu0 }
0x2140   : > { %v5347_v48 = vpop.f32.mrb[81].mxu0 }
0x2141   : > { %v3789_v49 = vpop.f32.mrb[82].mxu0  ;;  %v4125_v48 = vadd.f32 %v4123_v45, %v6383_v26 }
0x2142   : > { %v5348_v41 = vpop.f32.mrb[83].mxu0 }
0x2143   : > { %v4129_v49 = vsel %vm1253_vm2, %v4125_v48, 0.0 }
0x2147   : > { %v3743_v47 = vpop.f32.mrb[92].mxu1 }
0x2148   : > { %v6636_v13 = vadd.f32 %v3786_v46, %v3743_v47  ;;  %v5341_v51 = vpop.f32.mrb[93].mxu1 }
0x2149   : > { %v3746_v53 = vpop.f32.mrb[94].mxu1 }
0x214a   : > { %v5342_v54 = vpop.f32.mrb[95].mxu1 }
0x214f   : > { %v3836_v55 = vpop.f32.mrb[96].mxu1 }
0x2150   : > { %v3842_v56 = vmul.f32 0.35355338, %v3836_v55  ;;  %v5353_v60 = vpop.f32.mrb[97].mxu1 }
0x2151   : > { %v3839_v62 = vpop.f32.mrb[98].mxu1 }
0x2152   : > { %v5354_v39 = vpop.f32.mrb[99].mxu1  ;;  %v3843_v6 = vsel %vm3521_vm9, -1e+30, %v3842_v56 }
0x2153   : > { %v3844_v2 = vsel %vm1308_vm3, %v3843_v6, -inf }
0x2154   : > { %3845 = vmax.xlane.f32.xlu1 %v3844_v2 }
0x2165   : > { %3956 = vrot.lane.b32.xlu1 %v6542_v43, %s5705_s19 }
0x2169   : > { %3954 = vrot.lane.b32.xlu1 %v6533_v61, %s5705_s19 }
0x21e1   : > { %v3846_v4 = vpop.xlane.xlu1 %3845 }
0x21e2   : > { %v3847_v52 = vsub.f32 %v3843_v6, %v3846_v4 }
0x21e4   : > { %v3848_v7 = vmul.f32 1.442695, %v3847_v52 }
0x21e5   : > { %v3957_v19 = vpop.permute.xlu1 %3956 }
0x21e6   : > { %5578 = vpow2.f32 %v3848_v7  ;;  %v3962_v8 = vsel %vm1308_vm3, %v3957_v19, 0 }
0x21e9   : > { %v3955_v21 = vpop.permute.xlu1 %3954 }
0x21f0   : > { %v5579_v9 = vpop.eup %5578 }
0x21f1   : > { %v3850_v11 = vsel %vm1308_vm3, %v5579_v9, 0.0 }
0x21f2   : > { %3851 = vadd.xlane.f32.xlu0 %v3850_v11 }
0x2208   : > { %3861 = vrot.lane.b32.xlu0 %v6542_v43, %s5701_s8  ;;  %s5708_s8 = smov 8  }
0x227f   : > { %v3852_v12 = vpop.xlane.xlu0 %3851 }
0x2280   : > { %5580 = vrcp.f32 %v3852_v12 }
0x2283   : > { %v3862_v14 = vpop.permute.xlu0 %3861 }
0x2284   : > { %v3867_v27 = vsel %vm1375_vm4, %v3862_v14, 0 }
0x2285   : > { %5356 = vmatpush3.bf16.msra.mxu0 %v3867_v27 }
0x2286   : > { %5367 = vmatprep.subr.bf16.mxu0 %v5694_v3 }
0x228a   : > { %v5581_v61 = vpop.eup %5580 }
0x228b   : > { %v6650_v15 = vmul.f32 %v5581_v61, %v5579_v9 }
0x228d   : > { %v3860_v33 = vpack.c.bf16 %v6650_v15, %v6650_v15 }
0x228f   : > { %5358 = vmatmul.mubr.msk.bf16.vlgmr.msra.gmra.mrb[84].mxu0 %vm1308_vm3, %v3860_v33 }
0x2290   : > { %5368 = vmatpush3.bf16.xpose.msra.mxu0 %v3962_v8  ;;  %5369 = vmatprep.mubr.msk.bf16.mxu0 %vm5695_vm1, %v5694_v3 }
0x2291   : > { %5379 = vmatprep.subr.bf16.mxu0 %v5694_v3 }
0x2297   : > { %5370 = vmatmul.mubr.msk.bf16.vlgmr.msra.gmra.mrb[88].mxu0 %vm1308_vm3, %v3955_v21 }
0x2298   : > { %5380 = vmatpush3.bf16.msra.mxu0 %v6572_v24  ;;  %5381 = vmatprep.mubr.msk.bf16.mxu0 %vm5695_vm1, %v5694_v3 }
0x2299   : > { %5393 = vmatprep.subr.bf16.mxu0 %v5694_v3 }
0x2362   : > { %v3903_v10 = vpop.f32.mrb[84].mxu0 }
0x2363   : > { %v3909_v23 = vpack.c.bf16 %v3903_v10, %v3903_v10  ;;  %v5359_v22 = vpop.f32.mrb[85].mxu0 }
0x2364   : > { %v3906_v20 = vpop.f32.mrb[86].mxu0 }
0x2365   : > { %v5360_v0 = vpop.f32.mrb[87].mxu0  ;;  %5364 = vmatmul.mubr.msk.bf16.vlgmr.msra.gmra.mrb[100].mxu1 %vm1308_vm3, %v3909_v23 }
0x2366   : > { %5375 = vmatprep.mubr.msk.bf16.mxu1 %vm5695_vm1, %v5694_v3  ;;  %v5509_v0 = vld [vmem:[%s6019_s6 + $0x8] sm:$0xff]  }
0x236a   : > { %v3998_v29 = vpop.f32.mrb[88].mxu0 }
0x236b   : > { %v4004_v37 = vmul.f32 0.35355338, %v3998_v29  ;;  %v5371_v1 = vpop.f32.mrb[89].mxu0  ;;  %v5510_v29 = vld [vmem:[%s6029_s17] sm:$0xff]  }
0x236c   : > { %v4001_v24 = vpop.f32.mrb[90].mxu0 }
0x236d   : > { %v5372_v42 = vpop.f32.mrb[91].mxu0  ;;  %v4005_v32 = vsel %vm3521_vm9, -1e+30, %v4004_v37  ;;  %v5511_v37 = vld [vmem:[%s6029_s17 + $0x8] sm:$0xff]  }
0x236e   : > { %v4006_v34 = vsel %vm1308_vm3, %v4005_v32, -inf }
0x236f   : > { %4007 = vmax.xlane.f32.xlu0 %v4006_v34 }
0x2385   : > { %4023 = vrot.lane.b32.xlu0 %v6542_v43, %s5704_s4  ;;  %s6998_s4 = sld [smem:[#allocation36_spill]] }
0x238b   : > { %s6999_s19 = scalar_lea.vmem %s6998_s4, %s5927_s1  ;;  %s7007_s4 = sld [smem:[#allocation38_spill]] }
0x23fc   : > { %v4008_v59 = vpop.xlane.xlu0 %4007 }
0x23fd   : > { %v4009_v5 = vsub.f32 %v4005_v32, %v4008_v59 }
0x23ff   : > { %v4010_v38 = vmul.f32 1.442695, %v4009_v5 }
0x2400   : > { %v4024_v40 = vpop.permute.xlu0 %4023 }
0x2401   : > { %5582 = vpow2.f32 %v4010_v38  ;;  %v4029_v50 = vsel %vm1375_vm4, %v4024_v40, 0  ;;  %v4926_v40 = vld [vmem:[%s6999_s19] ss:$0 sm:$0xff]  ;;  %s7008_s19 = scalar_lea.vmem %s7007_s4, %s5927_s1  ;;  %s7012_s1 = sand.u32 1, %s7009_s3  }
0x2402   : > { %5374 = vmatpush3.bf16.msra.mxu1 %v4029_v50  ;;  %s6816_s21 = scalar_lea.sflag [#allocation3], %s7012_s1 }
0x2403   : > { %5385 = vmatprep.subr.bf16.mxu1 %v5694_v3 }
0x240b   : > { %v5583_v46 = vpop.eup %5582 }
0x240c   : > { %v4012_v43 = vsel %vm1308_vm3, %v5583_v46, 0.0 }
0x240d   : > { %4013 = vadd.xlane.f32.xlu1 %v4012_v43 }
0x2411   : > { %4130 = vadd.xlane.f32.xlu1 %v4129_v49 }
0x2438   : > { %v3947_v41 = vpop.f32.mrb[100].mxu1 }
0x2439   : > { %v3953_v47 = vadd.f32 %v3947_v41, %v6636_v13  ;;  %v5365_v51 = vpop.f32.mrb[101].mxu1 }
0x243a   : > { %v3950_v53 = vpop.f32.mrb[102].mxu1  ;;  %v5513_v51 = vld [vmem:[%s6029_s17 + $0x18] sm:$0xff]  }
0x243b   : > { %v5366_v54 = vpop.f32.mrb[103].mxu1  ;;  %v5514_v53 = vld [vmem:[%s6029_s17 + $0x20] sm:$0xff]  }
0x243c   : > { %v5515_v54 = vld [vmem:[%s6029_s17 + $0x28] sm:$0xff]  }
0x249a   : > { %v4014_v55 = vpop.xlane.xlu1 %4013 }
0x249b   : > { %5584 = vrcp.f32 %v4014_v55  ;;  %v5516_v55 = vld [vmem:[%s6029_s17 + $0x30] sm:$0xff]  }
0x249e   : > { %v4131_v2 = vpop.xlane.xlu1 %4130 }
0x249f   : > { %v4135_v4 = vmul.f32 0.03125, %v4131_v2 }
0x24a1   : > { %v4137_v12 = vsub.f32 %v4125_v48, %v4135_v4 }
0x24a3   : > { %v4139_v33 = vmul.f32 %v4137_v12, %v4137_v12 }
0x24a5   : > { %v5585_v56 = vpop.eup %5584  ;;  %v4141_v8 = vsel %vm1253_vm2, %v4139_v33, 0.0  ;;  %v4932_v33 = vld [vmem:[%s1193_s2] ss:$0 sm:$0xff]  ;;  %s5709_s2 = smov 24  }
0x24a6   : > { %v6684_v60 = vmul.f32 %v5585_v56, %v5583_v46  ;;  %v4927_v46 = vld [vmem:[%s7001_s27] ss:$0 sm:$0xff]  ;;  %v5517_v56 = vld [vmem:[%s6029_s17 + $0x38] sm:$0xff]  }
0x24a8   : > { %v4022_v57 = vpack.c.bf16 %v6684_v60, %v6684_v60 }
0x24aa   : > { %5376 = vmatmul.mubr.msk.bf16.vlgmr.msra.gmra.mrb[104].mxu1 %vm1308_vm3, %v4022_v57  ;;  %v4928_v57 = vld [vmem:[%s7003_s25] ss:$0 sm:$0xff]  ;;  %s5598_s25 = scalar_lea.vmem %s6810_s10, 256 }
0x24ab   : > { %5389 = vmatprep.mubr.msk.bf16.mxu1 %vm5695_vm1, %v5694_v3  ;;  %p5599_p1 = scmp.ne.s32.totalorder %s6810_s10, %s5598_s25 }
0x24ad   : > { %p5600_p2 = pnand %p5599_p1, %p5897_p3 }
0x24af   : > { %p5601_p4 = pneg %p5600_p2 }
0x257d   : > { %v4065_v26 = vpop.f32.mrb[104].mxu1 }
0x257e   : > { %v4071_v62 = vpack.c.bf16 %v4065_v26, %v4065_v26  ;;  %v5377_v39 = vpop.f32.mrb[105].mxu1 }
0x257f   : > { %v4068_v13 = vpop.f32.mrb[106].mxu1 }
0x2580   : > { %v5378_v6 = vpop.f32.mrb[107].mxu1  ;;  %5382 = vmatmul.mubr.msk.bf16.vlgmr.msra.gmra.mrb[92].mxu0 %vm1308_vm3, %v4071_v62 }
0x2581   : > { %5409 = vmatprep.mubr.msk.bf16.mxu0 %vm5695_vm1, %v5694_v3  ;;  %5394 = vmatpush3.bf16.msra.mxu0 %v5510_v29 }
0x2582   : > { %5395 = vmatprep.subr.bf16.mxu0 %v5694_v3 }
0x2585   : > { %5396 = vmatpush3.bf16.msra.mxu0 %v5511_v37 }
0x2586   : > { %5397 = vmatprep.subr.bf16.mxu0 %v5694_v3 }
0x2653   : > { %v4109_v52 = vpop.f32.mrb[92].mxu0 }
0x2654   : > { %v4115_v7 = vadd.f32 %v4109_v52, %v3953_v47  ;;  %v5383_v9 = vpop.f32.mrb[93].mxu0  ;;  %v5512_v47 = vld [vmem:[%s6029_s17 + $0x10] sm:$0xff]   ;;  %s5711_s17 = smov [#allocation2]  }
0x2655   : > { %v4112_v11 = vpop.f32.mrb[94].mxu0  ;;  %5398 = vmatpush3.bf16.msra.mxu0 %v5512_v47  ;;  %s5602_s30 = sshll.u32 %s5711_s17, 4  ;;  %s5603_s30 = int_to_ptr.vmem [resolvable:$false] %s5602_s30 }
0x2656   : > { %v4124_v14 = vadd.f32 %v4925_v31, %v4115_v7  ;;  %v5384_v27 = vpop.f32.mrb[95].mxu0  ;;  %5399 = vmatprep.subr.bf16.mxu0 %v5694_v3  ;;  %s5604_s24 = scalar_lea.vmem %s5603_s30, 512  ;;  %p5605_p5 = scmp.lt.s32.totalorder %s6810_s10, %s5603_s30 }
0x2657   : > { %p5606_p6 = scmp.lt.s32.totalorder %s5604_s24, %s5598_s25 }
0x2658   : > { %v4126_v61 = vadd.f32 %v4124_v14, %v6385_v28  ;;  %v5508_v28 = vld [vmem:[%s6019_s6] sm:$0xff]  }
0x2659   : > { %5386 = vmatpush3.bf16.msra.mxu1 %v5508_v28  ;;  %5400 = vmatpush3.bf16.msra.mxu0 %v5513_v51  ;;  %p5607_p7 = por %p5606_p6, %p5605_p5 }
0x265a   : > { %v4132_v19 = vsel %vm1253_vm2, %v4126_v61, 0.0  ;;  %5387 = vmatprep.subr.bf16.mxu1 %v5694_v3  ;;  %5401 = vmatprep.subr.bf16.mxu0 %v5694_v3 }
0x265b   : > { %4133 = vadd.xlane.f32.xlu1 %v4132_v19  ;;  %p5608_p8 = pnand %p5607_p7, %p5601_p4 }
0x265d   : > { %5388 = vmatpush3.bf16.msra.mxu1 %v5509_v0  ;;  %5402 = vmatpush3.bf16.msra.mxu0 %v5514_v53 }
0x265e   : > { %5403 = vmatprep.subr.bf16.mxu0 %v5694_v3 }
0x265f   : > { %4142 = vadd.xlane.f32.xlu1 %v4141_v8 }
0x2661   : > { %5404 = vmatpush3.bf16.msra.mxu0 %v5515_v54  ;;  %v4942_v54 = vld [vmem:[%s7008_s19] ss:$0 sm:$0xff] }
0x2662   : > { %5405 = vmatprep.subr.bf16.mxu0 %v5694_v3 }
0x2665   : > { %5406 = vmatpush3.bf16.msra.mxu0 %v5516_v55 }
0x2666   : > { %5407 = vmatprep.subr.bf16.mxu0 %v5694_v3 }
0x2669   : > { %5408 = vmatpush3.bf16.msra.mxu0 %v5517_v56 }
0x26e8   : > { %v4134_v21 = vpop.xlane.xlu1 %4133 }
0x26e9   : > { %v4136_v10 = vmul.f32 0.03125, %v4134_v21 }
0x26eb   : > { %v4138_v23 = vsub.f32 %v4126_v61, %v4136_v10 }
0x26ec   : > { %v4143_v1 = vpop.xlane.xlu1 %4142 }
0x26ed   : > { %v4140_v22 = vmul.f32 %v4138_v23, %v4138_v23  ;;  %v4147_v24 = vmul.f32 0.03125, %v4143_v1 }
0x26ef   : > { %v4144_v20 = vsel %vm1253_vm2, %v4140_v22, 0.0 }
0x26f0   : > { %4145 = vadd.xlane.f32.xlu1 %v4144_v20 }
0x2701   : > { %1484 = vrot.lane.b32.xlu1 %v6140_v63, %s5708_s8  ;;  %v4149_v63 = vadd.f32 1e-05, %v4147_v24 }
0x2703   : > { %5586 = vrsqrt.f32 %v4149_v63 }
0x270d   : > { %v5587_v5 = vpop.eup %5586 }
0x270e   : > { %v4153_v38 = vmul.f32 %v5587_v5, %v4137_v12 }
0x2710   : > { %v4161_v31 = vmul.f32 %v4926_v40, %v4153_v38 }
0x2712   : > { %v6719_v48 = vadd.f32 %v4927_v46, %v4161_v31 }
0x277d   : > { %v4146_v42 = vpop.xlane.xlu1 %4145 }
0x277e   : > { %v4148_v32 = vmul.f32 0.03125, %v4146_v42 }
0x2780   : > { %v4150_v34 = vadd.f32 1e-05, %v4148_v32 }
0x2781   : > { %v1485_v59 = vpop.permute.xlu1 %1484 }
0x2782   : > { %5588 = vrsqrt.f32 %v4150_v34  ;;  %1488 = vst.msk [vmem:[%s6040_s20] sm:$0xff] %vm1487_vm10, %v1485_v59 }
0x278c   : > { %v5589_v50 = vpop.eup %5588 }
0x278d   : > { %v4154_v45 = vmul.f32 %v5589_v50, %v4138_v23 }
0x278f   : > { %v4162_v43 = vmul.f32 %v4926_v40, %v4154_v45 }
0x2791   : > { %v6721_v49 = vadd.f32 %v4927_v46, %v4162_v43 }
0x2793   : > { %v4175_v41 = vpack.c.bf16 %v6721_v49, %v6719_v48 }
0x2795   : > { %5390 = vmatmul.mubr.msk.bf16.vlgmr.msra.gmra.mrb[108].mxu1 %vm1253_vm2, %v4175_v41 }
0x2868   : > { %v4232_v26 = vpop.f32.mrb[108].mxu1 }
0x2869   : > { %v4233_v62 = vadd.f32 %v4928_v57, %v4232_v26  ;;  %v5391_v39 = vpop.f32.mrb[109].mxu1 }
0x286a   : > { %v4235_v13 = vpop.f32.mrb[110].mxu1 }
0x286b   : > { %v4241_v6 = vmul.f32 0.70710677, %v4233_v62  ;;  %v4236_v2 = vadd.f32 %v4928_v57, %v4235_v13  ;;  %v5392_v4 = vpop.f32.mrb[111].mxu1  ;;  %v4239_v11 = vmul.f32 0.5, %v4233_v62 }
0x286d   : > { %5590 = verf.f32 %v4241_v6  ;;  %v4242_v52 = vmul.f32 0.70710677, %v4236_v2  ;;  %v4240_v12 = vmul.f32 0.5, %v4236_v2 }
0x286f   : > { %5592 = verf.f32 %v4242_v52 }
0x2877   : > { %v5591_v7 = vpop.eup %5590 }
0x2878   : > { %v4245_v3 = vadd.f32 1.0, %v5591_v7 }
0x2879   : > { %v5593_v9 = vpop.eup %5592 }
0x287a   : > { %v4246_v14 = vadd.f32 1.0, %v5593_v9  ;;  %v4247_v27 = vmul.f32 %v4245_v3, %v4239_v11 }
0x287c   : > { %v4248_v61 = vmul.f32 %v4246_v14, %v4240_v12 }
0x287e   : > { %v4265_v19 = vpack.c.bf16 %v4248_v61, %v4247_v27 }
0x2880   : > { %5410 = vmatmul.mubr.bf16.vlgmr.msra.gmra.mrb[96].mxu0 %v4265_v19 }
0x2953   : > { %v4355_v8 = vpop.f32.mrb[96].mxu0 }
0x2954   : > { %v4356_v21 = vadd.f32 %v4932_v33, %v4355_v8  ;;  %v5411_v10 = vpop.f32.mrb[97].mxu0 }
0x2955   : > { %v4358_v23 = vpop.f32.mrb[98].mxu0 }
0x2956   : > { %v4359_v22 = vadd.f32 %v4932_v33, %v4358_v23  ;;  %v5412_v20 = vpop.f32.mrb[99].mxu0  ;;  %v4362_v28 = vadd.f32 %v4356_v21, %v6719_v48 }
0x2958   : > { %v4366_v0 = vsel %vm1253_vm2, %v4362_v28, 0.0  ;;  %v4363_v29 = vadd.f32 %v4359_v22, %v6721_v49 }
0x2959   : > { %4367 = vadd.xlane.f32.xlu0 %v4366_v0 }
0x295a   : > { %v4369_v37 = vsel %vm1253_vm2, %v4363_v29, 0.0 }
0x295b   : > { %4370 = vadd.xlane.f32.xlu1 %v4369_v37 }
0x296c   : > { %2142 = vrot.lane.b32.xlu1 %v6276_v16, %s5708_s8 }
0x296f   : > { %2988 = vrot.lane.b32.xlu0 %v6461_v35, %s5708_s8 }
0x2970   : > { %3652 = vrot.lane.b32.xlu1 %v6614_v25, %s5708_s8 }
0x2973   : > { %1861 = vrot.lane.b32.xlu0 %v6219_v18, %s5709_s2 }
0x2974   : > { %1695 = vrot.lane.b32.xlu1 %v6185_v44, %s5710_s7 }
0x2977   : > { %3363 = vrot.lane.b32.xlu0 %v6549_v17, %s5709_s2 }
0x2978   : > { %2346 = vrot.lane.b32.xlu1 %v6312_v58, %s5710_s7 }
0x297c   : > { %3198 = vrot.lane.b32.xlu1 %v6505_v30, %s5710_s7 }
0x2980   : > { %3856 = vrot.lane.b32.xlu1 %v6650_v15, %s5710_s7 }
0x29e6   : > { %v4368_v16 = vpop.xlane.xlu0 %4367 }
0x29e7   : > { %v4372_v35 = vmul.f32 0.03125, %v4368_v16 }
0x29e8   : > { %v4371_v25 = vpop.xlane.xlu1 %4370 }
0x29e9   : > { %v4374_v1 = vsub.f32 %v4362_v28, %v4372_v35  ;;  %v4373_v24 = vmul.f32 0.03125, %v4371_v25 }
0x29ea   : > { %v2989_v18 = vpop.permute.xlu0 %2988 }
0x29eb   : > { %v4375_v63 = vsub.f32 %v4363_v29, %v4373_v24  ;;  %2991 = vst.msk [vmem:[%s6045_s28] sm:$0xff] %vm1487_vm10, %v2989_v18  ;;  %v4376_v44 = vmul.f32 %v4374_v1, %v4374_v1 }
0x29ec   : > { %v2143_v17 = vpop.permute.xlu1 %2142 }
0x29ed   : > { %4873 = vst.msk [vmem:[%s6040_s20 + $0x8] sm:$0xff] %vm1487_vm10, %v2143_v17  ;;  %v4378_v58 = vsel %vm1253_vm2, %v4376_v44, 0.0  ;;  %v4377_v30 = vmul.f32 %v4375_v63, %v4375_v63 }
0x29ee   : > { %4379 = vadd.xlane.f32.xlu1 %v4378_v58  ;;  %v1862_v34 = vpop.permute.xlu0 %1861 }
0x29ef   : > { %v4381_v42 = vsel %vm1253_vm2, %v4377_v30, 0.0 }
0x29f0   : > { %v3653_v15 = vpop.permute.xlu1 %3652 }
0x29f1   : > { %4913 = vst.msk [vmem:[%s6045_s28 + $0x8] sm:$0xff] %vm1487_vm10, %v3653_v15 }
0x29f2   : > { %4382 = vadd.xlane.f32.xlu1 %v4381_v42  ;;  %v3364_v38 = vpop.permute.xlu0 %3363 }
0x29f4   : > { %v1696_v32 = vpop.permute.xlu1 %1695 }
0x29f5   : > { %1699 = vst.msk [vmem:[%s6040_s20] sm:$0xff] %vm1698_vm11, %v1696_v32 }
0x29f6   : > { %1865 = vst.msk [vmem:[%s6040_s20] sm:$0xff] %vm1864_vm12, %v1862_v34 }
0x29f8   : > { %v2347_v59 = vpop.permute.xlu1 %2346 }
0x29f9   : > { %4878 = vst.msk [vmem:[%s6040_s20 + $0x8] sm:$0xff] %vm1698_vm11, %v2347_v59 }
0x29fc   : > { %v3199_v5 = vpop.permute.xlu1 %3198 }
0x29fd   : > { %3201 = vst.msk [vmem:[%s6045_s28] sm:$0xff] %vm1698_vm11, %v3199_v5 }
0x29fe   : > { %3366 = vst.msk [vmem:[%s6045_s28] sm:$0xff] %vm1864_vm12, %v3364_v38 }
0x2a00   : > { %v3857_v40 = vpop.permute.xlu1 %3856 }
0x2a01   : > { %4918 = vst.msk [vmem:[%s6045_s28 + $0x8] sm:$0xff] %vm1698_vm11, %v3857_v40 }
0x2a03   : > { %2508 = vrot.lane.b32.xlu1 %v6346_v36, %s5709_s2 }
0x2a07   : > { %4018 = vrot.lane.b32.xlu1 %v6684_v60, %s5709_s2  ;;  %v4941_v60 = vld [vmem:[%s7006_s0] ss:$0 sm:$0xff] }
0x2a7b   : > { %v4380_v50 = vpop.xlane.xlu1 %4379 }
0x2a7c   : > { %v4384_v31 = vmul.f32 0.03125, %v4380_v50 }
0x2a7e   : > { %v4386_v45 = vadd.f32 1e-05, %v4384_v31 }
0x2a7f   : > { %v4383_v46 = vpop.xlane.xlu1 %4382 }
0x2a80   : > { %5594 = vrsqrt.f32 %v4386_v45  ;;  %v4385_v43 = vmul.f32 0.03125, %v4383_v46 }
0x2a82   : > { %v4387_v41 = vadd.f32 1e-05, %v4385_v43 }
0x2a83   : > { %v2509_v47 = vpop.permute.xlu1 %2508 }
0x2a84   : > { %5596 = vrsqrt.f32 %v4387_v41  ;;  %4882 = vst.msk [vmem:[%s6040_s20 + $0x8] sm:$0xff] %vm1864_vm12, %v2509_v47 }
0x2a87   : > { %v4019_v51 = vpop.permute.xlu1 %4018 }
0x2a88   : > { %4922 = vst.msk [vmem:[%s6045_s28 + $0x8] sm:$0xff] %vm1864_vm12, %v4019_v51  ;;  %s4955_s28 = sshll.u32 %s7005_s29, 8 }
0x2a89   : > { %s6807_s22 = scalar_lea.hbm %s7011_s5, %s4955_s28 }
0x2a8a   : > { %v5595_v36 = vpop.eup %5594 }
0x2a8b   : > { %v4390_v53 = vmul.f32 %v5595_v36, %v4374_v1 }
0x2a8d   : > { %v4398_v55 = vmul.f32 %v4941_v60, %v4390_v53 }
0x2a8e   : > { %v5597_v56 = vpop.eup %5596 }
0x2a8f   : > { %v4406_v57 = vadd.f32 %v4942_v54, %v4398_v55  ;;  %v4391_v26 = vmul.f32 %v5597_v56, %v4375_v63 }
0x2a91   : > { %v4399_v62 = vmul.f32 %v4941_v60, %v4391_v26  ;;  %v4408_v39 = vadd.f32 %v4406_v57, %v6719_v48 }
0x2a93   : > { %v4407_v13 = vadd.f32 %v4942_v54, %v4399_v62  ;;  %4410 = vst.msk [vmem:[%s6048_s9] sm:$0xff] %vm1253_vm2, %v4408_v39 }
0x2a95   : > { %v4409_v6 = vadd.f32 %v4407_v13, %v6721_v49 }
0x2a97   : > { %4411 = vst.msk [vmem:[%s6048_s9 + $0x8] sm:$0xff] %vm1253_vm2, %v4409_v6 }
0x2a98   : > { %5611 = shalt.err (!%p5608_p8)
}
0x2a99   : > { %s5612_s9 = scalar_lea.hbm %s6807_s22, 256  ;;  %s5616_s29 = scalar_lea.hbm %s7011_s5, 512 }
0x2a9a   : > { %p5613_p10 = scmp.ne.s32.totalorder %s6807_s22, %s5612_s9  ;;  %p5617_p13 = scmp.lt.u32.totalorder %s6807_s22, %s7011_s5 }
0x2a9b   : > { %p5618_p0 = scmp.lt.u32.totalorder %s5616_s29, %s5612_s9  ;;  %p5620_p2 = scmp.lt.u32.totalorder %s5612_s9, %s6807_s22 }
0x2a9c   : > { %p5614_p11 = pnand %p5613_p10, %p5897_p3 }
0x2a9d   : > { %p5619_p1 = por %p5618_p0, %p5617_p13 }
0x2a9e   : > { %p5615_p12 = pneg %p5614_p11 }
0x2a9f   : > { %p5621_p4 = por %p5620_p2, %p5619_p1 }
0x2aa1   : > { %p5622_p5 = pnand %p5621_p4, %p5615_p12 }
0x2aa3   : > { %5625 = shalt.err (!%p5622_p5)
}
0x2aa4   : > { %s5712_s0 = smov 128  }
0x2aa5   : > { %5413 = dma.vmem_to_hbm [thread:$0]  (%p5897_p3), %s6810_s10, 256, %s6807_s22, %s6816_s21, %s5712_s0, %s5712_s0, %s5708_s8  }
0x2aa6 PF: > { %s7013_s6 = sld [smem:[#allocation12_spill]]  ;;  %s7014_s12 = sld [smem:[#allocation5_spill]] }
0x2aac   : > { %p5419_p6 = scmp.ge.s32.totalorder %s7013_s6, 2  ;;  %s4467_s19 = sand.u32 1, %s7014_s12  }
0x2aad   : > { %s4468_s3 = scalar_lea.sflag [#allocation3], %s4467_s19 }
0x2aae   : > { %p5416_p7 = pnand %p5419_p6, %p5907_p9 }
0x2ab0   : > { %5659 = dma.done.wait (!%p5416_p7), %s4468_s3, 256  }
0x2ab1   : > { %5661 = vsyncadd (!%p5416_p7), %s4468_s3, 4294967040  ;;  %s40_s0 = sadd.s32 1, %s7013_s6   ;;  %s7016_s27 = sld [smem:[#allocation6_spill]] }
0x2ab2   : > { %p37_p8 = scmp.ge.s32.totalorder %s40_s0, 6   ;;  %s7017_s3 = sld [smem:[#allocation7_spill]] }
0x2ab3   : > { %s7018_s7 = sld [smem:[#allocation17_spill]]  ;;  %s7019_s28 = sld [smem:[#allocation10_spill]] }
0x2ab4   : > { %s7020_s8 = sld [smem:[#allocation11_spill]]  ;;  %s7021_s4 = sld [smem:[#allocation13_spill]] }
0x2ab5   : > { %s7022_s29 = sld [smem:[#allocation15_spill]]  ;;  %39 = sbr.rel (!%p37_p8) target bundleno = 28 (0x1c), region = 248 }
0x2abc   :  { %4497 = vsyncpa [#allocation3], 1 }
0x2abd   :  { %4499 = vsyncpa [#allocation3 + $0x1], 1 }

</bundles_post_ra>
